<compile_context>
chip_gen: v7x
topology: tpu7x:2x2x1
jax: 0.10.0
libtpu: 0.0.40
codegen_flags: <defaults>
</compile_context>

<pallas_src>
import jax
import jax.numpy as jnp
from jax.experimental import pallas as pl
from jax.experimental.pallas import tpu as pltpu

# ---- model constants (implied by the PyTorch module) ------------------------
C_IN = 1500          # conv1 in_channels
L_IN = 40            # input length (forced by fc1 in_features = 18)
C1, K1 = 16, 3       # conv1
C2, K2 = 32, 2       # conv2
L1 = L_IN - K1 + 1   # 38  conv1 output length
LP = L1 // 2         # 19  MaxPool1d(2) output length
L2 = LP - K2 + 1     # 18  conv2 output length (== fc1 in_features)
LF = 2 * L2 - 1      # 35  stride-1 conv2 rows covering the 18 strided outputs
F1, F2 = 300, 2      # fc1 / fc2 out_features

BATCH_TILE = 16      # samples per grid step (bf16 x-block ~1.9 MB, fits every gen)


def cnn_kernel(x_ref, w1_ref, b1_ref, w2_ref, b2_ref, wf1_ref, wf2_ref, bf2_ref,
               o_ref, y_ref, o2t_ref):
    bt = o_ref.shape[2] // C2

    # ---- conv1 for the whole batch tile: ONE MXU matmul (bf16 -> f32 acc) ----
    # x block is (bt*40, 1500) time-major per sample; w1 is (1500, 48) with the
    # 3 conv1 taps concatenated along the output (lane) dim.
    y_ref[...] = jnp.dot(x_ref[...], w1_ref[...],
                         preferred_element_type=jnp.float32)       # (bt*40, 48)

    b1 = b1_ref[...]      # (1, 16)
    w2 = w2_ref[...]      # (16, 64)  [conv2 tap0 | conv2 tap1]
    b2 = b2_ref[...]      # (1, 32)

    # ones row matching the fc1-bias column folded into wf1 (column LF).
    o2t_ref[LF:LF + 1, :] = jnp.ones((1, bt * C2), jnp.float32)

    # ---- cheap per-sample head: tap combine + ReLU + pool + conv2 ------------
    # Each sample's (35, 32) conv2 result lands lane-dense in the (36, bt*32)
    # fc1-activation slab at lane offset b*32 (static, aligned slices only).
    for b in range(bt):
        yb = y_ref[b * L_IN:(b + 1) * L_IN, :]                     # (40, 48) aligned

        # conv1 tap combine + bias + ReLU -> (38, 16) time-major
        out1 = jnp.maximum(
            yb[0:L1, 0:C1]
            + yb[1:L1 + 1, C1:2 * C1]
            + yb[2:L1 + 2, 2 * C1:3 * C1]
            + b1, 0.0)

        # MaxPool1d(2): m[t] = max(out1[t], out1[t+1]); the even-t selection is
        # folded into the zero-interleaved fc1 weights.
        m = jnp.maximum(out1[0:L1 - 1, :], out1[1:L1, :])          # (37, 16)

        # conv2 (k=2) at stride 1 over all rows + bias + ReLU -> (35, 32);
        # only even rows are "real" conv2 outputs, odd rows get zero fc1 weight.
        mm = jnp.dot(m, w2, preferred_element_type=jnp.float32)    # (37, 64)
        out2 = jnp.maximum(mm[0:LF, 0:C2] + mm[2:LF + 2, C2:2 * C2] + b2, 0.0)

        o2t_ref[0:LF, b * C2:(b + 1) * C2] = out2

    # ---- batched tail: two lane-dense matmuls for the whole tile -------------
    # fc1 + ReLU: (300, 36) @ (36, bt*32); bias comes from the ones row.
    h = jnp.maximum(
        jnp.dot(wf1_ref[...], o2t_ref[...],
                preferred_element_type=jnp.float32), 0.0)           # (300, bt*32)
    # fc2: (2, 300) @ (300, bt*32) -> single lane-dense (2, bt*32) store.
    o_ref[0] = (jnp.dot(wf2_ref[...], h, preferred_element_type=jnp.float32)
                + bf2_ref[...])


def supervised_1d_cnn(x, params, batch_tile=BATCH_TILE):
    """x: (N, 1500, 40) float32 in PyTorch NCL layout. Returns (N, 32, 2)."""
    w1, b1, w2, b2, wf1, bf1, wf2, bf2 = params
    n = x.shape[0]

    # Keep >= 2 grid steps whenever possible (v7x has 2 TensorCores and the grid
    # axis is "parallel"), and keep the tile a multiple of 8 so every in-kernel
    # slice stays sublane/lane aligned.
    half8 = -(-(-(-n // 2)) // 8) * 8          # round_up(cdiv(n, 2), 8)
    bt = max(8, min(batch_tile, half8))
    num_blocks = -(-n // bt)
    n_pad = num_blocks * bt

    # ---- one-time wrapper-side re-layout (XLA ops, outside the kernel) ------
    # bf16 cast BEFORE the transpose so the materialized time-major copy is
    # half-size.
    # TODO(synk): if upstream can provide activations time-major (N, 40, 1500),
    # this transpose copy (the remaining extra HBM pass on the input) goes away.
    x_t = jnp.transpose(x.astype(jnp.bfloat16), (0, 2, 1))      # (N, 40, 1500)
    if n_pad != n:
        x_t = jnp.pad(x_t, ((0, n_pad - n), (0, 0), (0, 0)))
    x2d = x_t.reshape(n_pad * L_IN, C_IN)                        # (Np*40, 1500) bf16

    w1c = jnp.transpose(w1, (1, 2, 0)).reshape(C_IN, K1 * C1).astype(jnp.bfloat16)
    b1_r = b1.reshape(1, C1).astype(jnp.float32)
    w2c = jnp.concatenate([jnp.transpose(w2[:, :, 0]),
                           jnp.transpose(w2[:, :, 1])], axis=1)  # (16, 64)
    b2_r = b2.reshape(1, C2)
    # fc1 weights: stride-2 pool-row selection folded in (zeros on odd columns)
    # and fc1 bias folded in as an extra column (matched by a ones row in-kernel).
    wf1_exp = jnp.zeros((F1, LF), jnp.float32).at[:, 0::2].set(wf1)
    wf1_aug = jnp.concatenate([wf1_exp, bf1.reshape(F1, 1)], axis=1)   # (300, 36)
    bf2_r = bf2.reshape(F2, 1)

    rows = bt * L_IN
    grid_spec = pltpu.PrefetchScalarGridSpec(
        num_scalar_prefetch=0,
        grid=(num_blocks,),
        in_specs=[
            pl.BlockSpec((rows, C_IN), lambda i: (i, 0)),        # x batch tile (bf16)
            pl.BlockSpec((C_IN, K1 * C1), lambda i: (0, 0)),     # conv1 W (resident)
            pl.BlockSpec((1, C1), lambda i: (0, 0)),             # conv1 b
            pl.BlockSpec((C1, 2 * C2), lambda i: (0, 0)),        # conv2 W [tap0|tap1]
            pl.BlockSpec((1, C2), lambda i: (0, 0)),             # conv2 b
            pl.BlockSpec((F1, LF + 1), lambda i: (0, 0)),        # fc1 W (+bias col)
            pl.BlockSpec((F2, F1), lambda i: (0, 0)),            # fc2 W
            pl.BlockSpec((F2, 1), lambda i: (0, 0)),             # fc2 b
        ],
        out_specs=pl.BlockSpec((1, F2, bt * C2), lambda i: (i, 0, 0)),
        scratch_shapes=[
            pltpu.VMEM((rows, K1 * C1), jnp.float32),            # conv1 result
            pltpu.VMEM((LF + 1, bt * C2), jnp.float32),          # fc1 activation slab
        ],
    )

    flops_per_sample = 2 * (L_IN * C_IN * K1 * C1            # conv1
                            + (L1 - 1) * C1 * 2 * C2         # conv2 (stride-1 form)
                            + F1 * (LF + 1) * C2             # fc1 (incl. zero cols)
                            + F2 * F1 * C2)                  # fc2
    weight_bytes = (2 * C_IN * K1 * C1
                    + 4 * (C1 + C1 * 2 * C2 + C2 + F1 * (LF + 1) + F2 * F1 + F2))
    cost = pl.CostEstimate(
        flops=int(n_pad * flops_per_sample),
        transcendentals=0,
        bytes_accessed=int(n_pad * L_IN * C_IN * 2 + weight_bytes
                           + n_pad * F2 * C2 * 4))

    out = pl.pallas_call(
        cnn_kernel,
        out_shape=jax.ShapeDtypeStruct((num_blocks, F2, bt * C2), jnp.float32),
        grid_spec=grid_spec,
        compiler_params=pltpu.CompilerParams(
            dimension_semantics=("parallel",),
            vmem_limit_bytes=32 * 1024 * 1024),
        cost_estimate=cost,
    )(x2d, w1c, b1_r, w2c, b2_r, wf1_aug, wf2, bf2_r)

    # (nb, 2, bt*32) -> (Np, 32, 2) -> (N, 32, 2)
    out = out.reshape(num_blocks, F2, bt, C2)
    out = jnp.transpose(out, (0, 2, 3, 1)).reshape(n_pad, C2, F2)
    return out[:n]


def init_params(key):
    """Deterministic PyTorch-default-style (uniform +/- 1/sqrt(fan_in)) init."""
    ks = jax.random.split(key, 8)

    def u(k, shape, fan_in):
        bound = 1.0 / (fan_in ** 0.5)
        return jax.random.uniform(k, shape, jnp.float32, -bound, bound)

    w1 = u(ks[0], (C1, C_IN, K1), C_IN * K1)
    b1 = u(ks[1], (C1,), C_IN * K1)
    w2 = u(ks[2], (C2, C1, K2), C1 * K2)
    b2 = u(ks[3], (C2,), C1 * K2)
    wf1 = u(ks[4], (F1, L2), L2)
    bf1 = u(ks[5], (F1,), L2)
    wf2 = u(ks[6], (F2, F1), F1)
    bf2 = u(ks[7], (F2,), F1)
    return (w1, b1, w2, b2, wf1, bf1, wf2, bf2)


def ref_forward(x, params):
    """Pure-JAX reference matching the PyTorch forward semantics."""
    w1, b1, w2, b2, wf1, bf1, wf2, bf2 = params
    hp = jax.lax.Precision.HIGHEST
    y = jax.lax.conv_general_dilated(
        x, w1, (1,), 'VALID', dimension_numbers=('NCH', 'OIH', 'NCH'),
        precision=hp) + b1[None, :, None]
    y = jnp.maximum(y, 0.0)                                    # (N, 16, 38)
    y = jnp.max(y.reshape(y.shape[0], C1, LP, 2), axis=-1)     # (N, 16, 19)
    y = jax.lax.conv_general_dilated(
        y, w2, (1,), 'VALID', dimension_numbers=('NCH', 'OIH', 'NCH'),
        precision=hp) + b2[None, :, None]
    y = jnp.maximum(y, 0.0)                                    # (N, 32, 18)
    y = jnp.maximum(jnp.einsum('ncl,fl->ncf', y, wf1, precision=hp) + bf1, 0.0)
    y = jnp.einsum('ncf,of->nco', y, wf2, precision=hp) + bf2  # (N, 32, 2)
    return y


if __name__ == "__main__":
    key = jax.random.PRNGKey(0)
    kx, kp = jax.random.split(key)
    N = 12                                                     # exercises padding + 2 grid steps
    x = jax.random.normal(kx, (N, C_IN, L_IN), jnp.float32)    # (12, 1500, 40)
    params = init_params(kp)

    out = jax.jit(supervised_1d_cnn)(x, params)
    out = jax.block_until_ready(out)

    ref = ref_forward(x, params)
    assert out.shape == (N, C2, F2), out.shape
    err = float(jnp.max(jnp.abs(out - ref)))
    if not (err < 5e-2):
        raise AssertionError(f"kernel vs reference mismatch: max abs err {err}")
    print("KERNEL_OK")
</pallas_src>

<mosaic_0001>
module attributes {stable_mosaic.version = 11 : i64} {
  func.func @cnn_kernel(%arg0: i32, %arg1: memref<320x1500xbf16, #tpu.memory_space<vmem>>, %arg2: memref<1500x48xbf16, #tpu.memory_space<vmem>>, %arg3: memref<1x16xf32, #tpu.memory_space<vmem>>, %arg4: memref<16x64xf32, #tpu.memory_space<vmem>>, %arg5: memref<1x32xf32, #tpu.memory_space<vmem>>, %arg6: memref<300x36xf32, #tpu.memory_space<vmem>>, %arg7: memref<2x300xf32, #tpu.memory_space<vmem>>, %arg8: memref<2x1xf32, #tpu.memory_space<vmem>>, %arg9: memref<1x2x256xf32, #tpu.memory_space<vmem>>, %arg10: memref<320x48xf32, #tpu.memory_space<vmem>>, %arg11: memref<36x256xf32, #tpu.memory_space<vmem>>) attributes {dimension_semantics = [#tpu.dimension_semantics<parallel>], iteration_bounds = array<i64: 2>, scalar_prefetch = 0 : i64, scratch_operands = 2 : i64, tpu.core_type = #tpu.core_type<tc>, window_params = [{transform_indices = @transform_0, window_bounds = array<i64: 320, 1500>}, {pipeline_mode = #tpu.pipeline_mode<synchronous>, transform_indices = @transform_1, window_bounds = array<i64: 1500, 48>}, {pipeline_mode = #tpu.pipeline_mode<synchronous>, transform_indices = @transform_2, window_bounds = array<i64: 1, 16>}, {pipeline_mode = #tpu.pipeline_mode<synchronous>, transform_indices = @transform_3, window_bounds = array<i64: 16, 64>}, {pipeline_mode = #tpu.pipeline_mode<synchronous>, transform_indices = @transform_4, window_bounds = array<i64: 1, 32>}, {pipeline_mode = #tpu.pipeline_mode<synchronous>, transform_indices = @transform_5, window_bounds = array<i64: 300, 36>}, {pipeline_mode = #tpu.pipeline_mode<synchronous>, transform_indices = @transform_6, window_bounds = array<i64: 2, 300>}, {pipeline_mode = #tpu.pipeline_mode<synchronous>, transform_indices = @transform_7, window_bounds = array<i64: 2, 1>}, {transform_indices = @transform_8, window_bounds = array<i64: 1, 2, 256>}]} {
    %c0 = arith.constant 0 : index
    %c0_0 = arith.constant 0 : index
    %0 = vector.load %arg1[%c0, %c0_0] : memref<320x1500xbf16, #tpu.memory_space<vmem>>, vector<320x1500xbf16>
    %c0_1 = arith.constant 0 : index
    %c0_2 = arith.constant 0 : index
    %1 = vector.load %arg2[%c0_1, %c0_2] : memref<1500x48xbf16, #tpu.memory_space<vmem>>, vector<1500x48xbf16>
    %cst = arith.constant dense<0.000000e+00> : vector<320x48xf32>
    %2 = tpu.matmul %0, %1, %cst {dimension_numbers = #tpu.dot_dimension_numbers<[1], [0], [0], [1], [0, 0, 1, 1], [], []>} : vector<320x1500xbf16>, vector<1500x48xbf16>, vector<320x48xf32> -> vector<320x48xf32>
    %c0_3 = arith.constant 0 : index
    %c0_4 = arith.constant 0 : index
    %3 = vector.load %arg10[%c0_3, %c0_4] : memref<320x48xf32, #tpu.memory_space<vmem>>, vector<320x48xf32>
    tpu.vector_store %arg10[%c0_3, %c0_4], %2 {strides = array<i32>} : memref<320x48xf32, #tpu.memory_space<vmem>>, vector<320x48xf32>,
    %c0_5 = arith.constant 0 : index
    %c0_6 = arith.constant 0 : index
    %4 = vector.load %arg3[%c0_5, %c0_6] : memref<1x16xf32, #tpu.memory_space<vmem>>, vector<1x16xf32>
    %c0_7 = arith.constant 0 : index
    %c0_8 = arith.constant 0 : index
    %5 = vector.load %arg4[%c0_7, %c0_8] : memref<16x64xf32, #tpu.memory_space<vmem>>, vector<16x64xf32>
    %c0_9 = arith.constant 0 : index
    %c0_10 = arith.constant 0 : index
    %6 = vector.load %arg5[%c0_9, %c0_10] : memref<1x32xf32, #tpu.memory_space<vmem>>, vector<1x32xf32>
    %cst_11 = arith.constant 1.000000e+00 : f32
    %7 = vector.broadcast %cst_11 : f32 to vector<1x256xf32>
    %c35 = arith.constant 35 : index
    %c0_12 = arith.constant 0 : index
    %8 = vector.load %arg11[%c35, %c0_12] : memref<36x256xf32, #tpu.memory_space<vmem>>, vector<1x256xf32>
    tpu.vector_store %arg11[%c35, %c0_12], %7 {strides = array<i32>} : memref<36x256xf32, #tpu.memory_space<vmem>>, vector<1x256xf32>,
    %c0_13 = arith.constant 0 : index
    %c0_14 = arith.constant 0 : index
    %9 = vector.load %arg10[%c0_13, %c0_14] : memref<320x48xf32, #tpu.memory_space<vmem>>, vector<40x48xf32>
    %10 = vector.extract_strided_slice %9 {offsets = [0, 0], sizes = [38, 16], strides = [1, 1]} : vector<40x48xf32> to vector<38x16xf32>
    %11 = vector.extract_strided_slice %9 {offsets = [1, 16], sizes = [38, 16], strides = [1, 1]} : vector<40x48xf32> to vector<38x16xf32>
    %12 = arith.addf %10, %11 : vector<38x16xf32>
    %13 = vector.extract_strided_slice %9 {offsets = [2, 32], sizes = [38, 16], strides = [1, 1]} : vector<40x48xf32> to vector<38x16xf32>
    %14 = arith.addf %12, %13 : vector<38x16xf32>
    %15 = vector.broadcast %4 : vector<1x16xf32> to vector<38x16xf32>
    %16 = arith.addf %14, %15 : vector<38x16xf32>
    %cst_15 = arith.constant 0.000000e+00 : f32
    %17 = vector.broadcast %cst_15 : f32 to vector<38x16xf32>
    %18 = arith.maximumf %16, %17 : vector<38x16xf32>
    %19 = vector.extract_strided_slice %18 {offsets = [0, 0], sizes = [37, 16], strides = [1, 1]} : vector<38x16xf32> to vector<37x16xf32>
    %20 = vector.extract_strided_slice %18 {offsets = [1, 0], sizes = [37, 16], strides = [1, 1]} : vector<38x16xf32> to vector<37x16xf32>
    %21 = arith.maximumf %19, %20 : vector<37x16xf32>
    %cst_16 = arith.constant dense<0.000000e+00> : vector<37x64xf32>
    %22 = tpu.matmul %21, %5, %cst_16 {dimension_numbers = #tpu.dot_dimension_numbers<[1], [0], [0], [1], [0, 0, 1, 1], [], []>} : vector<37x16xf32>, vector<16x64xf32>, vector<37x64xf32> -> vector<37x64xf32>
    %23 = vector.extract_strided_slice %22 {offsets = [0, 0], sizes = [35, 32], strides = [1, 1]} : vector<37x64xf32> to vector<35x32xf32>
    %24 = vector.extract_strided_slice %22 {offsets = [2, 32], sizes = [35, 32], strides = [1, 1]} : vector<37x64xf32> to vector<35x32xf32>
    %25 = arith.addf %23, %24 : vector<35x32xf32>
    %26 = vector.broadcast %6 : vector<1x32xf32> to vector<35x32xf32>
    %27 = arith.addf %25, %26 : vector<35x32xf32>
    %cst_17 = arith.constant 0.000000e+00 : f32
    %28 = vector.broadcast %cst_17 : f32 to vector<35x32xf32>
    %29 = arith.maximumf %27, %28 : vector<35x32xf32>
    %c0_18 = arith.constant 0 : index
    %c0_19 = arith.constant 0 : index
    %30 = vector.load %arg11[%c0_18, %c0_19] : memref<36x256xf32, #tpu.memory_space<vmem>>, vector<35x32xf32>
    tpu.vector_store %arg11[%c0_18, %c0_19], %29 {strides = array<i32>} : memref<36x256xf32, #tpu.memory_space<vmem>>, vector<35x32xf32>,
    %c40 = arith.constant 40 : index
    %c0_20 = arith.constant 0 : index
    %31 = vector.load %arg10[%c40, %c0_20] : memref<320x48xf32, #tpu.memory_space<vmem>>, vector<40x48xf32>
    %32 = vector.extract_strided_slice %31 {offsets = [0, 0], sizes = [38, 16], strides = [1, 1]} : vector<40x48xf32> to vector<38x16xf32>
    %33 = vector.extract_strided_slice %31 {offsets = [1, 16], sizes = [38, 16], strides = [1, 1]} : vector<40x48xf32> to vector<38x16xf32>
    %34 = arith.addf %32, %33 : vector<38x16xf32>
    %35 = vector.extract_strided_slice %31 {offsets = [2, 32], sizes = [38, 16], strides = [1, 1]} : vector<40x48xf32> to vector<38x16xf32>
    %36 = arith.addf %34, %35 : vector<38x16xf32>
    %37 = vector.broadcast %4 : vector<1x16xf32> to vector<38x16xf32>
    %38 = arith.addf %36, %37 : vector<38x16xf32>
    %cst_21 = arith.constant 0.000000e+00 : f32
    %39 = vector.broadcast %cst_21 : f32 to vector<38x16xf32>
    %40 = arith.maximumf %38, %39 : vector<38x16xf32>
    %41 = vector.extract_strided_slice %40 {offsets = [0, 0], sizes = [37, 16], strides = [1, 1]} : vector<38x16xf32> to vector<37x16xf32>
    %42 = vector.extract_strided_slice %40 {offsets = [1, 0], sizes = [37, 16], strides = [1, 1]} : vector<38x16xf32> to vector<37x16xf32>
    %43 = arith.maximumf %41, %42 : vector<37x16xf32>
    %cst_22 = arith.constant dense<0.000000e+00> : vector<37x64xf32>
    %44 = tpu.matmul %43, %5, %cst_22 {dimension_numbers = #tpu.dot_dimension_numbers<[1], [0], [0], [1], [0, 0, 1, 1], [], []>} : vector<37x16xf32>, vector<16x64xf32>, vector<37x64xf32> -> vector<37x64xf32>
    %45 = vector.extract_strided_slice %44 {offsets = [0, 0], sizes = [35, 32], strides = [1, 1]} : vector<37x64xf32> to vector<35x32xf32>
    %46 = vector.extract_strided_slice %44 {offsets = [2, 32], sizes = [35, 32], strides = [1, 1]} : vector<37x64xf32> to vector<35x32xf32>
    %47 = arith.addf %45, %46 : vector<35x32xf32>
    %48 = vector.broadcast %6 : vector<1x32xf32> to vector<35x32xf32>
    %49 = arith.addf %47, %48 : vector<35x32xf32>
    %cst_23 = arith.constant 0.000000e+00 : f32
    %50 = vector.broadcast %cst_23 : f32 to vector<35x32xf32>
    %51 = arith.maximumf %49, %50 : vector<35x32xf32>
    %c0_24 = arith.constant 0 : index
    %c32 = arith.constant 32 : index
    %52 = vector.load %arg11[%c0_24, %c32] : memref<36x256xf32, #tpu.memory_space<vmem>>, vector<35x32xf32>
    tpu.vector_store %arg11[%c0_24, %c32], %51 {strides = array<i32>} : memref<36x256xf32, #tpu.memory_space<vmem>>, vector<35x32xf32>,
    %c80 = arith.constant 80 : index
    %c0_25 = arith.constant 0 : index
    %53 = vector.load %arg10[%c80, %c0_25] : memref<320x48xf32, #tpu.memory_space<vmem>>, vector<40x48xf32>
    %54 = vector.extract_strided_slice %53 {offsets = [0, 0], sizes = [38, 16], strides = [1, 1]} : vector<40x48xf32> to vector<38x16xf32>
    %55 = vector.extract_strided_slice %53 {offsets = [1, 16], sizes = [38, 16], strides = [1, 1]} : vector<40x48xf32> to vector<38x16xf32>
    %56 = arith.addf %54, %55 : vector<38x16xf32>
    %57 = vector.extract_strided_slice %53 {offsets = [2, 32], sizes = [38, 16], strides = [1, 1]} : vector<40x48xf32> to vector<38x16xf32>
    %58 = arith.addf %56, %57 : vector<38x16xf32>
    %59 = vector.broadcast %4 : vector<1x16xf32> to vector<38x16xf32>
    %60 = arith.addf %58, %59 : vector<38x16xf32>
    %cst_26 = arith.constant 0.000000e+00 : f32
    %61 = vector.broadcast %cst_26 : f32 to vector<38x16xf32>
    %62 = arith.maximumf %60, %61 : vector<38x16xf32>
    %63 = vector.extract_strided_slice %62 {offsets = [0, 0], sizes = [37, 16], strides = [1, 1]} : vector<38x16xf32> to vector<37x16xf32>
    %64 = vector.extract_strided_slice %62 {offsets = [1, 0], sizes = [37, 16], strides = [1, 1]} : vector<38x16xf32> to vector<37x16xf32>
    %65 = arith.maximumf %63, %64 : vector<37x16xf32>
    %cst_27 = arith.constant dense<0.000000e+00> : vector<37x64xf32>
    %66 = tpu.matmul %65, %5, %cst_27 {dimension_numbers = #tpu.dot_dimension_numbers<[1], [0], [0], [1], [0, 0, 1, 1], [], []>} : vector<37x16xf32>, vector<16x64xf32>, vector<37x64xf32> -> vector<37x64xf32>
    %67 = vector.extract_strided_slice %66 {offsets = [0, 0], sizes = [35, 32], strides = [1, 1]} : vector<37x64xf32> to vector<35x32xf32>
    %68 = vector.extract_strided_slice %66 {offsets = [2, 32], sizes = [35, 32], strides = [1, 1]} : vector<37x64xf32> to vector<35x32xf32>
    %69 = arith.addf %67, %68 : vector<35x32xf32>
    %70 = vector.broadcast %6 : vector<1x32xf32> to vector<35x32xf32>
    %71 = arith.addf %69, %70 : vector<35x32xf32>
    %cst_28 = arith.constant 0.000000e+00 : f32
    %72 = vector.broadcast %cst_28 : f32 to vector<35x32xf32>
    %73 = arith.maximumf %71, %72 : vector<35x32xf32>
    %c0_29 = arith.constant 0 : index
    %c64 = arith.constant 64 : index
    %74 = vector.load %arg11[%c0_29, %c64] : memref<36x256xf32, #tpu.memory_space<vmem>>, vector<35x32xf32>
    tpu.vector_store %arg11[%c0_29, %c64], %73 {strides = array<i32>} : memref<36x256xf32, #tpu.memory_space<vmem>>, vector<35x32xf32>,
    %c120 = arith.constant 120 : index
    %c0_30 = arith.constant 0 : index
    %75 = vector.load %arg10[%c120, %c0_30] : memref<320x48xf32, #tpu.memory_space<vmem>>, vector<40x48xf32>
    %76 = vector.extract_strided_slice %75 {offsets = [0, 0], sizes = [38, 16], strides = [1, 1]} : vector<40x48xf32> to vector<38x16xf32>
    %77 = vector.extract_strided_slice %75 {offsets = [1, 16], sizes = [38, 16], strides = [1, 1]} : vector<40x48xf32> to vector<38x16xf32>
    %78 = arith.addf %76, %77 : vector<38x16xf32>
    %79 = vector.extract_strided_slice %75 {offsets = [2, 32], sizes = [38, 16], strides = [1, 1]} : vector<40x48xf32> to vector<38x16xf32>
    %80 = arith.addf %78, %79 : vector<38x16xf32>
    %81 = vector.broadcast %4 : vector<1x16xf32> to vector<38x16xf32>
    %82 = arith.addf %80, %81 : vector<38x16xf32>
    %cst_31 = arith.constant 0.000000e+00 : f32
    %83 = vector.broadcast %cst_31 : f32 to vector<38x16xf32>
    %84 = arith.maximumf %82, %83 : vector<38x16xf32>
    %85 = vector.extract_strided_slice %84 {offsets = [0, 0], sizes = [37, 16], strides = [1, 1]} : vector<38x16xf32> to vector<37x16xf32>
    %86 = vector.extract_strided_slice %84 {offsets = [1, 0], sizes = [37, 16], strides = [1, 1]} : vector<38x16xf32> to vector<37x16xf32>
    %87 = arith.maximumf %85, %86 : vector<37x16xf32>
    %cst_32 = arith.constant dense<0.000000e+00> : vector<37x64xf32>
    %88 = tpu.matmul %87, %5, %cst_32 {dimension_numbers = #tpu.dot_dimension_numbers<[1], [0], [0], [1], [0, 0, 1, 1], [], []>} : vector<37x16xf32>, vector<16x64xf32>, vector<37x64xf32> -> vector<37x64xf32>
    %89 = vector.extract_strided_slice %88 {offsets = [0, 0], sizes = [35, 32], strides = [1, 1]} : vector<37x64xf32> to vector<35x32xf32>
    %90 = vector.extract_strided_slice %88 {offsets = [2, 32], sizes = [35, 32], strides = [1, 1]} : vector<37x64xf32> to vector<35x32xf32>
    %91 = arith.addf %89, %90 : vector<35x32xf32>
    %92 = vector.broadcast %6 : vector<1x32xf32> to vector<35x32xf32>
    %93 = arith.addf %91, %92 : vector<35x32xf32>
    %cst_33 = arith.constant 0.000000e+00 : f32
    %94 = vector.broadcast %cst_33 : f32 to vector<35x32xf32>
    %95 = arith.maximumf %93, %94 : vector<35x32xf32>
    %c0_34 = arith.constant 0 : index
    %c96 = arith.constant 96 : index
    %96 = vector.load %arg11[%c0_34, %c96] : memref<36x256xf32, #tpu.memory_space<vmem>>, vector<35x32xf32>
    tpu.vector_store %arg11[%c0_34, %c96], %95 {strides = array<i32>} : memref<36x256xf32, #tpu.memory_space<vmem>>, vector<35x32xf32>,
    %c160 = arith.constant 160 : index
    %c0_35 = arith.constant 0 : index
    %97 = vector.load %arg10[%c160, %c0_35] : memref<320x48xf32, #tpu.memory_space<vmem>>, vector<40x48xf32>
    %98 = vector.extract_strided_slice %97 {offsets = [0, 0], sizes = [38, 16], strides = [1, 1]} : vector<40x48xf32> to vector<38x16xf32>
    %99 = vector.extract_strided_slice %97 {offsets = [1, 16], sizes = [38, 16], strides = [1, 1]} : vector<40x48xf32> to vector<38x16xf32>
    %100 = arith.addf %98, %99 : vector<38x16xf32>
    %101 = vector.extract_strided_slice %97 {offsets = [2, 32], sizes = [38, 16], strides = [1, 1]} : vector<40x48xf32> to vector<38x16xf32>
    %102 = arith.addf %100, %101 : vector<38x16xf32>
    %103 = vector.broadcast %4 : vector<1x16xf32> to vector<38x16xf32>
    %104 = arith.addf %102, %103 : vector<38x16xf32>
    %cst_36 = arith.constant 0.000000e+00 : f32
    %105 = vector.broadcast %cst_36 : f32 to vector<38x16xf32>
    %106 = arith.maximumf %104, %105 : vector<38x16xf32>
    %107 = vector.extract_strided_slice %106 {offsets = [0, 0], sizes = [37, 16], strides = [1, 1]} : vector<38x16xf32> to vector<37x16xf32>
    %108 = vector.extract_strided_slice %106 {offsets = [1, 0], sizes = [37, 16], strides = [1, 1]} : vector<38x16xf32> to vector<37x16xf32>
    %109 = arith.maximumf %107, %108 : vector<37x16xf32>
    %cst_37 = arith.constant dense<0.000000e+00> : vector<37x64xf32>
    %110 = tpu.matmul %109, %5, %cst_37 {dimension_numbers = #tpu.dot_dimension_numbers<[1], [0], [0], [1], [0, 0, 1, 1], [], []>} : vector<37x16xf32>, vector<16x64xf32>, vector<37x64xf32> -> vector<37x64xf32>
    %111 = vector.extract_strided_slice %110 {offsets = [0, 0], sizes = [35, 32], strides = [1, 1]} : vector<37x64xf32> to vector<35x32xf32>
    %112 = vector.extract_strided_slice %110 {offsets = [2, 32], sizes = [35, 32], strides = [1, 1]} : vector<37x64xf32> to vector<35x32xf32>
    %113 = arith.addf %111, %112 : vector<35x32xf32>
    %114 = vector.broadcast %6 : vector<1x32xf32> to vector<35x32xf32>
    %115 = arith.addf %113, %114 : vector<35x32xf32>
    %cst_38 = arith.constant 0.000000e+00 : f32
    %116 = vector.broadcast %cst_38 : f32 to vector<35x32xf32>
    %117 = arith.maximumf %115, %116 : vector<35x32xf32>
    %c0_39 = arith.constant 0 : index
    %c128 = arith.constant 128 : index
    %118 = vector.load %arg11[%c0_39, %c128] : memref<36x256xf32, #tpu.memory_space<vmem>>, vector<35x32xf32>
    tpu.vector_store %arg11[%c0_39, %c128], %117 {strides = array<i32>} : memref<36x256xf32, #tpu.memory_space<vmem>>, vector<35x32xf32>,
    %c200 = arith.constant 200 : index
    %c0_40 = arith.constant 0 : index
    %119 = vector.load %arg10[%c200, %c0_40] : memref<320x48xf32, #tpu.memory_space<vmem>>, vector<40x48xf32>
    %120 = vector.extract_strided_slice %119 {offsets = [0, 0], sizes = [38, 16], strides = [1, 1]} : vector<40x48xf32> to vector<38x16xf32>
    %121 = vector.extract_strided_slice %119 {offsets = [1, 16], sizes = [38, 16], strides = [1, 1]} : vector<40x48xf32> to vector<38x16xf32>
    %122 = arith.addf %120, %121 : vector<38x16xf32>
    %123 = vector.extract_strided_slice %119 {offsets = [2, 32], sizes = [38, 16], strides = [1, 1]} : vector<40x48xf32> to vector<38x16xf32>
    %124 = arith.addf %122, %123 : vector<38x16xf32>
    %125 = vector.broadcast %4 : vector<1x16xf32> to vector<38x16xf32>
    %126 = arith.addf %124, %125 : vector<38x16xf32>
    %cst_41 = arith.constant 0.000000e+00 : f32
    %127 = vector.broadcast %cst_41 : f32 to vector<38x16xf32>
    %128 = arith.maximumf %126, %127 : vector<38x16xf32>
    %129 = vector.extract_strided_slice %128 {offsets = [0, 0], sizes = [37, 16], strides = [1, 1]} : vector<38x16xf32> to vector<37x16xf32>
    %130 = vector.extract_strided_slice %128 {offsets = [1, 0], sizes = [37, 16], strides = [1, 1]} : vector<38x16xf32> to vector<37x16xf32>
    %131 = arith.maximumf %129, %130 : vector<37x16xf32>
    %cst_42 = arith.constant dense<0.000000e+00> : vector<37x64xf32>
    %132 = tpu.matmul %131, %5, %cst_42 {dimension_numbers = #tpu.dot_dimension_numbers<[1], [0], [0], [1], [0, 0, 1, 1], [], []>} : vector<37x16xf32>, vector<16x64xf32>, vector<37x64xf32> -> vector<37x64xf32>
    %133 = vector.extract_strided_slice %132 {offsets = [0, 0], sizes = [35, 32], strides = [1, 1]} : vector<37x64xf32> to vector<35x32xf32>
    %134 = vector.extract_strided_slice %132 {offsets = [2, 32], sizes = [35, 32], strides = [1, 1]} : vector<37x64xf32> to vector<35x32xf32>
    %135 = arith.addf %133, %134 : vector<35x32xf32>
    %136 = vector.broadcast %6 : vector<1x32xf32> to vector<35x32xf32>
    %137 = arith.addf %135, %136 : vector<35x32xf32>
    %cst_43 = arith.constant 0.000000e+00 : f32
    %138 = vector.broadcast %cst_43 : f32 to vector<35x32xf32>
    %139 = arith.maximumf %137, %138 : vector<35x32xf32>
    %c0_44 = arith.constant 0 : index
    %c160_45 = arith.constant 160 : index
    %140 = vector.load %arg11[%c0_44, %c160_45] : memref<36x256xf32, #tpu.memory_space<vmem>>, vector<35x32xf32>
    tpu.vector_store %arg11[%c0_44, %c160_45], %139 {strides = array<i32>} : memref<36x256xf32, #tpu.memory_space<vmem>>, vector<35x32xf32>,
    %c240 = arith.constant 240 : index
    %c0_46 = arith.constant 0 : index
    %141 = vector.load %arg10[%c240, %c0_46] : memref<320x48xf32, #tpu.memory_space<vmem>>, vector<40x48xf32>
    %142 = vector.extract_strided_slice %141 {offsets = [0, 0], sizes = [38, 16], strides = [1, 1]} : vector<40x48xf32> to vector<38x16xf32>
    %143 = vector.extract_strided_slice %141 {offsets = [1, 16], sizes = [38, 16], strides = [1, 1]} : vector<40x48xf32> to vector<38x16xf32>
    %144 = arith.addf %142, %143 : vector<38x16xf32>
    %145 = vector.extract_strided_slice %141 {offsets = [2, 32], sizes = [38, 16], strides = [1, 1]} : vector<40x48xf32> to vector<38x16xf32>
    %146 = arith.addf %144, %145 : vector<38x16xf32>
    %147 = vector.broadcast %4 : vector<1x16xf32> to vector<38x16xf32>
    %148 = arith.addf %146, %147 : vector<38x16xf32>
    %cst_47 = arith.constant 0.000000e+00 : f32
    %149 = vector.broadcast %cst_47 : f32 to vector<38x16xf32>
    %150 = arith.maximumf %148, %149 : vector<38x16xf32>
    %151 = vector.extract_strided_slice %150 {offsets = [0, 0], sizes = [37, 16], strides = [1, 1]} : vector<38x16xf32> to vector<37x16xf32>
    %152 = vector.extract_strided_slice %150 {offsets = [1, 0], sizes = [37, 16], strides = [1, 1]} : vector<38x16xf32> to vector<37x16xf32>
    %153 = arith.maximumf %151, %152 : vector<37x16xf32>
    %cst_48 = arith.constant dense<0.000000e+00> : vector<37x64xf32>
    %154 = tpu.matmul %153, %5, %cst_48 {dimension_numbers = #tpu.dot_dimension_numbers<[1], [0], [0], [1], [0, 0, 1, 1], [], []>} : vector<37x16xf32>, vector<16x64xf32>, vector<37x64xf32> -> vector<37x64xf32>
    %155 = vector.extract_strided_slice %154 {offsets = [0, 0], sizes = [35, 32], strides = [1, 1]} : vector<37x64xf32> to vector<35x32xf32>
    %156 = vector.extract_strided_slice %154 {offsets = [2, 32], sizes = [35, 32], strides = [1, 1]} : vector<37x64xf32> to vector<35x32xf32>
    %157 = arith.addf %155, %156 : vector<35x32xf32>
    %158 = vector.broadcast %6 : vector<1x32xf32> to vector<35x32xf32>
    %159 = arith.addf %157, %158 : vector<35x32xf32>
    %cst_49 = arith.constant 0.000000e+00 : f32
    %160 = vector.broadcast %cst_49 : f32 to vector<35x32xf32>
    %161 = arith.maximumf %159, %160 : vector<35x32xf32>
    %c0_50 = arith.constant 0 : index
    %c192 = arith.constant 192 : index
    %162 = vector.load %arg11[%c0_50, %c192] : memref<36x256xf32, #tpu.memory_space<vmem>>, vector<35x32xf32>
    tpu.vector_store %arg11[%c0_50, %c192], %161 {strides = array<i32>} : memref<36x256xf32, #tpu.memory_space<vmem>>, vector<35x32xf32>,
    %c280 = arith.constant 280 : index
    %c0_51 = arith.constant 0 : index
    %163 = vector.load %arg10[%c280, %c0_51] : memref<320x48xf32, #tpu.memory_space<vmem>>, vector<40x48xf32>
    %164 = vector.extract_strided_slice %163 {offsets = [0, 0], sizes = [38, 16], strides = [1, 1]} : vector<40x48xf32> to vector<38x16xf32>
    %165 = vector.extract_strided_slice %163 {offsets = [1, 16], sizes = [38, 16], strides = [1, 1]} : vector<40x48xf32> to vector<38x16xf32>
    %166 = arith.addf %164, %165 : vector<38x16xf32>
    %167 = vector.extract_strided_slice %163 {offsets = [2, 32], sizes = [38, 16], strides = [1, 1]} : vector<40x48xf32> to vector<38x16xf32>
    %168 = arith.addf %166, %167 : vector<38x16xf32>
    %169 = vector.broadcast %4 : vector<1x16xf32> to vector<38x16xf32>
    %170 = arith.addf %168, %169 : vector<38x16xf32>
    %cst_52 = arith.constant 0.000000e+00 : f32
    %171 = vector.broadcast %cst_52 : f32 to vector<38x16xf32>
    %172 = arith.maximumf %170, %171 : vector<38x16xf32>
    %173 = vector.extract_strided_slice %172 {offsets = [0, 0], sizes = [37, 16], strides = [1, 1]} : vector<38x16xf32> to vector<37x16xf32>
    %174 = vector.extract_strided_slice %172 {offsets = [1, 0], sizes = [37, 16], strides = [1, 1]} : vector<38x16xf32> to vector<37x16xf32>
    %175 = arith.maximumf %173, %174 : vector<37x16xf32>
    %cst_53 = arith.constant dense<0.000000e+00> : vector<37x64xf32>
    %176 = tpu.matmul %175, %5, %cst_53 {dimension_numbers = #tpu.dot_dimension_numbers<[1], [0], [0], [1], [0, 0, 1, 1], [], []>} : vector<37x16xf32>, vector<16x64xf32>, vector<37x64xf32> -> vector<37x64xf32>
    %177 = vector.extract_strided_slice %176 {offsets = [0, 0], sizes = [35, 32], strides = [1, 1]} : vector<37x64xf32> to vector<35x32xf32>
    %178 = vector.extract_strided_slice %176 {offsets = [2, 32], sizes = [35, 32], strides = [1, 1]} : vector<37x64xf32> to vector<35x32xf32>
    %179 = arith.addf %177, %178 : vector<35x32xf32>
    %180 = vector.broadcast %6 : vector<1x32xf32> to vector<35x32xf32>
    %181 = arith.addf %179, %180 : vector<35x32xf32>
    %cst_54 = arith.constant 0.000000e+00 : f32
    %182 = vector.broadcast %cst_54 : f32 to vector<35x32xf32>
    %183 = arith.maximumf %181, %182 : vector<35x32xf32>
    %c0_55 = arith.constant 0 : index
    %c224 = arith.constant 224 : index
    %184 = vector.load %arg11[%c0_55, %c224] : memref<36x256xf32, #tpu.memory_space<vmem>>, vector<35x32xf32>
    tpu.vector_store %arg11[%c0_55, %c224], %183 {strides = array<i32>} : memref<36x256xf32, #tpu.memory_space<vmem>>, vector<35x32xf32>,
    %c0_56 = arith.constant 0 : index
    %c0_57 = arith.constant 0 : index
    %185 = vector.load %arg6[%c0_56, %c0_57] : memref<300x36xf32, #tpu.memory_space<vmem>>, vector<300x36xf32>
    %c0_58 = arith.constant 0 : index
    %c0_59 = arith.constant 0 : index
    %186 = vector.load %arg11[%c0_58, %c0_59] : memref<36x256xf32, #tpu.memory_space<vmem>>, vector<36x256xf32>
    %cst_60 = arith.constant dense<0.000000e+00> : vector<300x256xf32>
    %187 = tpu.matmul %185, %186, %cst_60 {dimension_numbers = #tpu.dot_dimension_numbers<[1], [0], [0], [1], [0, 0, 1, 1], [], []>} : vector<300x36xf32>, vector<36x256xf32>, vector<300x256xf32> -> vector<300x256xf32>
    %cst_61 = arith.constant 0.000000e+00 : f32
    %188 = vector.broadcast %cst_61 : f32 to vector<300x256xf32>
    %189 = arith.maximumf %187, %188 : vector<300x256xf32>
    %c0_62 = arith.constant 0 : index
    %c0_63 = arith.constant 0 : index
    %190 = vector.load %arg7[%c0_62, %c0_63] : memref<2x300xf32, #tpu.memory_space<vmem>>, vector<2x300xf32>
    %cst_64 = arith.constant dense<0.000000e+00> : vector<2x256xf32>
    %191 = tpu.matmul %190, %189, %cst_64 {dimension_numbers = #tpu.dot_dimension_numbers<[1], [0], [0], [1], [0, 0, 1, 1], [], []>} : vector<2x300xf32>, vector<300x256xf32>, vector<2x256xf32> -> vector<2x256xf32>
    %c0_65 = arith.constant 0 : index
    %c0_66 = arith.constant 0 : index
    %192 = vector.load %arg8[%c0_65, %c0_66] : memref<2x1xf32, #tpu.memory_space<vmem>>, vector<2x1xf32>
    %193 = vector.broadcast %192 : vector<2x1xf32> to vector<2x256xf32>
    %194 = arith.addf %191, %193 : vector<2x256xf32>
    %c0_67 = arith.constant 0 : index
    %c0_68 = arith.constant 0 : index
    %c0_69 = arith.constant 0 : index
    %195 = vector.load %arg9[%c0_67, %c0_68, %c0_69] : memref<1x2x256xf32, #tpu.memory_space<vmem>>, vector<1x2x256xf32>
    %196 = vector.shape_cast %195 : vector<1x2x256xf32> to vector<2x256xf32>
    %197 = vector.shape_cast %194 : vector<2x256xf32> to vector<1x2x256xf32>
    tpu.vector_store %arg9[%c0_67, %c0_68, %c0_69], %197 {strides = array<i32>} : memref<1x2x256xf32, #tpu.memory_space<vmem>>, vector<1x2x256xf32>,
    return
  }
  func.func @transform_0(%arg0: i32) -> (i32, i32) {
    %c0_i32 = arith.constant 0 : i32
    %c0_i32_0 = arith.constant 0 : i32
    return %arg0, %c0_i32 : i32, i32
  }
  func.func @transform_1(%arg0: i32) -> (i32, i32) {
    %c0_i32 = arith.constant 0 : i32
    %c0_i32_0 = arith.constant 0 : i32
    %c0_i32_1 = arith.constant 0 : i32
    return %c0_i32, %c0_i32_0 : i32, i32
  }
  func.func @transform_2(%arg0: i32) -> (i32, i32) {
    %c0_i32 = arith.constant 0 : i32
    %c0_i32_0 = arith.constant 0 : i32
    %c0_i32_1 = arith.constant 0 : i32
    return %c0_i32, %c0_i32_0 : i32, i32
  }
  func.func @transform_3(%arg0: i32) -> (i32, i32) {
    %c0_i32 = arith.constant 0 : i32
    %c0_i32_0 = arith.constant 0 : i32
    %c0_i32_1 = arith.constant 0 : i32
    return %c0_i32, %c0_i32_0 : i32, i32
  }
  func.func @transform_4(%arg0: i32) -> (i32, i32) {
    %c0_i32 = arith.constant 0 : i32
    %c0_i32_0 = arith.constant 0 : i32
    %c0_i32_1 = arith.constant 0 : i32
    return %c0_i32, %c0_i32_0 : i32, i32
  }
  func.func @transform_5(%arg0: i32) -> (i32, i32) {
    %c0_i32 = arith.constant 0 : i32
    %c0_i32_0 = arith.constant 0 : i32
    %c0_i32_1 = arith.constant 0 : i32
    return %c0_i32, %c0_i32_0 : i32, i32
  }
  func.func @transform_6(%arg0: i32) -> (i32, i32) {
    %c0_i32 = arith.constant 0 : i32
    %c0_i32_0 = arith.constant 0 : i32
    %c0_i32_1 = arith.constant 0 : i32
    return %c0_i32, %c0_i32_0 : i32, i32
  }
  func.func @transform_7(%arg0: i32) -> (i32, i32) {
    %c0_i32 = arith.constant 0 : i32
    %c0_i32_0 = arith.constant 0 : i32
    %c0_i32_1 = arith.constant 0 : i32
    return %c0_i32, %c0_i32_0 : i32, i32
  }
  func.func @transform_8(%arg0: i32) -> (i32, i32, i32) {
    %c0_i32 = arith.constant 0 : i32
    %c0_i32_0 = arith.constant 0 : i32
    %c0_i32_1 = arith.constant 0 : i32
    return %arg0, %c0_i32, %c0_i32_0 : i32, i32, i32
  }
}

</mosaic_0001>

<bundles_post_ra>
// kernel: supervised_1d_cnn.1
= control target key start
LH: loop header
LB: loop body
LE: loop exit
PB: predicated region body
PF: predicated region fallthrough
CT: control target
= control target key end

     0   :  { %s8407_s27 = smov 0   ;;  %s10449_s0 = inlined_call_operand.vmem [shape: bf16[640,1500], index: 0, kind: input, shape index: {}]   ;;  %s10450_s1 = inlined_call_operand.vmem [shape: bf16[1500,48], index: 1, kind: input, shape index: {}]   ;;  %s10451_s2 = inlined_call_operand.vmem [shape: f32[1,16], index: 2, kind: input, shape index: {}]   ;;  %s10452_s3 = inlined_call_operand.vmem [shape: f32[16,64], index: 3, kind: input, shape index: {}]   ;;  %s10453_s4 = inlined_call_operand.vmem [shape: f32[1,32], index: 4, kind: input, shape index: {}]   ;;  %s10454_s5 = inlined_call_operand.vmem [shape: f32[300,36], index: 5, kind: input, shape index: {}]   ;;  %s10455_s6 = inlined_call_operand.vmem [shape: f32[2,300], index: 6, kind: input, shape index: {}]   ;;  %s10456_s7 = inlined_call_operand.vmem [shape: f32[2,1], index: 7, kind: input, shape index: {}]   ;;  %s10457_s8 = inlined_call_operand.vmem [shape: f32[2,2,256], index: 8, kind: output, shape index: {}]  }
   0x1 LB: > { %s8413_s28 = sadd.s32 4294967295, %s8349_s27   ;;  %p6735_p0 = scmp.ge.s32.totalorder %s8349_s27, 1  ;;  %s8349_s27 = sphi %s8407_s27, %s18_s27  }
   0x2   : > { %p264_p1 = scmp.lt.s32.totalorder %s8349_s27, 3 }
   0x4   : > { %p265_p2 = pnand %p6735_p0, %p264_p1 }
   0x6   : > { %268 = sbr.rel (%p265_p2) target bundleno = 2197 (0x895), region = 52 }
   0xd   : > { %v7887_v0 = vld [vmem:[%s10450_s1 + $0x100] sm:$0xff]   ;;  %v8351_v1 = vmov 0   ;;  %s299_s9 = smul.u32 40, %s8413_s28  ;;  %v7888_v2 = vld [vmem:[%s10450_s1 + $0x108] sm:$0xff]   ;;  %v7889_v3 = vld [vmem:[%s10450_s1 + $0x110] sm:$0xff]   ;;  %vm2544_vm0 = vcmask 1045504  }
   0xe   : > { %2934 = vmatprep.subr.bf16.mxu0 %v8351_v1  ;;  %2548 = vmatprep.subr.bf16.mxu1 %v8351_v1  ;;  %v7890_v4 = vld [vmem:[%s10450_s1 + $0x118] sm:$0xff]   ;;  %v7891_v5 = vld [vmem:[%s10450_s1 + $0x120] sm:$0xff]   ;;  %v7892_v7 = vld [vmem:[%s10450_s1 + $0x128] sm:$0xff]   ;;  %vm2483_vm1 = vcmask 752640   ;;  %vm3706_vm2 = vcmask 392192   ;;  %vm3768_vm3 = vcmask 1046528  }
   0xf   : > { %2935 = vmatpush1.bf16.msra.mxu0 %v7887_v0  ;;  %7886 = vset.pattern.permute.xlu0 %v8351_v1  ;;  %p300_p3 = scmp.lt.s32.totalorder %s299_s9, 79  ;;  %v7893_v8 = vld [vmem:[%s10450_s1 + $0x130] sm:$0xff]   ;;  %v7894_v9 = vld [vmem:[%s10450_s1 + $0x138] sm:$0xff]   ;;  %v7895_v10 = vld [vmem:[%s10450_s1 + $0x140] sm:$0xff]   ;;  %s8354_s13 = smov 112   ;;  %vm8355_vm4 = vmmov 0  }
  0x10   : > { %2936 = vmatprep.subr.bf16.mxu0 %v8351_v1  ;;  %v7896_v11 = vld [vmem:[%s10450_s1 + $0x148] sm:$0xff]   ;;  %v7897_v12 = vld [vmem:[%s10450_s1 + $0x150] sm:$0xff]   ;;  %v7947_v13 = vld [vmem:[%s10450_s1] sm:$0xff]   ;;  %vm3867_vm5 = vcmask 130048   ;;  %vm4023_vm6 = vcmask 261120   ;;  %s8357_s20 = smov 32  }
  0x11   : > { %s10484_s9 = smov (!%p300_p3, %s299_s9), 79  ;;  %v7898_v14 = vld [vmem:[%s10450_s1 + $0x158] sm:$0xff]   ;;  %2549 = vmatpush1.bf16.msra.mxu1 %v7947_v13  ;;  %v7952_v15 = vld [vmem:[%s10450_s1 + $0x8] sm:$0xff]   ;;  %v7899_v16 = vld [vmem:[%s10450_s1 + $0x160] sm:$0xff]   ;;  %s8358_s22 = smov 64   ;;  %vm4301_vm8 = vcmask 523520  }
  0x12   : > { %s7866_s16 = smul.u32 48, %s10484_s9  ;;  %2550 = vmatprep.subr.bf16.mxu1 %v8351_v1  ;;  %v7953_v17 = vld [vmem:[%s10450_s1 + $0x10] sm:$0xff]   ;;  %v7900_v18 = vld [vmem:[%s10450_s1 + $0x168] sm:$0xff]   ;;  %v7957_v19 = vld [vmem:[%s10450_s1 + $0x18] sm:$0xff]   ;;  %vm4028_vm9 = vcmask 256000   ;;  %vm4306_vm10 = vcmask 518400  }
  0x13   : > { %2937 = vmatpush1.bf16.msra.mxu0 %v7888_v2  ;;  %v7901_v20 = vld [vmem:[%s10450_s1 + $0x170] sm:$0xff]   ;;  %v7959_v21 = vld [vmem:[%s10450_s1 + $0x20] sm:$0xff]   ;;  %v7902_v22 = vld [vmem:[%s10450_s1 + $0x178] sm:$0xff]   ;;  %vm4579_vm11 = vcmask 785920   ;;  %vm4857_vm12 = vcmask 1048320   ;;  %vm4584_vm13 = vcmask 780800  }
  0x14   : > { %2938 = vmatprep.subr.bf16.mxu0 %v8351_v1  ;;  %s8442_s21 = scalar_lea.vmem %s10449_s0, %s7866_s16  ;;  %v7963_v23 = vld [vmem:[%s10450_s1 + $0x28] sm:$0xff]   ;;  %v7912_v26 = vld [vmem:[%s10450_s1 + $0x180] sm:$0xff]   ;;  %v7965_v27 = vld [vmem:[%s10450_s1 + $0x30] sm:$0xff]   ;;  %vm4862_vm14 = vcmask 1043200   ;;  %vm6111_vm15 = vcmask 1043456   ;;  %p306_p4 = scmp.lt.s32.totalorder %s8413_s28, 1 }
  0x15   : > { %v7905_v6 = vld [vmem:[%s8442_s21 + $0x14] ss:$48 sps:$4 sm:$0xff]   ;;  %2551 = vmatpush1.bf16.msra.mxu1 %v7952_v15  ;;  %v7903_v24 = vld [vmem:[%s8442_s21 + $0x10] ss:$48 sps:$4 sm:$0xff]   ;;  %v7916_v28 = vld [vmem:[%s10450_s1 + $0x188] sm:$0xff]  }
  0x16   : > { %2966 = vmatprep.mubr.bf16.mxu0 %v7905_v6  ;;  %2552 = vmatprep.subr.bf16.mxu1 %v8351_v1  ;;  %v7906_v25 = vld [vmem:[%s8442_s21 + $0x74] ss:$48 sps:$4 sm:$0xff]   ;;  %v7969_v29 = vld [vmem:[%s10450_s1 + $0x38] sm:$0xff]   ;;  %v7908_v30 = vld [vmem:[%s8442_s21 + $0x70] ss:$48 sps:$4 sm:$0xff]   ;;  %s10486_s28 = smov (!%p306_p4, %s8413_s28), 1 }
  0x17   : > { %2939 = vmatpush1.bf16.msra.mxu0 %v7889_v3  ;;  %v7909_v31 = vld [vmem:[%s8442_s21 + $0xd4] ss:$48 sps:$4 sm:$0xff]   ;;  %v7924_v34 = vld [vmem:[%s10450_s1 + $0x198] sm:$0xff]   ;;  %v7975_v35 = vld [vmem:[%s10450_s1 + $0x48] sm:$0xff]   ;;  %s7181_s23 = sshll.u32 %s10486_s28, 2 }
  0x18   : > { %2940 = vmatprep.subr.bf16.mxu0 %v8351_v1  ;;  %v7920_v32 = vld [vmem:[%s10450_s1 + $0x190] sm:$0xff]   ;;  %v7970_v33 = vld [vmem:[%s10450_s1 + $0x40] sm:$0xff]   ;;  %v7935_v40 = vld [vmem:[%s10450_s1 + $0x1a8] sm:$0xff]   ;;  %s310_s26 = scalar_lea.vmem %s10457_s8, %s7181_s23 }
  0x19   : > { %2553 = vmatpush1.bf16.msra.mxu1 %v7953_v17  ;;  %v7911_v36 = vld [vmem:[%s8442_s21 + $0xd0] ss:$48 sps:$4 sm:$0xff]   ;;  %v7913_v37 = vld [vmem:[%s8442_s21 + $0x134] ss:$48 sps:$4 sm:$0xff]   ;;  %v7981_v41 = vld [vmem:[%s10450_s1 + $0x58] sm:$0xff]  }
  0x1a   : > { %2554 = vmatprep.subr.bf16.mxu1 %v8351_v1  ;;  %v7931_v38 = vld [vmem:[%s10450_s1 + $0x1a0] sm:$0xff]   ;;  %v7976_v39 = vld [vmem:[%s10450_s1 + $0x50] sm:$0xff]   ;;  %v7943_v47 = vld [vmem:[%s10450_s1 + $0x1b8] sm:$0xff]  }
  0x1b   : > { %2941 = vmatpush1.bf16.msra.mxu0 %v7890_v4  ;;  %v7915_v42 = vld [vmem:[%s8442_s21 + $0x130] ss:$48 sps:$4 sm:$0xff]   ;;  %v7917_v43 = vld [vmem:[%s8442_s21 + $0x194] ss:$48 sps:$4 sm:$0xff]   ;;  %v7986_v48 = vld [vmem:[%s10450_s1 + $0x68] sm:$0xff]  }
  0x1c   : > { %2942 = vmatprep.subr.bf16.mxu0 %v8351_v1  ;;  %v7939_v44 = vld [vmem:[%s10450_s1 + $0x1b0] sm:$0xff]   ;;  %v7982_v45 = vld [vmem:[%s10450_s1 + $0x60] sm:$0xff]   ;;  %v7958_v53 = vld [vmem:[%s10450_s1 + $0x1c8] sm:$0xff]  }
  0x1d   : > { %2555 = vmatpush1.bf16.msra.mxu1 %v7957_v19  ;;  %v7996_v46 = vld [vmem:[%s8442_s21 + $0x4] ss:$48 sps:$4 sm:$0xff]   ;;  %v7919_v49 = vld [vmem:[%s8442_s21 + $0x190] ss:$48 sps:$4 sm:$0xff]   ;;  %v7993_v54 = vld [vmem:[%s10450_s1 + $0x78] sm:$0xff]  }
  0x1e   : > { %2556 = vmatprep.subr.bf16.mxu1 %v8351_v1  ;;  %v7921_v50 = vld [vmem:[%s8442_s21 + $0x1f4] ss:$48 sps:$4 sm:$0xff]   ;;  %2580 = vmatprep.mubr.bf16.mxu1 %v7996_v46  ;;  %v7923_v55 = vld [vmem:[%s8442_s21 + $0x1f0] ss:$48 sps:$4 sm:$0xff]   ;;  %v7971_v60 = vld [vmem:[%s10450_s1 + $0x1d8] sm:$0xff]  }
  0x1f   : > { %2943 = vmatpush1.bf16.msra.mxu0 %v7891_v5  ;;  %v7951_v51 = vld [vmem:[%s10450_s1 + $0x1c0] sm:$0xff]   ;;  %v7988_v52 = vld [vmem:[%s10450_s1 + $0x70] sm:$0xff]   ;;  %v7987_v3 = vld [vmem:[%s10450_s1 + $0x1e8] sm:$0xff]  }
  0x20   : > { %2944 = vmatprep.subr.bf16.mxu0 %v8351_v1  ;;  %v7925_v56 = vld [vmem:[%s8442_s21 + $0x254] ss:$48 sps:$4 sm:$0xff]   ;;  %v7994_v58 = vld [vmem:[%s8442_s21] ss:$48 sps:$4 sm:$0xff]  }
  0x21   : > { %2557 = vmatpush1.bf16.msra.mxu1 %v7959_v21  ;;  %v7964_v57 = vld [vmem:[%s10450_s1 + $0x1d0] sm:$0xff]   ;;  %v7980_v63 = vld [vmem:[%s10450_s1 + $0x1e0] sm:$0xff]  }
  0x22   : > { %2558 = vmatprep.subr.bf16.mxu1 %v8351_v1  ;;  %v8001_v59 = vld [vmem:[%s8442_s21 + $0x64] ss:$48 sps:$4 sm:$0xff]   ;;  %v7927_v61 = vld [vmem:[%s8442_s21 + $0x250] ss:$48 sps:$4 sm:$0xff]  }
  0x23   : > { %2945 = vmatpush1.bf16.msra.mxu0 %v7892_v7  ;;  %v7928_v62 = vld [vmem:[%s8442_s21 + $0x2b4] ss:$48 sps:$4 sm:$0xff]   ;;  %v8003_v0 = vld [vmem:[%s8442_s21 + $0x60] ss:$48 sps:$4 sm:$0xff]  }
  0x24   : > { %2946 = vmatprep.subr.bf16.mxu0 %v8351_v1  ;;  %v8007_v2 = vld [vmem:[%s8442_s21 + $0xc4] ss:$48 sps:$4 sm:$0xff]   ;;  %v7930_v4 = vld [vmem:[%s8442_s21 + $0x2b0] ss:$48 sps:$4 sm:$0xff]  }
  0x25   : > { %2559 = vmatpush1.bf16.msra.mxu1 %v7963_v23  ;;  %v7932_v5 = vld [vmem:[%s8442_s21 + $0x314] ss:$48 sps:$4 sm:$0xff]   ;;  %v8009_v7 = vld [vmem:[%s8442_s21 + $0xc0] ss:$48 sps:$4 sm:$0xff]  }
  0x26   : > { %2560 = vmatprep.subr.bf16.mxu1 %v8351_v1  ;;  %v7992_v6 = vld [vmem:[%s10450_s1 + $0x1f0] sm:$0xff]  }
  0x27   : > { %2947 = vmatpush1.bf16.msra.mxu0 %v7893_v8  ;;  %v8014_v8 = vld [vmem:[%s8442_s21 + $0x124] ss:$48 sps:$4 sm:$0xff]  }
  0x28   : > { %2948 = vmatprep.subr.bf16.mxu0 %v8351_v1  ;;  %v8021_v13 = vld [vmem:[%s8442_s21 + $0x184] ss:$48 sps:$4 sm:$0xff]  }
  0x29   : > { %2561 = vmatpush1.bf16.msra.mxu1 %v7965_v27  ;;  %v7940_v15 = vld [vmem:[%s8442_s21 + $0x3d4] ss:$48 sps:$4 sm:$0xff]  }
  0x2a   : > { %2562 = vmatprep.subr.bf16.mxu1 %v8351_v1  ;;  %v8027_v17 = vld [vmem:[%s8442_s21 + $0x1e4] ss:$48 sps:$4 sm:$0xff]  }
  0x2b   : > { %2949 = vmatpush1.bf16.msra.mxu0 %v7894_v9  ;;  %v7997_v9 = vld [vmem:[%s10450_s1 + $0x1f8] sm:$0xff]   ;;  %v7944_v19 = vld [vmem:[%s8442_s21 + $0x434] ss:$48 sps:$4 sm:$0xff]  }
  0x2c   : > { %2950 = vmatprep.subr.bf16.mxu0 %v8351_v1  ;;  %v8034_v21 = vld [vmem:[%s8442_s21 + $0x244] ss:$48 sps:$4 sm:$0xff]  }
  0x2d   : > { %2563 = vmatpush1.bf16.msra.mxu1 %v7969_v29  ;;  %v7948_v23 = vld [vmem:[%s8442_s21 + $0x494] ss:$48 sps:$4 sm:$0xff]  }
  0x2e   : > { %2564 = vmatprep.subr.bf16.mxu1 %v8351_v1  ;;  %v7954_v27 = vld [vmem:[%s8442_s21 + $0x4f4] ss:$48 sps:$4 sm:$0xff]  }
  0x2f   : > { %2951 = vmatpush1.bf16.msra.mxu0 %v7895_v10  ;;  %v7934_v10 = vld [vmem:[%s8442_s21 + $0x310] ss:$48 sps:$4 sm:$0xff]   ;;  %v8048_v29 = vld [vmem:[%s8442_s21 + $0x304] ss:$48 sps:$4 sm:$0xff]  }
  0x30   : > { %2952 = vmatprep.subr.bf16.mxu0 %v8351_v1  ;;  %v8075_v46 = vld [vmem:[%s8442_s21 + $0x484] ss:$48 sps:$4 sm:$0xff]  }
  0x31   : > { %2565 = vmatpush1.bf16.msra.mxu1 %v7970_v33  ;;  %v8055_v33 = vld [vmem:[%s8442_s21 + $0x364] ss:$48 sps:$4 sm:$0xff]  }
  0x32   : > { %2566 = vmatprep.subr.bf16.mxu1 %v8351_v1 }
  0x33   : > { %2953 = vmatpush1.bf16.msra.mxu0 %v7896_v11  ;;  %v7936_v11 = vld [vmem:[%s8442_s21 + $0x374] ss:$48 sps:$4 sm:$0xff]  }
  0x34   : > { %2954 = vmatprep.subr.bf16.mxu0 %v8351_v1 }
  0x35   : > { %2567 = vmatpush1.bf16.msra.mxu1 %v7975_v35  ;;  %v7966_v35 = vld [vmem:[%s8442_s21 + $0x5b4] ss:$48 sps:$4 sm:$0xff]  }
  0x36   : > { %2568 = vmatprep.subr.bf16.mxu1 %v8351_v1 }
  0x37   : > { %2955 = vmatpush1.bf16.msra.mxu0 %v7897_v12  ;;  %v8016_v12 = vld [vmem:[%s8442_s21 + $0x120] ss:$48 sps:$4 sm:$0xff]  }
  0x38   : > { %2956 = vmatprep.subr.bf16.mxu0 %v8351_v1 }
  0x39   : > { %2569 = vmatpush1.bf16.msra.mxu1 %v7976_v39  ;;  %v7972_v39 = vld [vmem:[%s8442_s21 + $0x614] ss:$48 sps:$4 sm:$0xff]  }
  0x3a   : > { %2570 = vmatprep.subr.bf16.mxu1 %v8351_v1 }
  0x3b   : > { %2957 = vmatpush1.bf16.msra.mxu0 %v7898_v14  ;;  %v7938_v14 = vld [vmem:[%s8442_s21 + $0x370] ss:$48 sps:$4 sm:$0xff]  }
  0x3c   : > { %2958 = vmatprep.subr.bf16.mxu0 %v8351_v1 }
  0x3d   : > { %2571 = vmatpush1.bf16.msra.mxu1 %v7981_v41  ;;  %v8068_v41 = vld [vmem:[%s8442_s21 + $0x424] ss:$48 sps:$4 sm:$0xff]  }
  0x3e   : > { %2572 = vmatprep.subr.bf16.mxu1 %v8351_v1 }
  0x3f   : > { %2959 = vmatpush1.bf16.msra.mxu0 %v7899_v16  ;;  %v8023_v16 = vld [vmem:[%s8442_s21 + $0x180] ss:$48 sps:$4 sm:$0xff]  }
  0x40   : > { %2960 = vmatprep.subr.bf16.mxu0 %v8351_v1 }
  0x41   : > { %2573 = vmatpush1.bf16.msra.mxu1 %v7982_v45  ;;  %v8070_v45 = vld [vmem:[%s8442_s21 + $0x420] ss:$48 sps:$4 sm:$0xff]  }
  0x42   : > { %2574 = vmatprep.subr.bf16.mxu1 %v8351_v1 }
  0x43   : > { %2961 = vmatpush1.bf16.msra.mxu0 %v7900_v18  ;;  %v7942_v18 = vld [vmem:[%s8442_s21 + $0x3d0] ss:$48 sps:$4 sm:$0xff]  }
  0x44   : > { %2962 = vmatprep.subr.bf16.mxu0 %v8351_v1 }
  0x45   : > { %2575 = vmatpush1.bf16.msra.mxu1 %v7986_v48  ;;  %v8087_v48 = vld [vmem:[%s10450_s1 + $0x90] sm:$0xff]  }
  0x46   : > { %2576 = vmatprep.subr.bf16.mxu1 %v8351_v1 }
  0x47   : > { %2963 = vmatpush1.bf16.msra.mxu0 %v7901_v20  ;;  %v8030_v20 = vld [vmem:[%s8442_s21 + $0x1e0] ss:$48 sps:$4 sm:$0xff]  }
  0x48   : > { %2964 = vmatprep.subr.bf16.mxu0 %v8351_v1 }
  0x49   : > { %2577 = vmatpush1.bf16.msra.mxu1 %v7988_v52  ;;  %v8084_v52 = vld [vmem:[%s8442_s21 + $0x4e4] ss:$48 sps:$4 sm:$0xff]  }
  0x4a   : > { %2578 = vmatprep.subr.bf16.mxu1 %v8351_v1 }
  0x4b   : > { %2965 = vmatpush1.bf16.msra.mxu0 %v7902_v22  ;;  %v7946_v22 = vld [vmem:[%s8442_s21 + $0x430] ss:$48 sps:$4 sm:$0xff]  }
  0x4c   : > { %3127 = vmatprep.subr.bf16.mxu0 %v8351_v1 }
  0x4d   : > { %2579 = vmatpush1.bf16.msra.mxu1 %v7993_v54  ;;  %v8096_v54 = vld [vmem:[%s10450_s1 + $0xa0] sm:$0xff]  }
  0x4e   : > { %2967 = vmatmul.mubr.bf16.vlgmr.msra.gmra.mrb[0].mxu0 %v7903_v24  ;;  %2741 = vmatprep.subr.bf16.mxu1 %v8351_v1  ;;  %v8036_v24 = vld [vmem:[%s8442_s21 + $0x240] ss:$48 sps:$4 sm:$0xff]  }
  0x4f   : > { %2974 = vmatprep.mubr.bf16.mxu0 %v7906_v25  ;;  %3128 = vmatpush1.bf16.msra.mxu0 %v7912_v26  ;;  %v8041_v25 = vld [vmem:[%s8442_s21 + $0x2a4] ss:$48 sps:$4 sm:$0xff]   ;;  %v7950_v26 = vld [vmem:[%s8442_s21 + $0x490] ss:$48 sps:$4 sm:$0xff]  }
  0x50   : > { %3129 = vmatprep.subr.bf16.mxu0 %v8351_v1  ;;  %2581 = vmatmul.mubr.bf16.vlgmr.msra.gmra.mrb[0].mxu1 %v7994_v58  ;;  %v8093_v58 = vld [vmem:[%s8442_s21 + $0x544] ss:$48 sps:$4 sm:$0xff]  }
  0x51   : > { %2588 = vmatprep.mubr.bf16.mxu1 %v8001_v59  ;;  %v8100_v59 = vld [vmem:[%s10450_s1 + $0xa8] sm:$0xff]  }
  0x53   : > { %3130 = vmatpush1.bf16.msra.mxu0 %v7916_v28  ;;  %v8043_v28 = vld [vmem:[%s8442_s21 + $0x2a0] ss:$48 sps:$4 sm:$0xff]  }
  0x54   : > { %3131 = vmatprep.subr.bf16.mxu0 %v8351_v1 }
  0x56   : > { %2975 = vmatmul.mubr.bf16.gmra.mrb[4].mxu0 %v7908_v30  ;;  %v7956_v30 = vld [vmem:[%s8442_s21 + $0x4f0] ss:$48 sps:$4 sm:$0xff]  }
  0x57   : > { %2982 = vmatprep.mubr.bf16.mxu0 %v7909_v31  ;;  %3132 = vmatpush1.bf16.msra.mxu0 %v7920_v32  ;;  %v7960_v31 = vld [vmem:[%s8442_s21 + $0x554] ss:$48 sps:$4 sm:$0xff]   ;;  %v8050_v32 = vld [vmem:[%s8442_s21 + $0x300] ss:$48 sps:$4 sm:$0xff]  }
  0x58   : > { %3133 = vmatprep.subr.bf16.mxu0 %v8351_v1  ;;  %2589 = vmatmul.mubr.bf16.gmra.mrb[4].mxu1 %v8003_v0  ;;  %v8101_v0 = vld [vmem:[%s8442_s21 + $0x5a4] ss:$48 sps:$4 sm:$0xff]  }
  0x59   : > { %2596 = vmatprep.mubr.bf16.mxu1 %v8007_v2  ;;  %v8109_v2 = vld [vmem:[%s10450_s1 + $0xb8] sm:$0xff]  }
  0x5b   : > { %3134 = vmatpush1.bf16.msra.mxu0 %v7924_v34  ;;  %v7962_v34 = vld [vmem:[%s8442_s21 + $0x550] ss:$48 sps:$4 sm:$0xff]  }
  0x5c   : > { %3135 = vmatprep.subr.bf16.mxu0 %v8351_v1 }
  0x5e   : > { %2983 = vmatmul.mubr.bf16.gmra.mrb[8].mxu0 %v7911_v36  ;;  %v8057_v36 = vld [vmem:[%s8442_s21 + $0x360] ss:$48 sps:$4 sm:$0xff]  }
  0x5f   : > { %2990 = vmatprep.mubr.bf16.mxu0 %v7913_v37  ;;  %3136 = vmatpush1.bf16.msra.mxu0 %v7931_v38  ;;  %v8061_v37 = vld [vmem:[%s8442_s21 + $0x3c4] ss:$48 sps:$4 sm:$0xff]   ;;  %v7968_v38 = vld [vmem:[%s8442_s21 + $0x5b0] ss:$48 sps:$4 sm:$0xff]  }
  0x60   : > { %3137 = vmatprep.subr.bf16.mxu0 %v8351_v1  ;;  %2597 = vmatmul.mubr.bf16.gmra.mrb[8].mxu1 %v8009_v7  ;;  %v8104_v7 = vld [vmem:[%s8442_s21 + $0x5a0] ss:$48 sps:$4 sm:$0xff]  }
  0x61   : > { %2604 = vmatprep.mubr.bf16.mxu1 %v8014_v8  ;;  %v8110_v8 = vld [vmem:[%s8442_s21 + $0x604] ss:$48 sps:$4 sm:$0xff]  }
  0x63   : > { %3138 = vmatpush1.bf16.msra.mxu0 %v7935_v40  ;;  %v8064_v40 = vld [vmem:[%s8442_s21 + $0x3c0] ss:$48 sps:$4 sm:$0xff]  }
  0x64   : > { %3139 = vmatprep.subr.bf16.mxu0 %v8351_v1 }
  0x66   : > { %2991 = vmatmul.mubr.bf16.gmra.mrb[12].mxu0 %v7915_v42  ;;  %v8078_v42 = vld [vmem:[%s10450_s1 + $0x80] sm:$0xff]  }
  0x67   : > { %2998 = vmatprep.mubr.bf16.mxu0 %v7917_v43  ;;  %3140 = vmatpush1.bf16.msra.mxu0 %v7939_v44  ;;  %v7974_v43 = vld [vmem:[%s8442_s21 + $0x610] ss:$48 sps:$4 sm:$0xff]   ;;  %v7977_v44 = vld [vmem:[%s8442_s21 + $0x674] ss:$48 sps:$4 sm:$0xff]  }
  0x68   : > { %3141 = vmatprep.subr.bf16.mxu0 %v8351_v1  ;;  %2605 = vmatmul.mubr.bf16.gmra.mrb[12].mxu1 %v8016_v12  ;;  %v8006_v12 = vld [vmem:[%s8442_s21 + $0x78] ss:$48 sps:$4 sm:$0xff]  }
  0x69   : > { %2612 = vmatprep.mubr.bf16.mxu1 %v8021_v13  ;;  %2742 = vmatpush1.bf16.msra.mxu1 %v8078_v42  ;;  %v8010_v13 = vld [vmem:[%s8442_s21 + $0xdc] ss:$48 sps:$4 sm:$0xff]  }
  0x6a   : > { %2743 = vmatprep.subr.bf16.mxu1 %v8351_v1  ;;  %v8038_v42 = vld [vmem:[%s8442_s21 + $0x25c] ss:$48 sps:$4 sm:$0xff]  }
  0x6b   : > { %3142 = vmatpush1.bf16.msra.mxu0 %v7943_v47  ;;  %v8083_v47 = vld [vmem:[%s10450_s1 + $0x88] sm:$0xff]  }
  0x6c   : > { %3143 = vmatprep.subr.bf16.mxu0 %v8351_v1 }
  0x6d   : > { %2744 = vmatpush1.bf16.msra.mxu1 %v8083_v47  ;;  %v8040_v47 = vld [vmem:[%s8442_s21 + $0x258] ss:$48 sps:$4 sm:$0xff]  }
  0x6e   : > { %2999 = vmatmul.mubr.bf16.gmra.mrb[16].mxu0 %v7919_v49  ;;  %v7979_v49 = vld [vmem:[%s8442_s21 + $0x670] ss:$48 sps:$4 sm:$0xff]   ;;  %2745 = vmatprep.subr.bf16.mxu1 %v8351_v1 }
  0x6f   : > { %3006 = vmatprep.mubr.bf16.mxu0 %v7921_v50  ;;  %3144 = vmatpush1.bf16.msra.mxu0 %v7951_v51  ;;  %v7983_v50 = vld [vmem:[%s8442_s21 + $0x6d4] ss:$48 sps:$4 sm:$0xff]   ;;  %v8077_v51 = vld [vmem:[%s8442_s21 + $0x480] ss:$48 sps:$4 sm:$0xff]  }
  0x70   : > { %3145 = vmatprep.subr.bf16.mxu0 %v8351_v1  ;;  %2613 = vmatmul.mubr.bf16.gmra.mrb[16].mxu1 %v8023_v16  ;;  %v8119_v16 = vld [vmem:[%s8442_s21 + $0x664] ss:$48 sps:$4 sm:$0xff]  }
  0x71   : > { %2620 = vmatprep.mubr.bf16.mxu1 %v8027_v17  ;;  %2746 = vmatpush1.bf16.msra.mxu1 %v8087_v48  ;;  %v8127_v17 = vld [vmem:[%s10450_s1 + $0xd8] sm:$0xff]  }
  0x72   : > { %2747 = vmatprep.subr.bf16.mxu1 %v8351_v1  ;;  %v8044_v48 = vld [vmem:[%s8442_s21 + $0x2bc] ss:$48 sps:$4 sm:$0xff]  }
  0x73   : > { %3146 = vmatpush1.bf16.msra.mxu0 %v7958_v53  ;;  %v8091_v53 = vld [vmem:[%s10450_s1 + $0x98] sm:$0xff]  }
  0x74   : > { %3147 = vmatprep.subr.bf16.mxu0 %v8351_v1 }
  0x75   : > { %2748 = vmatpush1.bf16.msra.mxu1 %v8091_v53  ;;  %v8046_v53 = vld [vmem:[%s8442_s21 + $0x2b8] ss:$48 sps:$4 sm:$0xff]  }
  0x76   : > { %3007 = vmatmul.mubr.bf16.gmra.mrb[20].mxu0 %v7923_v55  ;;  %v7985_v55 = vld [vmem:[%s8442_s21 + $0x6d0] ss:$48 sps:$4 sm:$0xff]   ;;  %2749 = vmatprep.subr.bf16.mxu1 %v8351_v1 }
  0x77   : > { %3014 = vmatprep.mubr.bf16.mxu0 %v7925_v56  ;;  %3148 = vmatpush1.bf16.msra.mxu0 %v7964_v57  ;;  %v7989_v56 = vld [vmem:[%s8442_s21 + $0x734] ss:$48 sps:$4 sm:$0xff]   ;;  %v8086_v57 = vld [vmem:[%s8442_s21 + $0x4e0] ss:$48 sps:$4 sm:$0xff]  }
  0x78   : > { %3149 = vmatprep.subr.bf16.mxu0 %v8351_v1  ;;  %2621 = vmatmul.mubr.bf16.gmra.mrb[20].mxu1 %v8030_v20  ;;  %v8012_v20 = vld [vmem:[%s8442_s21 + $0xd8] ss:$48 sps:$4 sm:$0xff]  }
  0x79   : > { %2628 = vmatprep.mubr.bf16.mxu1 %v8034_v21  ;;  %2750 = vmatpush1.bf16.msra.mxu1 %v8096_v54  ;;  %v8017_v21 = vld [vmem:[%s8442_s21 + $0x13c] ss:$48 sps:$4 sm:$0xff]  }
  0x7a   : > { %2751 = vmatprep.subr.bf16.mxu1 %v8351_v1  ;;  %v8051_v54 = vld [vmem:[%s8442_s21 + $0x31c] ss:$48 sps:$4 sm:$0xff]  }
  0x7b   : > { %3150 = vmatpush1.bf16.msra.mxu0 %v7971_v60  ;;  %v8105_v60 = vld [vmem:[%s10450_s1 + $0xb0] sm:$0xff]  }
  0x7c   : > { %3151 = vmatprep.subr.bf16.mxu0 %v8351_v1 }
  0x7d   : > { %2752 = vmatpush1.bf16.msra.mxu1 %v8100_v59  ;;  %v8053_v59 = vld [vmem:[%s8442_s21 + $0x318] ss:$48 sps:$4 sm:$0xff]  }
  0x7e   : > { %3015 = vmatmul.mubr.bf16.gmra.mrb[24].mxu0 %v7927_v61  ;;  %v7991_v61 = vld [vmem:[%s8442_s21 + $0x730] ss:$48 sps:$4 sm:$0xff]   ;;  %2753 = vmatprep.subr.bf16.mxu1 %v8351_v1 }
  0x7f   : > { %3022 = vmatprep.mubr.bf16.mxu0 %v7928_v62  ;;  %3152 = vmatpush1.bf16.msra.mxu0 %v7980_v63  ;;  %v8000_v62 = vld [vmem:[%s8442_s21 + $0x1c] ss:$48 sps:$4 sm:$0xff]   ;;  %v8095_v63 = vld [vmem:[%s8442_s21 + $0x540] ss:$48 sps:$4 sm:$0xff]  }
  0x80   : > { %3153 = vmatprep.subr.bf16.mxu0 %v8351_v1  ;;  %2629 = vmatmul.mubr.bf16.gmra.mrb[24].mxu1 %v8036_v24  ;;  %v8128_v24 = vld [vmem:[%s8442_s21 + $0x6c4] ss:$48 sps:$4 sm:$0xff]  }
  0x81   : > { %2636 = vmatprep.mubr.bf16.mxu1 %v8041_v25  ;;  %2754 = vmatpush1.bf16.msra.mxu1 %v8105_v60  ;;  %v8135_v25 = vld [vmem:[%s10450_s1 + $0xe8] sm:$0xff]  }
  0x82   : > { %2755 = vmatprep.subr.bf16.mxu1 %v8351_v1  ;;  %v8058_v60 = vld [vmem:[%s8442_s21 + $0x37c] ss:$48 sps:$4 sm:$0xff]  }
  0x83   : > { %3154 = vmatpush1.bf16.msra.mxu0 %v7987_v3  ;;  %v8113_v3 = vld [vmem:[%s10450_s1 + $0xc0] sm:$0xff]  }
  0x84   : > { %3155 = vmatprep.subr.bf16.mxu0 %v8351_v1 }
  0x85   : > { %2756 = vmatpush1.bf16.msra.mxu1 %v8109_v2  ;;  %v8175_v2 = vld [vmem:[%s8442_s21 + $0x188] ss:$48 sps:$4 sm:$0xff]  }
  0x86   : > { %3023 = vmatmul.mubr.bf16.gmra.mrb[28].mxu0 %v7930_v4  ;;  %v7998_v4 = vld [vmem:[%s8442_s21 + $0x18] ss:$48 sps:$4 sm:$0xff]   ;;  %2757 = vmatprep.subr.bf16.mxu1 %v8351_v1 }
  0x87   : > { %3030 = vmatprep.mubr.bf16.mxu0 %v7932_v5  ;;  %3156 = vmatpush1.bf16.msra.mxu0 %v7992_v6  ;;  %v8004_v5 = vld [vmem:[%s8442_s21 + $0x7c] ss:$48 sps:$4 sm:$0xff]   ;;  %v8013_v6 = vld [vmem:[%s10450_s1 + $0x200] sm:$0xff]  }
  0x88   : > { %3157 = vmatprep.subr.bf16.mxu0 %v8351_v1  ;;  %2637 = vmatmul.mubr.bf16.gmra.mrb[28].mxu1 %v8043_v28  ;;  %v8019_v28 = vld [vmem:[%s8442_s21 + $0x138] ss:$48 sps:$4 sm:$0xff]  }
  0x89   : > { %2644 = vmatprep.mubr.bf16.mxu1 %v8048_v29  ;;  %2758 = vmatpush1.bf16.msra.mxu1 %v8113_v3  ;;  %v8024_v29 = vld [vmem:[%s8442_s21 + $0x19c] ss:$48 sps:$4 sm:$0xff]  }
  0x8a   : > { %2759 = vmatprep.subr.bf16.mxu1 %v8351_v1  ;;  %v8179_v3 = vld [vmem:[%s8442_s21 + $0x1ec] ss:$48 sps:$4 sm:$0xff]  }
  0x8b   : > { %3158 = vmatpush1.bf16.msra.mxu0 %v7997_v9  ;;  %v8118_v9 = vld [vmem:[%s10450_s1 + $0xc8] sm:$0xff]  }
  0x8c   : > { %3320 = vmatprep.subr.bf16.mxu0 %v8351_v1 }
  0x8d   : > { %2760 = vmatpush1.bf16.msra.mxu1 %v8118_v9  ;;  %v8079_v9 = vld [vmem:[%s8442_s21 + $0x49c] ss:$48 sps:$4 sm:$0xff]  }
  0x8e   : > { %3031 = vmatmul.mubr.bf16.gmra.mrb[32].mxu0 %v7934_v10  ;;  %v8020_v10 = vld [vmem:[%s10450_s1 + $0x208] sm:$0xff]   ;;  %2761 = vmatprep.subr.bf16.mxu1 %v8351_v1 }
  0x8f   : > { %3038 = vmatprep.mubr.bf16.mxu0 %v7936_v11  ;;  %v8122_v11 = vld [vmem:[%s10450_s1 + $0xd0] sm:$0xff]  }
  0x90   : > { %2645 = vmatmul.mubr.bf16.gmra.mrb[32].mxu1 %v8050_v32  ;;  %v8137_v32 = vld [vmem:[%s8442_s21 + $0x724] ss:$48 sps:$4 sm:$0xff]  }
  0x91   : > { %2652 = vmatprep.mubr.bf16.mxu1 %v8055_v33  ;;  %2762 = vmatpush1.bf16.msra.mxu1 %v8122_v11  ;;  %v8145_v33 = vld [vmem:[%s10450_s1 + $0xf8] sm:$0xff]  }
  0x92   : > { %2763 = vmatprep.subr.bf16.mxu1 %v8351_v1  ;;  %v8193_v11 = vld [vmem:[%s8442_s21 + $0x2ac] ss:$48 sps:$4 sm:$0xff]  }
  0x95   : > { %2764 = vmatpush1.bf16.msra.mxu1 %v8127_v17  ;;  %v8097_v17 = vld [vmem:[%s8442_s21 + $0x55c] ss:$48 sps:$4 sm:$0xff]  }
  0x96   : > { %3039 = vmatmul.mubr.bf16.gmra.mrb[36].mxu0 %v7938_v14  ;;  %v8029_v14 = vld [vmem:[%s10450_s1 + $0x210] sm:$0xff]   ;;  %2765 = vmatprep.subr.bf16.mxu1 %v8351_v1 }
  0x97   : > { %3046 = vmatprep.mubr.bf16.mxu0 %v7940_v15  ;;  %v8112_v15 = vld [vmem:[%s8442_s21 + $0x600] ss:$48 sps:$4 sm:$0xff]  }
  0x98   : > { %2653 = vmatmul.mubr.bf16.gmra.mrb[36].mxu1 %v8057_v36  ;;  %v8031_v36 = vld [vmem:[%s8442_s21 + $0x1fc] ss:$48 sps:$4 sm:$0xff]  }
  0x99   : > { %2660 = vmatprep.mubr.bf16.mxu1 %v8061_v37  ;;  %v8082_v37 = vld [vmem:[%s10450_s1 + $0x240] sm:$0xff]  }
  0x9e   : > { %3047 = vmatmul.mubr.bf16.gmra.mrb[40].mxu0 %v7942_v18  ;;  %v8037_v18 = vld [vmem:[%s10450_s1 + $0x218] sm:$0xff]  }
  0x9f   : > { %3054 = vmatprep.mubr.bf16.mxu0 %v7944_v19  ;;  %v8131_v19 = vld [vmem:[%s10450_s1 + $0xe0] sm:$0xff]  }
  0xa0   : > { %2661 = vmatmul.mubr.bf16.gmra.mrb[40].mxu1 %v8064_v40  ;;  %v8092_v40 = vld [vmem:[%s10450_s1 + $0x248] sm:$0xff]  }
  0xa1   : > { %2668 = vmatprep.mubr.bf16.mxu1 %v8068_v41  ;;  %2766 = vmatpush1.bf16.msra.mxu1 %v8131_v19  ;;  %v8033_v41 = vld [vmem:[%s8442_s21 + $0x1f8] ss:$48 sps:$4 sm:$0xff]   ;;  %v8206_v19 = vld [vmem:[%s8442_s21 + $0x36c] ss:$48 sps:$4 sm:$0xff]  }
  0xa2   : > { %2767 = vmatprep.subr.bf16.mxu1 %v8351_v1 }
  0xa5   : > { %2768 = vmatpush1.bf16.msra.mxu1 %v8135_v25  ;;  %v8115_v25 = vld [vmem:[%s8442_s21 + $0x61c] ss:$48 sps:$4 sm:$0xff]  }
  0xa6   : > { %3055 = vmatmul.mubr.bf16.gmra.mrb[44].mxu0 %v7946_v22  ;;  %v8047_v22 = vld [vmem:[%s10450_s1 + $0x220] sm:$0xff]   ;;  %2769 = vmatprep.subr.bf16.mxu1 %v8351_v1 }
  0xa7   : > { %3062 = vmatprep.mubr.bf16.mxu0 %v7948_v23  ;;  %v8121_v23 = vld [vmem:[%s8442_s21 + $0x660] ss:$48 sps:$4 sm:$0xff]  }
  0xa8   : > { %2669 = vmatmul.mubr.bf16.gmra.mrb[44].mxu1 %v8070_v45  ;;  %v8153_v45 = vld [vmem:[%s8442_s21 + $0x6c] ss:$48 sps:$4 sm:$0xff]  }
  0xa9   : > { %2676 = vmatprep.mubr.bf16.mxu1 %v8075_v46  ;;  %v8114_v46 = vld [vmem:[%s10450_s1 + $0x258] sm:$0xff]  }
  0xae   : > { %3063 = vmatmul.mubr.bf16.gmra.mrb[48].mxu0 %v7950_v26  ;;  %v8054_v26 = vld [vmem:[%s10450_s1 + $0x228] sm:$0xff]  }
  0xaf   : > { %3070 = vmatprep.mubr.bf16.mxu0 %v7954_v27  ;;  %v8140_v27 = vld [vmem:[%s10450_s1 + $0xf0] sm:$0xff]  }
  0xb0   : > { %2677 = vmatmul.mubr.bf16.gmra.mrb[48].mxu1 %v8077_v51  ;;  %v8159_v51 = vld [vmem:[%s8442_s21 + $0xcc] ss:$48 sps:$4 sm:$0xff]  }
  0xb1   : > { %2684 = vmatprep.mubr.bf16.mxu1 %v8084_v52  ;;  %2770 = vmatpush1.bf16.msra.mxu1 %v8140_v27  ;;  %v8136_v52 = vld [vmem:[%s10450_s1 + $0x268] sm:$0xff]  }
  0xb2   : > { %2771 = vmatprep.subr.bf16.mxu1 %v8351_v1  ;;  %v8219_v27 = vld [vmem:[%s8442_s21 + $0x42c] ss:$48 sps:$4 sm:$0xff]  }
  0xb5   : > { %2772 = vmatpush1.bf16.msra.mxu1 %v8145_v33  ;;  %v8132_v33 = vld [vmem:[%s8442_s21 + $0x6dc] ss:$48 sps:$4 sm:$0xff]  }
  0xb6   : > { %3071 = vmatmul.mubr.bf16.gmra.mrb[52].mxu0 %v7956_v30  ;;  %v8063_v30 = vld [vmem:[%s10450_s1 + $0x230] sm:$0xff]  }
  0xb7   : > { %3078 = vmatprep.mubr.bf16.mxu0 %v7960_v31  ;;  %v8130_v31 = vld [vmem:[%s8442_s21 + $0x6c0] ss:$48 sps:$4 sm:$0xff]  }
  0xb8   : > { %2685 = vmatmul.mubr.bf16.gmra.mrb[52].mxu1 %v8086_v57  ;;  %v8166_v57 = vld [vmem:[%s8442_s21 + $0x12c] ss:$48 sps:$4 sm:$0xff]  }
  0xb9   : > { %2692 = vmatprep.mubr.bf16.mxu1 %v8093_v58  ;;  %v8149_v58 = vld [vmem:[%s10450_s1 + $0x278] sm:$0xff]  }
  0xbe   : > { %3079 = vmatmul.mubr.bf16.gmra.mrb[56].mxu0 %v7962_v34  ;;  %v8071_v34 = vld [vmem:[%s10450_s1 + $0x238] sm:$0xff]  }
  0xbf   : > { %3086 = vmatprep.mubr.bf16.mxu0 %v7966_v35  ;;  %v8026_v35 = vld [vmem:[%s8442_s21 + $0x198] ss:$48 sps:$4 sm:$0xff]  }
  0xc0   : > { %2693 = vmatmul.mubr.bf16.gmra.mrb[56].mxu1 %v8095_v63  ;;  %v8060_v63 = vld [vmem:[%s8442_s21 + $0x378] ss:$48 sps:$4 sm:$0xff]  }
  0xc1   : > { %2700 = vmatprep.mubr.bf16.mxu1 %v8101_v0  ;;  %v8065_v0 = vld [vmem:[%s8442_s21 + $0x3dc] ss:$48 sps:$4 sm:$0xff]  }
  0xc6   : > { %3087 = vmatmul.mubr.bf16.gmra.mrb[60].mxu0 %v7968_v38  ;;  %v8139_v38 = vld [vmem:[%s8442_s21 + $0x720] ss:$48 sps:$4 sm:$0xff]  }
  0xc7   : > { %3094 = vmatprep.mubr.bf16.mxu0 %v7972_v39  ;;  %v8148_v39 = vld [vmem:[%s8442_s21 + $0xc] ss:$48 sps:$4 sm:$0xff]  }
  0xc8   : > { %2701 = vmatmul.mubr.bf16.gmra.mrb[60].mxu1 %v8104_v7  ;;  %v8186_v7 = vld [vmem:[%s8442_s21 + $0x24c] ss:$48 sps:$4 sm:$0xff]  }
  0xc9   : > { %2708 = vmatprep.mubr.bf16.mxu1 %v8110_v8  ;;  %v8074_v8 = vld [vmem:[%s8442_s21 + $0x438] ss:$48 sps:$4 sm:$0xff]  }
  0xce   : > { %3095 = vmatmul.mubr.bf16.gmra.mrb[64].mxu0 %v7974_v43  ;;  %v8103_v43 = vld [vmem:[%s10450_s1 + $0x250] sm:$0xff]  }
  0xcf   : > { %3102 = vmatprep.mubr.bf16.mxu0 %v7977_v44  ;;  %v8146_v44 = vld [vmem:[%s8442_s21 + $0x8] ss:$48 sps:$4 sm:$0xff]  }
  0xd0   : > { %2709 = vmatmul.mubr.bf16.gmra.mrb[64].mxu1 %v8112_v15  ;;  %v8199_v15 = vld [vmem:[%s8442_s21 + $0x30c] ss:$48 sps:$4 sm:$0xff]  }
  0xd1   : > { %2716 = vmatprep.mubr.bf16.mxu1 %v8119_v16  ;;  %v8090_v16 = vld [vmem:[%s8442_s21 + $0x4f8] ss:$48 sps:$4 sm:$0xff]  }
  0xd6   : > { %3103 = vmatmul.mubr.bf16.gmra.mrb[68].mxu0 %v7979_v49  ;;  %v8126_v49 = vld [vmem:[%s10450_s1 + $0x260] sm:$0xff]  }
  0xd7   : > { %3110 = vmatprep.mubr.bf16.mxu0 %v7983_v50  ;;  %v8155_v50 = vld [vmem:[%s8442_s21 + $0x68] ss:$48 sps:$4 sm:$0xff]  }
  0xd8   : > { %2717 = vmatmul.mubr.bf16.gmra.mrb[68].mxu1 %v8121_v23  ;;  %v8213_v23 = vld [vmem:[%s8442_s21 + $0x3cc] ss:$48 sps:$4 sm:$0xff]  }
  0xd9   : > { %2724 = vmatprep.mubr.bf16.mxu1 %v8128_v24  ;;  %v8108_v24 = vld [vmem:[%s8442_s21 + $0x5b8] ss:$48 sps:$4 sm:$0xff]  }
  0xde   : > { %3111 = vmatmul.mubr.bf16.gmra.mrb[72].mxu0 %v7985_v55  ;;  %v8144_v55 = vld [vmem:[%s10450_s1 + $0x270] sm:$0xff]  }
  0xdf   : > { %3118 = vmatprep.mubr.bf16.mxu0 %v7989_v56  ;;  %v8161_v56 = vld [vmem:[%s8442_s21 + $0xc8] ss:$48 sps:$4 sm:$0xff]  }
  0xe0   : > { %2725 = vmatmul.mubr.bf16.gmra.mrb[72].mxu1 %v8130_v31  ;;  %v8226_v31 = vld [vmem:[%s8442_s21 + $0x48c] ss:$48 sps:$4 sm:$0xff]  }
  0xe1   : > { %2732 = vmatprep.mubr.bf16.mxu1 %v8137_v32  ;;  %v8125_v32 = vld [vmem:[%s8442_s21 + $0x678] ss:$48 sps:$4 sm:$0xff]  }
  0xe6   : > { %3119 = vmatmul.mubr.bf16.gmra.mrb[76].mxu0 %v7991_v61  ;;  %v8168_v61 = vld [vmem:[%s8442_s21 + $0x128] ss:$48 sps:$4 sm:$0xff]  }
  0xe7   : > { %3159 = vmatprep.mubr.bf16.mxu0 %v8000_v62  ;;  %v8172_v62 = vld [vmem:[%s8442_s21 + $0x18c] ss:$48 sps:$4 sm:$0xff]  }
  0xe8   : > { %2733 = vmatmul.mubr.bf16.gmra.mrb[76].mxu1 %v8139_v38  ;;  %v8235_v38 = vld [vmem:[%s8442_s21 + $0x4e8] ss:$48 sps:$4 sm:$0xff]  }
  0xe9   : > { %2773 = vmatprep.mubr.bf16.mxu1 %v8148_v39  ;;  %v8239_v39 = vld [vmem:[%s8442_s21 + $0x54c] ss:$48 sps:$4 sm:$0xff]  }
  0xee   : > { %3160 = vmatmul.mubr.bf16.vlgmr.msra.gmra.mrb[0].mxu0 %v7998_v4  ;;  %v8067_v4 = vld [vmem:[%s8442_s21 + $0x3d8] ss:$48 sps:$4 sm:$0xff]  }
  0xef   : > { %3167 = vmatprep.mubr.bf16.mxu0 %v8004_v5  ;;  %3321 = vmatpush1.bf16.msra.mxu0 %v8013_v6  ;;  %v8072_v5 = vld [vmem:[%s8442_s21 + $0x43c] ss:$48 sps:$4 sm:$0xff]   ;;  %v8181_v6 = vld [vmem:[%s8442_s21 + $0x1e8] ss:$48 sps:$4 sm:$0xff]  }
  0xf0   : > { %3322 = vmatprep.subr.bf16.mxu0 %v8351_v1  ;;  %2774 = vmatmul.mubr.bf16.vlgmr.msra.gmra.mrb[0].mxu1 %v8146_v44  ;;  %v8150_v44 = vld [vmem:[%s8442_s21 + $0x20] ss:$48 sps:$4 sm:$0xff]  }
  0xf1   : > { %2781 = vmatprep.mubr.bf16.mxu1 %v8153_v45  ;;  %v8156_v45 = vld [vmem:[%s8442_s21 + $0x84] ss:$48 sps:$4 sm:$0xff]  }
  0xf3   : > { %3323 = vmatpush1.bf16.msra.mxu0 %v8020_v10  ;;  %v8188_v10 = vld [vmem:[%s8442_s21 + $0x248] ss:$48 sps:$4 sm:$0xff]  }
  0xf4   : > { %3324 = vmatprep.subr.bf16.mxu0 %v8351_v1 }
  0xf6   : > { %3168 = vmatmul.mubr.bf16.gmra.mrb[4].mxu0 %v8006_v12  ;;  %v8081_v12 = vld [vmem:[%s8442_s21 + $0x498] ss:$48 sps:$4 sm:$0xff]  }
  0xf7   : > { %3175 = vmatprep.mubr.bf16.mxu0 %v8010_v13  ;;  %3325 = vmatpush1.bf16.msra.mxu0 %v8029_v14  ;;  %v8088_v13 = vld [vmem:[%s8442_s21 + $0x4fc] ss:$48 sps:$4 sm:$0xff]   ;;  %v8195_v14 = vld [vmem:[%s8442_s21 + $0x2a8] ss:$48 sps:$4 sm:$0xff]  }
  0xf8   : > { %3326 = vmatprep.subr.bf16.mxu0 %v8351_v1  ;;  %2782 = vmatmul.mubr.bf16.gmra.mrb[4].mxu1 %v8155_v50  ;;  %v8158_v50 = vld [vmem:[%s8442_s21 + $0x80] ss:$48 sps:$4 sm:$0xff]  }
  0xf9   : > { %2789 = vmatprep.mubr.bf16.mxu1 %v8159_v51  ;;  %v8162_v51 = vld [vmem:[%s8442_s21 + $0xe4] ss:$48 sps:$4 sm:$0xff]  }
  0xfb   : > { %3327 = vmatpush1.bf16.msra.mxu0 %v8037_v18  ;;  %v8201_v18 = vld [vmem:[%s8442_s21 + $0x308] ss:$48 sps:$4 sm:$0xff]  }
  0xfc   : > { %3328 = vmatprep.subr.bf16.mxu0 %v8351_v1 }
  0xfe   : > { %3176 = vmatmul.mubr.bf16.gmra.mrb[8].mxu0 %v8012_v20  ;;  %v8099_v20 = vld [vmem:[%s8442_s21 + $0x558] ss:$48 sps:$4 sm:$0xff]  }
  0xff   : > { %3183 = vmatprep.mubr.bf16.mxu0 %v8017_v21  ;;  %3329 = vmatpush1.bf16.msra.mxu0 %v8047_v22  ;;  %v8106_v21 = vld [vmem:[%s8442_s21 + $0x5bc] ss:$48 sps:$4 sm:$0xff]   ;;  %v8208_v22 = vld [vmem:[%s8442_s21 + $0x368] ss:$48 sps:$4 sm:$0xff]  }
 0x100   : > { %3330 = vmatprep.subr.bf16.mxu0 %v8351_v1  ;;  %2790 = vmatmul.mubr.bf16.gmra.mrb[8].mxu1 %v8161_v56  ;;  %v8164_v56 = vld [vmem:[%s8442_s21 + $0xe0] ss:$48 sps:$4 sm:$0xff]  }
 0x101   : > { %2797 = vmatprep.mubr.bf16.mxu1 %v8166_v57  ;;  %v8169_v57 = vld [vmem:[%s8442_s21 + $0x144] ss:$48 sps:$4 sm:$0xff]  }
 0x103   : > { %3331 = vmatpush1.bf16.msra.mxu0 %v8054_v26  ;;  %v8215_v26 = vld [vmem:[%s8442_s21 + $0x3c8] ss:$48 sps:$4 sm:$0xff]  }
 0x104   : > { %3332 = vmatprep.subr.bf16.mxu0 %v8351_v1 }
 0x106   : > { %3184 = vmatmul.mubr.bf16.gmra.mrb[12].mxu0 %v8019_v28  ;;  %v8117_v28 = vld [vmem:[%s8442_s21 + $0x618] ss:$48 sps:$4 sm:$0xff]  }
 0x107   : > { %3191 = vmatprep.mubr.bf16.mxu0 %v8024_v29  ;;  %3333 = vmatpush1.bf16.msra.mxu0 %v8063_v30  ;;  %v8123_v29 = vld [vmem:[%s8442_s21 + $0x67c] ss:$48 sps:$4 sm:$0xff]   ;;  %v8221_v30 = vld [vmem:[%s8442_s21 + $0x428] ss:$48 sps:$4 sm:$0xff]  }
 0x108   : > { %3334 = vmatprep.subr.bf16.mxu0 %v8351_v1  ;;  %2798 = vmatmul.mubr.bf16.gmra.mrb[12].mxu1 %v8168_v61  ;;  %v8212_v61 = vld [vmem:[%s10450_s1 + $0x2a8] sm:$0xff]  }
 0x109   : > { %2805 = vmatprep.mubr.bf16.mxu1 %v8172_v62  ;;  %v8171_v62 = vld [vmem:[%s8442_s21 + $0x140] ss:$48 sps:$4 sm:$0xff]  }
 0x10b   : > { %3335 = vmatpush1.bf16.msra.mxu0 %v8071_v34  ;;  %v8228_v34 = vld [vmem:[%s8442_s21 + $0x488] ss:$48 sps:$4 sm:$0xff]  }
 0x10c   : > { %3336 = vmatprep.subr.bf16.mxu0 %v8351_v1 }
 0x10e   : > { %3192 = vmatmul.mubr.bf16.gmra.mrb[16].mxu0 %v8026_v35  ;;  %v8233_v35 = vld [vmem:[%s8442_s21 + $0x4ec] ss:$48 sps:$4 sm:$0xff]  }
 0x10f   : > { %3199 = vmatprep.mubr.bf16.mxu0 %v8031_v36  ;;  %3337 = vmatpush1.bf16.msra.mxu0 %v8082_v37  ;;  %v8134_v36 = vld [vmem:[%s8442_s21 + $0x6d8] ss:$48 sps:$4 sm:$0xff]   ;;  %v8141_v37 = vld [vmem:[%s8442_s21 + $0x73c] ss:$48 sps:$4 sm:$0xff]  }
 0x110   : > { %3338 = vmatprep.subr.bf16.mxu0 %v8351_v1  ;;  %2806 = vmatmul.mubr.bf16.gmra.mrb[16].mxu1 %v8175_v2  ;;  %v8268_v2 = vld [vmem:[%s8442_s21 + $0x6c8] ss:$48 sps:$4 sm:$0xff]  }
 0x111   : > { %2813 = vmatprep.mubr.bf16.mxu1 %v8179_v3  ;;  %v8273_v3 = vld [vmem:[%s8442_s21 + $0x72c] ss:$48 sps:$4 sm:$0xff]  }
 0x113   : > { %3339 = vmatpush1.bf16.msra.mxu0 %v8092_v40  ;;  %v8143_v40 = vld [vmem:[%s8442_s21 + $0x738] ss:$48 sps:$4 sm:$0xff]  }
 0x114   : > { %3340 = vmatprep.subr.bf16.mxu0 %v8351_v1 }
 0x116   : > { %3200 = vmatmul.mubr.bf16.gmra.mrb[20].mxu0 %v8033_v41  ;;  %v8152_v41 = vld [vmem:[%s8442_s21 + $0x24] ss:$48 sps:$4 sm:$0xff]  }
 0x117   : > { %3207 = vmatprep.mubr.bf16.mxu0 %v8038_v42  ;;  %3341 = vmatpush1.bf16.msra.mxu0 %v8103_v43  ;;  %v8242_v42 = vld [vmem:[%s8442_s21 + $0x548] ss:$48 sps:$4 sm:$0xff]   ;;  %v8246_v43 = vld [vmem:[%s8442_s21 + $0x5ac] ss:$48 sps:$4 sm:$0xff]  }
 0x118   : > { %3342 = vmatprep.subr.bf16.mxu0 %v8351_v1  ;;  %2814 = vmatmul.mubr.bf16.gmra.mrb[20].mxu1 %v8181_v6  ;;  %v8182_v6 = vld [vmem:[%s8442_s21 + $0x204] ss:$48 sps:$4 sm:$0xff]  }
 0x119   : > { %2821 = vmatprep.mubr.bf16.mxu1 %v8186_v7  ;;  %v8241_v7 = vld [vmem:[%s10450_s1 + $0x2c0] sm:$0xff]  }
 0x11b   : > { %3343 = vmatpush1.bf16.msra.mxu0 %v8114_v46  ;;  %v8165_v46 = vld [vmem:[%s10450_s1 + $0x280] sm:$0xff]  }
 0x11c   : > { %3344 = vmatprep.subr.bf16.mxu0 %v8351_v1 }
 0x11e   : > { %3208 = vmatmul.mubr.bf16.gmra.mrb[24].mxu0 %v8040_v47  ;;  %v8248_v47 = vld [vmem:[%s8442_s21 + $0x5a8] ss:$48 sps:$4 sm:$0xff]  }
 0x11f   : > { %3215 = vmatprep.mubr.bf16.mxu0 %v8044_v48  ;;  %3345 = vmatpush1.bf16.msra.mxu0 %v8126_v49  ;;  %v8253_v48 = vld [vmem:[%s8442_s21 + $0x60c] ss:$48 sps:$4 sm:$0xff]  }
 0x120   : > { %3346 = vmatprep.subr.bf16.mxu0 %v8351_v1  ;;  %2822 = vmatmul.mubr.bf16.gmra.mrb[24].mxu1 %v8188_v10  ;;  %v8174_v49 = vld [vmem:[%s10450_s1 + $0x288] sm:$0xff]   ;;  %v8185_v10 = vld [vmem:[%s8442_s21 + $0x200] ss:$48 sps:$4 sm:$0xff]  }
 0x121   : > { %2829 = vmatprep.mubr.bf16.mxu1 %v8193_v11  ;;  %v8189_v11 = vld [vmem:[%s8442_s21 + $0x264] ss:$48 sps:$4 sm:$0xff]  }
 0x123   : > { %3347 = vmatpush1.bf16.msra.mxu0 %v8136_v52  ;;  %v8184_v52 = vld [vmem:[%s10450_s1 + $0x290] sm:$0xff]  }
 0x124   : > { %3348 = vmatprep.subr.bf16.mxu0 %v8351_v1 }
 0x126   : > { %3216 = vmatmul.mubr.bf16.gmra.mrb[28].mxu0 %v8046_v53  ;;  %v8255_v53 = vld [vmem:[%s8442_s21 + $0x608] ss:$48 sps:$4 sm:$0xff]  }
 0x127   : > { %3223 = vmatprep.mubr.bf16.mxu0 %v8051_v54  ;;  %3349 = vmatpush1.bf16.msra.mxu0 %v8144_v55  ;;  %v8260_v54 = vld [vmem:[%s8442_s21 + $0x66c] ss:$48 sps:$4 sm:$0xff]  }
 0x128   : > { %3350 = vmatprep.subr.bf16.mxu0 %v8351_v1  ;;  %2830 = vmatmul.mubr.bf16.gmra.mrb[28].mxu1 %v8195_v14  ;;  %v8192_v55 = vld [vmem:[%s10450_s1 + $0x298] sm:$0xff]   ;;  %v8191_v14 = vld [vmem:[%s8442_s21 + $0x260] ss:$48 sps:$4 sm:$0xff]  }
 0x129   : > { %2837 = vmatprep.mubr.bf16.mxu1 %v8199_v15  ;;  %v8196_v15 = vld [vmem:[%s8442_s21 + $0x2c4] ss:$48 sps:$4 sm:$0xff]  }
 0x12b   : > { %3351 = vmatpush1.bf16.msra.mxu0 %v8149_v58  ;;  %v8202_v58 = vld [vmem:[%s10450_s1 + $0x2a0] sm:$0xff]  }
 0x12c   : > { %3513 = vmatprep.subr.bf16.mxu0 %v8351_v1 }
 0x12e   : > { %3224 = vmatmul.mubr.bf16.gmra.mrb[32].mxu0 %v8053_v59  ;;  %v8262_v59 = vld [vmem:[%s8442_s21 + $0x668] ss:$48 sps:$4 sm:$0xff]  }
 0x12f   : > { %3231 = vmatprep.mubr.bf16.mxu0 %v8058_v60  ;;  %v8266_v60 = vld [vmem:[%s8442_s21 + $0x6cc] ss:$48 sps:$4 sm:$0xff]  }
 0x130   : > { %2838 = vmatmul.mubr.bf16.gmra.mrb[32].mxu1 %v8201_v18 }
 0x131   : > { %2845 = vmatprep.mubr.bf16.mxu1 %v8206_v19  ;;  %v8198_v19 = vld [vmem:[%s8442_s21 + $0x2c0] ss:$48 sps:$4 sm:$0xff]  }
 0x136   : > { %3232 = vmatmul.mubr.bf16.gmra.mrb[36].mxu0 %v8060_v63  ;;  %v8176_v63 = vld [vmem:[%s8442_s21 + $0x1a4] ss:$48 sps:$4 sm:$0xff]  }
 0x137   : > { %3239 = vmatprep.mubr.bf16.mxu0 %v8065_v0  ;;  %v8222_v0 = vld [vmem:[%s10450_s1 + $0x2b0] sm:$0xff]  }
 0x138   : > { %2846 = vmatmul.mubr.bf16.gmra.mrb[36].mxu1 %v8208_v22  ;;  %v8209_v22 = vld [vmem:[%s8442_s21 + $0x384] ss:$48 sps:$4 sm:$0xff]  }
 0x139   : > { %2853 = vmatprep.mubr.bf16.mxu1 %v8213_v23  ;;  %v8211_v23 = vld [vmem:[%s8442_s21 + $0x380] ss:$48 sps:$4 sm:$0xff]  }
 0x13e   : > { %3240 = vmatmul.mubr.bf16.gmra.mrb[40].mxu0 %v8067_v4  ;;  %v8232_v4 = vld [vmem:[%s10450_s1 + $0x2b8] sm:$0xff]  }
 0x13f   : > { %3247 = vmatprep.mubr.bf16.mxu0 %v8072_v5  ;;  %v8178_v5 = vld [vmem:[%s8442_s21 + $0x1a0] ss:$48 sps:$4 sm:$0xff]  }
 0x140   : > { %2854 = vmatmul.mubr.bf16.gmra.mrb[40].mxu1 %v8215_v26  ;;  %v8225_v26 = vld [vmem:[%s8442_s21 + $0x440] ss:$48 sps:$4 sm:$0xff]  }
 0x141   : > { %2861 = vmatprep.mubr.bf16.mxu1 %v8219_v27  ;;  %v8229_v27 = vld [vmem:[%s8442_s21 + $0x4a4] ss:$48 sps:$4 sm:$0xff]  }
 0x146   : > { %3248 = vmatmul.mubr.bf16.gmra.mrb[44].mxu0 %v8074_v8  ;;  %v8275_v8 = vld [vmem:[%s8442_s21 + $0x728] ss:$48 sps:$4 sm:$0xff]  }
 0x147   : > { %3255 = vmatprep.mubr.bf16.mxu0 %v8079_v9  ;;  %v8251_v9 = vld [vmem:[%s10450_s1 + $0x2c8] sm:$0xff]  }
 0x148   : > { %2862 = vmatmul.mubr.bf16.gmra.mrb[44].mxu1 %v8221_v30 }
 0x149   : > { %2869 = vmatprep.mubr.bf16.mxu1 %v8226_v31 }
 0x14e   : > { %3256 = vmatmul.mubr.bf16.gmra.mrb[48].mxu0 %v8081_v12  ;;  %v8259_v12 = vld [vmem:[%s10450_s1 + $0x2d0] sm:$0xff]  }
 0x14f   : > { %3263 = vmatprep.mubr.bf16.mxu0 %v8088_v13  ;;  %v8269_v13 = vld [vmem:[%s10450_s1 + $0x2d8] sm:$0xff]  }
 0x150   : > { %2870 = vmatmul.mubr.bf16.gmra.mrb[48].mxu1 %v8228_v34  ;;  %v8238_v34 = vld [vmem:[%s8442_s21 + $0x500] ss:$48 sps:$4 sm:$0xff]  }
 0x151   : > { %2877 = vmatprep.mubr.bf16.mxu1 %v8233_v35  ;;  %v8243_v35 = vld [vmem:[%s8442_s21 + $0x564] ss:$48 sps:$4 sm:$0xff]  }
 0x156   : > { %3264 = vmatmul.mubr.bf16.gmra.mrb[52].mxu0 %v8090_v16  ;;  %v8279_v16 = vld [vmem:[%s10450_s1 + $0x2e0] sm:$0xff]  }
 0x157   : > { %3271 = vmatprep.mubr.bf16.mxu0 %v8097_v17  ;;  %v8280_v17 = vld [vmem:[%s10450_s1 + $0x2e8] sm:$0x3f]  }
 0x158   : > { %2878 = vmatmul.mubr.bf16.gmra.mrb[52].mxu1 %v8235_v38  ;;  %v2546_v18 = vsel %vm2544_vm0, %v8280_v17, 0 }
 0x159   : > { %2885 = vmatprep.mubr.bf16.mxu1 %v8239_v39 }
 0x15e   : > { %3272 = vmatmul.mubr.bf16.gmra.mrb[56].mxu0 %v8099_v20  ;;  %v8203_v20 = vld [vmem:[%s8442_s21 + $0x324] ss:$48 sps:$4 sm:$0xff]  }
 0x15f   : > { %3279 = vmatprep.mubr.bf16.mxu0 %v8106_v21  ;;  %v8205_v21 = vld [vmem:[%s8442_s21 + $0x320] ss:$48 sps:$4 sm:$0xff]  }
 0x160   : > { %2886 = vmatmul.mubr.bf16.gmra.mrb[56].mxu1 %v8242_v42 }
 0x161   : > { %2893 = vmatprep.mubr.bf16.mxu1 %v8246_v43 }
 0x166   : > { %3280 = vmatmul.mubr.bf16.gmra.mrb[60].mxu0 %v8108_v24  ;;  %v8216_v24 = vld [vmem:[%s8442_s21 + $0x3e4] ss:$48 sps:$4 sm:$0xff]  }
 0x167   : > { %3287 = vmatprep.mubr.bf16.mxu0 %v8115_v25  ;;  %v8223_v25 = vld [vmem:[%s8442_s21 + $0x444] ss:$48 sps:$4 sm:$0xff]  }
 0x168   : > { %2894 = vmatmul.mubr.bf16.gmra.mrb[60].mxu1 %v8248_v47  ;;  %v8256_v47 = vld [vmem:[%s8442_s21 + $0x624] ss:$48 sps:$4 sm:$0xff]  }
 0x169   : > { %2901 = vmatprep.mubr.bf16.mxu1 %v8253_v48 }
 0x16e   : > { %3288 = vmatmul.mubr.bf16.gmra.mrb[64].mxu0 %v8117_v28  ;;  %v8231_v28 = vld [vmem:[%s8442_s21 + $0x4a0] ss:$48 sps:$4 sm:$0xff]  }
 0x16f   : > { %3295 = vmatprep.mubr.bf16.mxu0 %v8123_v29  ;;  %v8236_v29 = vld [vmem:[%s8442_s21 + $0x504] ss:$48 sps:$4 sm:$0xff]  }
 0x170   : > { %2902 = vmatmul.mubr.bf16.gmra.mrb[64].mxu1 %v8255_v53  ;;  %v8263_v53 = vld [vmem:[%s8442_s21 + $0x684] ss:$48 sps:$4 sm:$0xff]  }
 0x171   : > { %2909 = vmatprep.mubr.bf16.mxu1 %v8260_v54 }
 0x176   : > { %3296 = vmatmul.mubr.bf16.gmra.mrb[68].mxu0 %v8125_v32 }
 0x177   : > { %3303 = vmatprep.mubr.bf16.mxu0 %v8132_v33 }
 0x178   : > { %2910 = vmatmul.mubr.bf16.gmra.mrb[68].mxu1 %v8262_v59  ;;  %v8270_v59 = vld [vmem:[%s8442_s21 + $0x6e4] ss:$48 sps:$4 sm:$0xff]  }
 0x179   : > { %2917 = vmatprep.mubr.bf16.mxu1 %v8266_v60 }
 0x17e   : > { %3304 = vmatmul.mubr.bf16.gmra.mrb[72].mxu0 %v8134_v36 }
 0x17f   : > { %3311 = vmatprep.mubr.bf16.mxu0 %v8141_v37 }
 0x180   : > { %2918 = vmatmul.mubr.bf16.gmra.mrb[72].mxu1 %v8268_v2  ;;  %v8276_v2 = vld [vmem:[%s8442_s21 + $0x744] ss:$48 sps:$4 sm:$0xff]  }
 0x181   : > { %2925 = vmatprep.mubr.bf16.mxu1 %v8273_v3 }
 0x186   : > { %3312 = vmatmul.mubr.bf16.gmra.mrb[76].mxu0 %v8143_v40  ;;  %v8245_v40 = vld [vmem:[%s8442_s21 + $0x560] ss:$48 sps:$4 sm:$0xff]  }
 0x187   : > { %3352 = vmatprep.mubr.bf16.mxu0 %v8152_v41  ;;  %v8249_v41 = vld [vmem:[%s8442_s21 + $0x5c4] ss:$48 sps:$4 sm:$0xff]  }
 0x188   : > { %2926 = vmatmul.mubr.bf16.gmra.mrb[76].mxu1 %v8275_v8  ;;  %v8283_v8 = vld [vmem:[%s8442_s21 + $0x2c] ss:$48 sps:$4 sm:$0xff]  }
 0x18e   : > { %3353 = vmatmul.mubr.bf16.vlgmr.msra.gmra.mrb[0].mxu0 %v8150_v44 }
 0x18f   : > { %3360 = vmatprep.mubr.bf16.mxu0 %v8156_v45  ;;  %3514 = vmatpush1.bf16.msra.mxu0 %v8165_v46  ;;  %v8252_v46 = vld [vmem:[%s8442_s21 + $0x5c0] ss:$48 sps:$4 sm:$0xff]  }
 0x190   : > { %3515 = vmatprep.subr.bf16.mxu0 %v8351_v1 }
 0x193   : > { %3516 = vmatpush1.bf16.msra.mxu0 %v8174_v49 }
 0x194   : > { %3517 = vmatprep.subr.bf16.mxu0 %v8351_v1 }
 0x196   : > { %3361 = vmatmul.mubr.bf16.gmra.mrb[4].mxu0 %v8158_v50 }
 0x197   : > { %3368 = vmatprep.mubr.bf16.mxu0 %v8162_v51  ;;  %3518 = vmatpush1.bf16.msra.mxu0 %v8184_v52  ;;  %v8258_v52 = vld [vmem:[%s8442_s21 + $0x620] ss:$48 sps:$4 sm:$0xff]  }
 0x198   : > { %3519 = vmatprep.subr.bf16.mxu0 %v8351_v1 }
 0x19b   : > { %3520 = vmatpush1.bf16.msra.mxu0 %v8192_v55 }
 0x19c   : > { %3521 = vmatprep.subr.bf16.mxu0 %v8351_v1 }
 0x19e   : > { %3369 = vmatmul.mubr.bf16.gmra.mrb[8].mxu0 %v8164_v56 }
 0x19f   : > { %3376 = vmatprep.mubr.bf16.mxu0 %v8169_v57  ;;  %3522 = vmatpush1.bf16.msra.mxu0 %v8202_v58  ;;  %v8265_v58 = vld [vmem:[%s8442_s21 + $0x680] ss:$48 sps:$4 sm:$0xff]  }
 0x1a0   : > { %3523 = vmatprep.subr.bf16.mxu0 %v8351_v1 }
 0x1a3   : > { %3524 = vmatpush1.bf16.msra.mxu0 %v8212_v61 }
 0x1a4   : > { %3525 = vmatprep.subr.bf16.mxu0 %v8351_v1 }
 0x1a6   : > { %3377 = vmatmul.mubr.bf16.gmra.mrb[12].mxu0 %v8171_v62 }
 0x1a7   : > { %3384 = vmatprep.mubr.bf16.mxu0 %v8176_v63  ;;  %3526 = vmatpush1.bf16.msra.mxu0 %v8222_v0  ;;  %v8272_v0 = vld [vmem:[%s8442_s21 + $0x6e0] ss:$48 sps:$4 sm:$0xff]  }
 0x1a8   : > { %3527 = vmatprep.subr.bf16.mxu0 %v8351_v1 }
 0x1ab   : > { %3528 = vmatpush1.bf16.msra.mxu0 %v8232_v4 }
 0x1ac   : > { %3529 = vmatprep.subr.bf16.mxu0 %v8351_v1 }
 0x1ae   : > { %3385 = vmatmul.mubr.bf16.gmra.mrb[16].mxu0 %v8178_v5 }
 0x1af   : > { %3392 = vmatprep.mubr.bf16.mxu0 %v8182_v6  ;;  %3530 = vmatpush1.bf16.msra.mxu0 %v8241_v7  ;;  %v8278_v7 = vld [vmem:[%s8442_s21 + $0x740] ss:$48 sps:$4 sm:$0xff]  }
 0x1b0   : > { %3531 = vmatprep.subr.bf16.mxu0 %v8351_v1 }
 0x1b3   : > { %3532 = vmatpush1.bf16.msra.mxu0 %v8251_v9 }
 0x1b4   : > { %3533 = vmatprep.subr.bf16.mxu0 %v8351_v1 }
 0x1b6   : > { %3393 = vmatmul.mubr.bf16.gmra.mrb[20].mxu0 %v8185_v10 }
 0x1b7   : > { %3400 = vmatprep.mubr.bf16.mxu0 %v8189_v11  ;;  %3534 = vmatpush1.bf16.msra.mxu0 %v8259_v12 }
 0x1b8   : > { %3535 = vmatprep.subr.bf16.mxu0 %v8351_v1 }
 0x1bb   : > { %3536 = vmatpush1.bf16.msra.mxu0 %v8269_v13  ;;  %v8281_v13 = vld [vmem:[%s8442_s21 + $0x28] ss:$48 sps:$4 sm:$0xff]  }
 0x1bc   : > { %3537 = vmatprep.subr.bf16.mxu0 %v8351_v1 }
 0x1be   : > { %3401 = vmatmul.mubr.bf16.gmra.mrb[24].mxu0 %v8191_v14  ;;  %v8284_v14 = vld [vmem:[%s8442_s21 + $0x8c] ss:$48 sps:$4 sm:$0xff]  }
 0x1bf   : > { %3408 = vmatprep.mubr.bf16.mxu0 %v8196_v15  ;;  %3538 = vmatpush1.bf16.msra.mxu0 %v8279_v16 }
 0x1c0   : > { %3539 = vmatprep.subr.bf16.mxu0 %v8351_v1  ;;  %v8218_v1 = vld [vmem:[%s8442_s21 + $0x3e0] ss:$48 sps:$4 sm:$0xff]  }
 0x1c3   : > { %3540 = vmatpush1.bf16.msra.mxu0 %v2546_v18  ;;  %v8988_v30 = vpop.f32.mrb[0].mxu1 }
 0x1c4   : > { %v2777_v31 = vpop.f32.mrb[1].mxu1 }
 0x1c5   : > { %v8990_v32 = vpop.f32.mrb[2].mxu1  ;;  %v8292_v31 = vld [vmem:[%s8442_s21 + $0x148] ss:$48 sps:$4 sm:$0xff]  }
 0x1c6   : > { %3409 = vmatmul.mubr.bf16.gmra.mrb[28].mxu0 %v8198_v19  ;;  %v2780_v33 = vpop.f32.mrb[3].mxu1  ;;  %v8286_v19 = vld [vmem:[%s8442_s21 + $0x88] ss:$48 sps:$4 sm:$0xff]  }
 0x1c7   : > { %3416 = vmatprep.mubr.bf16.mxu0 %v8203_v20  ;;  %v8287_v20 = vld [vmem:[%s8442_s21 + $0xec] ss:$48 sps:$4 sm:$0xff]  }
 0x1c8   : > { %v8293_v33 = vld [vmem:[%s8442_s21 + $0x1ac] ss:$48 sps:$4 sm:$0xff]  }
 0x1cb   : > { %v8994_v36 = vpop.f32.mrb[4].mxu1 }
 0x1cc   : > { %v2785_v37 = vpop.f32.mrb[5].mxu1 }
 0x1cd   : > { %v8996_v38 = vpop.f32.mrb[6].mxu1 }
 0x1ce   : > { %3417 = vmatmul.mubr.bf16.gmra.mrb[32].mxu0 %v8205_v21  ;;  %v2788_v39 = vpop.f32.mrb[7].mxu1 }
 0x1cf   : > { %3424 = vmatprep.mubr.bf16.mxu0 %v8209_v22 }
 0x1d3   : > { %v9000_v42 = vpop.f32.mrb[8].mxu1 }
 0x1d4   : > { %v2793_v43 = vpop.f32.mrb[9].mxu1 }
 0x1d5   : > { %v9002_v44 = vpop.f32.mrb[10].mxu1 }
 0x1d6   : > { %3425 = vmatmul.mubr.bf16.gmra.mrb[36].mxu0 %v8211_v23  ;;  %v2796_v45 = vpop.f32.mrb[11].mxu1 }
 0x1d7   : > { %3432 = vmatprep.mubr.bf16.mxu0 %v8216_v24 }
 0x1db   : > { %v9006_v48 = vpop.f32.mrb[12].mxu1 }
 0x1dc   : > { %v2801_v49 = vpop.f32.mrb[13].mxu1 }
 0x1dd   : > { %v9008_v50 = vpop.f32.mrb[14].mxu1  ;;  %v8298_v49 = vld [vmem:[%s8442_s21 + $0x208] ss:$48 sps:$4 sm:$0xff]  }
 0x1de   : > { %3433 = vmatmul.mubr.bf16.gmra.mrb[40].mxu0 %v8218_v1  ;;  %v2804_v51 = vpop.f32.mrb[15].mxu1  ;;  %v8289_v1 = vld [vmem:[%s8442_s21 + $0xe8] ss:$48 sps:$4 sm:$0xff]  }
 0x1df   : > { %3440 = vmatprep.mubr.bf16.mxu0 %v8223_v25  ;;  %v8290_v25 = vld [vmem:[%s8442_s21 + $0x14c] ss:$48 sps:$4 sm:$0xff]  }
 0x1e0   : > { %v8299_v51 = vld [vmem:[%s8442_s21 + $0x26c] ss:$48 sps:$4 sm:$0xff]  }
 0x1e3   : > { %v9012_v54 = vpop.f32.mrb[16].mxu1 }
 0x1e4   : > { %v2809_v55 = vpop.f32.mrb[17].mxu1 }
 0x1e5   : > { %v9014_v56 = vpop.f32.mrb[18].mxu1 }
 0x1e6   : > { %3441 = vmatmul.mubr.bf16.gmra.mrb[44].mxu0 %v8225_v26  ;;  %v2812_v57 = vpop.f32.mrb[19].mxu1 }
 0x1e7   : > { %3448 = vmatprep.mubr.bf16.mxu0 %v8229_v27 }
 0x1eb   : > { %v9018_v60 = vpop.f32.mrb[20].mxu1 }
 0x1ec   : > { %v2817_v61 = vpop.f32.mrb[21].mxu1 }
 0x1ed   : > { %v9020_v62 = vpop.f32.mrb[22].mxu1 }
 0x1ee   : > { %3449 = vmatmul.mubr.bf16.gmra.mrb[48].mxu0 %v8231_v28  ;;  %v2820_v63 = vpop.f32.mrb[23].mxu1 }
 0x1ef   : > { %3456 = vmatprep.mubr.bf16.mxu0 %v8236_v29 }
 0x1f3   : > { %v9024_v3 = vpop.f32.mrb[24].mxu1 }
 0x1f4   : > { %v2825_v4 = vpop.f32.mrb[25].mxu1 }
 0x1f5   : > { %v9026_v5 = vpop.f32.mrb[26].mxu1  ;;  %v8304_v4 = vld [vmem:[%s8442_s21 + $0x2c8] ss:$48 sps:$4 sm:$0xff]  }
 0x1f6   : > { %3457 = vmatmul.mubr.bf16.gmra.mrb[52].mxu0 %v8238_v34  ;;  %v2828_v6 = vpop.f32.mrb[27].mxu1 }
 0x1f7   : > { %3464 = vmatprep.mubr.bf16.mxu0 %v8243_v35  ;;  %v8305_v6 = vld [vmem:[%s8442_s21 + $0x32c] ss:$48 sps:$4 sm:$0xff]  }
 0x1fb   : > { %v9030_v9 = vpop.f32.mrb[28].mxu1 }
 0x1fc   : > { %v2833_v10 = vpop.f32.mrb[29].mxu1 }
 0x1fd   : > { %v9032_v11 = vpop.f32.mrb[30].mxu1 }
 0x1fe   : > { %3465 = vmatmul.mubr.bf16.gmra.mrb[56].mxu0 %v8245_v40  ;;  %v2836_v12 = vpop.f32.mrb[31].mxu1  ;;  %v8295_v40 = vld [vmem:[%s8442_s21 + $0x1a8] ss:$48 sps:$4 sm:$0xff]  }
 0x1ff   : > { %3472 = vmatprep.mubr.bf16.mxu0 %v8249_v41  ;;  %v8296_v41 = vld [vmem:[%s8442_s21 + $0x20c] ss:$48 sps:$4 sm:$0xff]  }
 0x203   : > { %v9037_v15 = vpop.f32.mrb[32].mxu1 }
 0x204   : > { %v2841_v16 = vpop.f32.mrb[33].mxu1 }
 0x205   : > { %v9039_v17 = vpop.f32.mrb[34].mxu1 }
 0x206   : > { %3473 = vmatmul.mubr.bf16.gmra.mrb[60].mxu0 %v8252_v46  ;;  %v2844_v18 = vpop.f32.mrb[35].mxu1 }
 0x207   : > { %3480 = vmatprep.mubr.bf16.mxu0 %v8256_v47 }
 0x20b   : > { %v9044_v21 = vpop.f32.mrb[36].mxu1 }
 0x20c   : > { %v2849_v22 = vpop.f32.mrb[37].mxu1 }
 0x20d   : > { %v9046_v23 = vpop.f32.mrb[38].mxu1  ;;  %v8310_v22 = vld [vmem:[%s8442_s21 + $0x388] ss:$48 sps:$4 sm:$0xff]  }
 0x20e   : > { %3481 = vmatmul.mubr.bf16.gmra.mrb[64].mxu0 %v8258_v52  ;;  %v2852_v24 = vpop.f32.mrb[39].mxu1 }
 0x20f   : > { %3488 = vmatprep.mubr.bf16.mxu0 %v8263_v53  ;;  %v8311_v24 = vld [vmem:[%s8442_s21 + $0x3ec] ss:$48 sps:$4 sm:$0xff]  }
 0x213   : > { %v9051_v26 = vpop.f32.mrb[40].mxu1 }
 0x214   : > { %v2857_v27 = vpop.f32.mrb[41].mxu1 }
 0x215   : > { %v9053_v28 = vpop.f32.mrb[42].mxu1 }
 0x216   : > { %3489 = vmatmul.mubr.bf16.gmra.mrb[68].mxu0 %v8265_v58  ;;  %v2860_v29 = vpop.f32.mrb[43].mxu1  ;;  %v8301_v58 = vld [vmem:[%s8442_s21 + $0x268] ss:$48 sps:$4 sm:$0xff]  }
 0x217   : > { %3496 = vmatprep.mubr.bf16.mxu0 %v8270_v59  ;;  %v8302_v59 = vld [vmem:[%s8442_s21 + $0x2cc] ss:$48 sps:$4 sm:$0xff]  }
 0x21b   : > { %v9058_v34 = vpop.f32.mrb[44].mxu1 }
 0x21c   : > { %v2865_v35 = vpop.f32.mrb[45].mxu1 }
 0x21d   : > { %v9060_v37 = vpop.f32.mrb[46].mxu1 }
 0x21e   : > { %3497 = vmatmul.mubr.bf16.gmra.mrb[72].mxu0 %v8272_v0  ;;  %v2868_v39 = vpop.f32.mrb[47].mxu1 }
 0x21f   : > { %3504 = vmatprep.mubr.bf16.mxu0 %v8276_v2 }
 0x223   : > { %v9065_v43 = vpop.f32.mrb[48].mxu1 }
 0x224   : > { %v2873_v45 = vpop.f32.mrb[49].mxu1 }
 0x225   : > { %v9067_v46 = vpop.f32.mrb[50].mxu1  ;;  %v8316_v45 = vld [vmem:[%s8442_s21 + $0x448] ss:$48 sps:$4 sm:$0xff]  }
 0x226   : > { %3505 = vmatmul.mubr.bf16.gmra.mrb[76].mxu0 %v8278_v7  ;;  %v2876_v47 = vpop.f32.mrb[51].mxu1 }
 0x227   : > { %7073 = vmatprep.mubr.msk.bf16.mxu0 %vm2483_vm1, %v8283_v8  ;;  %v8317_v47 = vld [vmem:[%s8442_s21 + $0x4ac] ss:$48 sps:$4 sm:$0xff]  }
 0x22b   : > { %v9072_v52 = vpop.f32.mrb[52].mxu1 }
 0x22c   : > { %v2881_v53 = vpop.f32.mrb[53].mxu1 }
 0x22d   : > { %v9074_v55 = vpop.f32.mrb[54].mxu1 }
 0x22e   : > { %3546 = vmatmul.mubr.bf16.vlgmr.msra.gmra.mrb[0].mxu0 %v8281_v13  ;;  %v2884_v57 = vpop.f32.mrb[55].mxu1  ;;  %v8307_v13 = vld [vmem:[%s8442_s21 + $0x328] ss:$48 sps:$4 sm:$0xff]  }
 0x22f   : > { %7074 = vmatprep.mubr.msk.bf16.mxu0 %vm2483_vm1, %v8284_v14  ;;  %v8308_v14 = vld [vmem:[%s8442_s21 + $0x38c] ss:$48 sps:$4 sm:$0xff]  }
 0x233   : > { %v9079_v61 = vpop.f32.mrb[56].mxu1 }
 0x234   : > { %v2889_v63 = vpop.f32.mrb[57].mxu1 }
 0x235   : > { %v9081_v0 = vpop.f32.mrb[58].mxu1  ;;  %v8322_v63 = vld [vmem:[%s8442_s21 + $0x508] ss:$48 sps:$4 sm:$0xff]  }
 0x236   : > { %3554 = vmatmul.mubr.bf16.gmra.mrb[4].mxu0 %v8286_v19  ;;  %v2892_v2 = vpop.f32.mrb[59].mxu1 }
 0x237   : > { %7075 = vmatprep.mubr.msk.bf16.mxu0 %vm2483_vm1, %v8287_v20  ;;  %v8323_v2 = vld [vmem:[%s8442_s21 + $0x56c] ss:$48 sps:$4 sm:$0xff]  }
 0x23b   : > { %v9086_v7 = vpop.f32.mrb[60].mxu1 }
 0x23c   : > { %v2897_v8 = vpop.f32.mrb[61].mxu1 }
 0x23d   : > { %v9088_v10 = vpop.f32.mrb[62].mxu1  ;;  %v8328_v8 = vld [vmem:[%s8442_s21 + $0x5c8] ss:$48 sps:$4 sm:$0xff]  }
 0x23e   : > { %3562 = vmatmul.mubr.bf16.gmra.mrb[8].mxu0 %v8289_v1  ;;  %v2900_v12 = vpop.f32.mrb[63].mxu1 }
 0x23f   : > { %7076 = vmatprep.mubr.msk.bf16.mxu0 %vm2483_vm1, %v8290_v25  ;;  %v8329_v12 = vld [vmem:[%s8442_s21 + $0x62c] ss:$48 sps:$4 sm:$0xff]  }
 0x243   : > { %v9093_v16 = vpop.f32.mrb[64].mxu1 }
 0x244   : > { %v2905_v18 = vpop.f32.mrb[65].mxu1 }
 0x245   : > { %v9095_v19 = vpop.f32.mrb[66].mxu1  ;;  %v8334_v18 = vld [vmem:[%s8442_s21 + $0x688] ss:$48 sps:$4 sm:$0xff]  }
 0x246   : > { %3570 = vmatmul.mubr.bf16.gmra.mrb[12].mxu0 %v8292_v31  ;;  %v2908_v20 = vpop.f32.mrb[67].mxu1  ;;  %v8313_v31 = vld [vmem:[%s8442_s21 + $0x3e8] ss:$48 sps:$4 sm:$0xff]  }
 0x247   : > { %7077 = vmatprep.mubr.msk.bf16.mxu0 %vm2483_vm1, %v8293_v33  ;;  %v8314_v33 = vld [vmem:[%s8442_s21 + $0x44c] ss:$48 sps:$4 sm:$0xff]  }
 0x248   : > { %v8335_v20 = vld [vmem:[%s8442_s21 + $0x6ec] ss:$48 sps:$4 sm:$0xff]  }
 0x24b   : > { %v9100_v1 = vpop.f32.mrb[68].mxu1 }
 0x24c   : > { %v2913_v25 = vpop.f32.mrb[69].mxu1 }
 0x24d   : > { %v9102_v27 = vpop.f32.mrb[70].mxu1  ;;  %v8340_v25 = vld [vmem:[%s8442_s21 + $0x748] ss:$48 sps:$4 sm:$0xff]  }
 0x24e   : > { %3578 = vmatmul.mubr.bf16.gmra.mrb[16].mxu0 %v8295_v40  ;;  %v2916_v29 = vpop.f32.mrb[71].mxu1 }
 0x24f   : > { %7078 = vmatprep.mubr.msk.bf16.mxu0 %vm2483_vm1, %v8296_v41  ;;  %v3748_v29 = vld [vmem:[%s10452_s3] sm:$0xff] }
 0x253   : > { %v9107_v35 = vpop.f32.mrb[72].mxu1 }
 0x254   : > { %v2921_v39 = vpop.f32.mrb[73].mxu1 }
 0x255   : > { %v9109_v40 = vpop.f32.mrb[74].mxu1 }
 0x256   : > { %3586 = vmatmul.mubr.bf16.gmra.mrb[20].mxu0 %v8298_v49  ;;  %v2924_v41 = vpop.f32.mrb[75].mxu1 }
 0x257   : > { %7079 = vmatprep.mubr.msk.bf16.mxu0 %vm2483_vm1, %v8299_v51 }
 0x25b   : > { %v9114_v49 = vpop.f32.mrb[76].mxu1 }
 0x25c   : > { %v2929_v51 = vpop.f32.mrb[77].mxu1 }
 0x25d   : > { %v9116_v53 = vpop.f32.mrb[78].mxu1 }
 0x25e   : > { %3594 = vmatmul.mubr.bf16.gmra.mrb[24].mxu0 %v8301_v58  ;;  %v2932_v57 = vpop.f32.mrb[79].mxu1  ;;  %v8319_v58 = vld [vmem:[%s8442_s21 + $0x4a8] ss:$48 sps:$4 sm:$0xff]  }
 0x25f   : > { %7080 = vmatprep.mubr.msk.bf16.mxu0 %vm2483_vm1, %v8302_v59  ;;  %v8320_v59 = vld [vmem:[%s8442_s21 + $0x50c] ss:$48 sps:$4 sm:$0xff]  }
 0x266   : > { %3602 = vmatmul.mubr.bf16.gmra.mrb[28].mxu0 %v8304_v4  ;;  %v8325_v4 = vld [vmem:[%s8442_s21 + $0x568] ss:$48 sps:$4 sm:$0xff]  }
 0x267   : > { %7081 = vmatprep.mubr.msk.bf16.mxu0 %vm2483_vm1, %v8305_v6  ;;  %v8326_v6 = vld [vmem:[%s8442_s21 + $0x5cc] ss:$48 sps:$4 sm:$0xff]  }
 0x26e   : > { %3610 = vmatmul.mubr.bf16.gmra.mrb[32].mxu0 %v8307_v13  ;;  %v8331_v13 = vld [vmem:[%s8442_s21 + $0x628] ss:$48 sps:$4 sm:$0xff]  }
 0x26f   : > { %7082 = vmatprep.mubr.msk.bf16.mxu0 %vm2483_vm1, %v8308_v14  ;;  %v8332_v14 = vld [vmem:[%s8442_s21 + $0x68c] ss:$48 sps:$4 sm:$0xff]  }
 0x276   : > { %3618 = vmatmul.mubr.bf16.gmra.mrb[36].mxu0 %v8310_v22  ;;  %v8337_v22 = vld [vmem:[%s8442_s21 + $0x6e8] ss:$48 sps:$4 sm:$0xff]  }
 0x277   : > { %7083 = vmatprep.mubr.msk.bf16.mxu0 %vm2483_vm1, %v8311_v24  ;;  %v8338_v24 = vld [vmem:[%s8442_s21 + $0x74c] ss:$48 sps:$4 sm:$0xff]   ;;  %s8353_s21 = smov 96  }
 0x27e   : > { %3626 = vmatmul.mubr.bf16.gmra.mrb[40].mxu0 %v8313_v31  ;;  %v3749_v31 = vld [vmem:[%s10452_s3 + $0x8] sm:$0xff] }
 0x27f   : > { %7084 = vmatprep.mubr.msk.bf16.mxu0 %vm2483_vm1, %v8314_v33  ;;  %v8352_v33 = vmov 0.0|0.0   ;;  %v9148_v39 = vpack.c.bf16 %v3749_v31, %v3748_v29 }
 0x280   : > { %7500 = vmatprep.subr.bf16.mxu1 %v8352_v33  ;;  %7390 = vmatprep.subr.bf16.mxu0 %v8352_v33 }
 0x281   : > { %7501 = vmatpush3.bf16.msra.mxu1 %v9148_v39  ;;  %7392 = vmatpush3.bf16.msra.mxu0 %v9148_v39 }
 0x282   : > { %7393 = vmatprep.subr.bf16.mxu1 %v8352_v33 }
 0x286   : > { %3634 = vmatmul.mubr.bf16.gmra.mrb[44].mxu0 %v8316_v45 }
 0x287   : > { %7085 = vmatprep.mubr.msk.bf16.mxu0 %vm2483_vm1, %v8317_v47 }
 0x28e   : > { %3642 = vmatmul.mubr.bf16.gmra.mrb[48].mxu0 %v8319_v58 }
 0x28f   : > { %7086 = vmatprep.mubr.msk.bf16.mxu0 %vm2483_vm1, %v8320_v59 }
 0x296   : > { %3650 = vmatmul.mubr.bf16.gmra.mrb[52].mxu0 %v8322_v63 }
 0x297   : > { %7087 = vmatprep.mubr.msk.bf16.mxu0 %vm2483_vm1, %v8323_v2 }
 0x29e   : > { %3658 = vmatmul.mubr.bf16.gmra.mrb[56].mxu0 %v8325_v4 }
 0x29f   : > { %7088 = vmatprep.mubr.msk.bf16.mxu0 %vm2483_vm1, %v8326_v6 }
 0x2a6   : > { %3666 = vmatmul.mubr.bf16.gmra.mrb[60].mxu0 %v8328_v8 }
 0x2a7   : > { %7089 = vmatprep.mubr.msk.bf16.mxu0 %vm2483_vm1, %v8329_v12 }
 0x2ae   : > { %3674 = vmatmul.mubr.bf16.gmra.mrb[64].mxu0 %v8331_v13 }
 0x2af   : > { %7090 = vmatprep.mubr.msk.bf16.mxu0 %vm2483_vm1, %v8332_v14 }
 0x2b6   : > { %3682 = vmatmul.mubr.bf16.gmra.mrb[68].mxu0 %v8334_v18 }
 0x2b7   : > { %7091 = vmatprep.mubr.msk.bf16.mxu0 %vm2483_vm1, %v8335_v20 }
 0x2be   : > { %3690 = vmatmul.mubr.bf16.gmra.mrb[72].mxu0 %v8337_v22 }
 0x2bf   : > { %7092 = vmatprep.mubr.msk.bf16.mxu0 %vm2483_vm1, %v8338_v24  ;;  %vm8361_vm1 = vmmov 1  }
 0x2c6   : > { %3698 = vmatmul.mubr.bf16.gmra.mrb[76].mxu0 %v8340_v25 }
 0x301   : > { %v3547_v41 = vpop.f32.mrb[0].mxu0 }
 0x302   : > { %v7502_v45 = vadd.f32 %v3547_v41, %v8988_v30  ;;  %v3549_v47 = vpop.f32.mrb[1].mxu0 }
 0x303   : > { %v3550_v51 = vpop.f32.mrb[2].mxu0 }
 0x304   : > { %3707 = vst.msk [vmem:[#allocation2] sm:$0xff] %vm3706_vm2, %v7502_v45  ;;  %v7503_v57 = vadd.f32 %v3550_v51, %v8990_v32  ;;  %v3552_v58 = vpop.f32.mrb[3].mxu0 }
 0x306   : > { %3708 = vst.msk [vmem:[#allocation2 + $0x8] sm:$0xff] %vm3706_vm2, %v7503_v57 }
 0x309   : > { %v3555_v59 = vpop.f32.mrb[4].mxu0 }
 0x30a   : > { %v7504_v63 = vadd.f32 %v3555_v59, %v8994_v36  ;;  %v3557_v2 = vpop.f32.mrb[5].mxu0 }
 0x30b   : > { %v3558_v4 = vpop.f32.mrb[6].mxu0 }
 0x30c   : > { %3709 = vst.msk [vmem:[#allocation2 + $0x10] sm:$0xff] %vm3706_vm2, %v7504_v63  ;;  %v7505_v6 = vadd.f32 %v3558_v4, %v8996_v38  ;;  %v3560_v8 = vpop.f32.mrb[7].mxu0 }
 0x30d   : > { %v9162_v30 = vld [vmem:[#allocation2 + $0x8] sm:$0xff] }
 0x30e   : > { %3710 = vst.msk [vmem:[#allocation2 + $0x18] sm:$0xff] %vm3706_vm2, %v7505_v6  ;;  %v3799_v36 = vrot.slane %v9162_v30, 2  ;;  %v3770_v24 = vrot.slane %v9162_v30, 1 }
 0x311   : > { %v3563_v12 = vpop.f32.mrb[8].mxu0 }
 0x312   : > { %v7506_v32 = vadd.f32 %v3563_v12, %v9000_v42  ;;  %v3565_v13 = vpop.f32.mrb[9].mxu0 }
 0x313   : > { %v3566_v14 = vpop.f32.mrb[10].mxu0  ;;  %v9165_v18 = vld [vmem:[#allocation2 + $0x10] sm:$0xff] }
 0x314   : > { %3711 = vst.msk [vmem:[#allocation2 + $0x20] sm:$0xff] %vm3706_vm2, %v7506_v32  ;;  %v7507_v20 = vadd.f32 %v3566_v14, %v9002_v44  ;;  %v3568_v22 = vpop.f32.mrb[11].mxu0  ;;  %v3801_v38 = vrot.slane %v9165_v18, 2  ;;  %v3772_v25 = vrot.slane %v9165_v18, 1 }
 0x315   : > { %v9173_v29 = vld [vmem:[#allocation2 + $0x18] sm:$0xff] }
 0x316   : > { %3712 = vst.msk [vmem:[#allocation2 + $0x28] sm:$0xff] %vm3706_vm2, %v7507_v20  ;;  %v3802_v42 = vsel %vm2544_vm0, %v3799_v36, %v3801_v38  ;;  %v3773_v44 = vsel %vm3768_vm3, %v3770_v24, %v3772_v25  ;;  %v3803_v31 = vrot.slane %v9173_v29, 2  ;;  %v3774_v41 = vrot.slane %v9173_v29, 1 }
 0x317   : > { %3809 = vrot.lane.b32.xlu1 %v3802_v42, %s8353_s21  ;;  %3780 = vrot.lane.b32.xlu0 %v3773_v44, %s8354_s13 }
 0x318   : > { %v3804_v47 = vsel %vm2544_vm0, %v3801_v38, %v3803_v31  ;;  %v3775_v58 = vsel %vm3768_vm3, %v3772_v25, %v3774_v41 }
 0x319   : > { %v3571_v45 = vpop.f32.mrb[12].mxu0 }
 0x31a   : > { %v7508_v51 = vadd.f32 %v3571_v45, %v9006_v48  ;;  %v3573_v57 = vpop.f32.mrb[13].mxu0  ;;  %v10458_v48 = vmov 0.0  }
 0x31b   : > { %v3574_v59 = vpop.f32.mrb[14].mxu0  ;;  %3811 = vrot.lane.b32.xlu1 %v3804_v47, %s8353_s21  ;;  %3782 = vrot.lane.b32.xlu0 %v3775_v58, %s8354_s13  ;;  %v9191_v63 = vld [vmem:[#allocation2 + $0x20] sm:$0xff] }
 0x31c   : > { %3713 = vst.msk [vmem:[#allocation2 + $0x30] sm:$0xff] %vm3706_vm2, %v7508_v51  ;;  %v7509_v2 = vadd.f32 %v3574_v59, %v9008_v50  ;;  %v3576_v4 = vpop.f32.mrb[15].mxu0  ;;  %v3805_v6 = vrot.slane %v9191_v63, 2  ;;  %v3776_v8 = vrot.slane %v9191_v63, 1  ;;  %7245 = vmatprep.mubr.msk.f32.mxu1 %vm8355_vm4, %v10458_v48  ;;  %7242 = vmatprep.mubr.msk.f32.mxu0 %vm8355_vm4, %v10458_v48 }
 0x31d   : > { %v9206_v13 = vld [vmem:[#allocation2 + $0x28] sm:$0xff] }
 0x31e   : > { %3714 = vst.msk [vmem:[#allocation2 + $0x38] sm:$0xff] %vm3706_vm2, %v7509_v2  ;;  %v3806_v12 = vsel %vm2544_vm0, %v3803_v31, %v3805_v6  ;;  %v3777_v32 = vsel %vm3768_vm3, %v3774_v41, %v3776_v8  ;;  %v4040_v44 = vrot.slane %v9206_v13, 1 }
 0x31f   : > { %3813 = vrot.lane.b32.xlu1 %v3806_v12, %s8353_s21  ;;  %3784 = vrot.lane.b32.xlu0 %v3777_v32, %s8354_s13 }
 0x321   : > { %v3579_v50 = vpop.f32.mrb[16].mxu0 }
 0x322   : > { %v7510_v14 = vadd.f32 %v3579_v50, %v9012_v54  ;;  %v3581_v20 = vpop.f32.mrb[17].mxu0 }
 0x323   : > { %v3582_v22 = vpop.f32.mrb[18].mxu0  ;;  %3815 = vrot.lane.b32.xlu1 %v3805_v6, %s8353_s21  ;;  %3786 = vrot.lane.b32.xlu0 %v3776_v8, %s8354_s13  ;;  %v9211_v38 = vld [vmem:[#allocation2 + $0x30] sm:$0xff] }
 0x324   : > { %3715 = vst.msk [vmem:[#allocation2 + $0x40] sm:$0xff] %vm3706_vm2, %v7510_v14  ;;  %v7511_v25 = vadd.f32 %v3582_v22, %v9014_v56  ;;  %v3584_v42 = vpop.f32.mrb[19].mxu0  ;;  %v4041_v31 = vrot.slane %v9211_v38, 1  ;;  %v4070_v47 = vrot.slane %v9211_v38, 2  ;;  %v4069_v56 = vrot.slane %v9206_v13, 2 }
 0x325   : > { %v9217_v41 = vld [vmem:[#allocation2 + $0x38] sm:$0xff] }
 0x326   : > { %3716 = vst.msk [vmem:[#allocation2 + $0x48] sm:$0xff] %vm3706_vm2, %v7511_v25  ;;  %v4042_v54 = vsel %vm3768_vm3, %v4040_v44, %v4041_v31  ;;  %v4043_v45 = vrot.slane %v9217_v41, 1  ;;  %v4072_v57 = vrot.slane %v9217_v41, 2  ;;  %v4071_v4 = vsel %vm2544_vm0, %v4069_v56, %v4070_v47 }
 0x327   : > { %4049 = vrot.lane.b32.xlu0 %v4042_v54, %s8354_s13 }
 0x328   : > { %v4044_v51 = vsel %vm3768_vm3, %v4041_v31, %v4043_v45  ;;  %v4073_v50 = vsel %vm2544_vm0, %v4070_v47, %v4072_v57 }
 0x329   : > { %v3587_v58 = vpop.f32.mrb[20].mxu0  ;;  %4051 = vrot.lane.b32.xlu1 %v4044_v51, %s8354_s13 }
 0x32a   : > { %v7512_v59 = vadd.f32 %v3587_v58, %v9018_v60  ;;  %v3589_v2 = vpop.f32.mrb[21].mxu0 }
 0x32b   : > { %v3590_v6 = vpop.f32.mrb[22].mxu0  ;;  %4078 = vrot.lane.b32.xlu0 %v4071_v4, %s8353_s21  ;;  %v9231_v8 = vld [vmem:[#allocation2 + $0x40] sm:$0xff] }
 0x32c   : > { %3717 = vst.msk [vmem:[#allocation2 + $0x50] sm:$0xff] %vm3706_vm2, %v7512_v59  ;;  %v7513_v12 = vadd.f32 %v3590_v6, %v9020_v62  ;;  %v3592_v32 = vpop.f32.mrb[23].mxu0  ;;  %v4045_v14 = vrot.slane %v9231_v8, 1  ;;  %v4074_v20 = vrot.slane %v9231_v8, 2 }
 0x32d   : > { %4080 = vrot.lane.b32.xlu1 %v4073_v50, %s8353_s21  ;;  %v9239_v60 = vld [vmem:[#allocation2 + $0x48] sm:$0xff] }
 0x32e   : > { %3718 = vst.msk [vmem:[#allocation2 + $0x58] sm:$0xff] %vm3706_vm2, %v7513_v12  ;;  %v4046_v22 = vsel %vm3768_vm3, %v4043_v45, %v4045_v14  ;;  %v4047_v25 = vrot.slane %v9239_v60, 1  ;;  %v4075_v62 = vsel %vm2544_vm0, %v4072_v57, %v4074_v20  ;;  %v4076_v42 = vrot.slane %v9239_v60, 2 }
 0x32f   : > { %4053 = vrot.lane.b32.xlu0 %v4046_v22, %s8354_s13 }
 0x330   : > { %v4048_v47 = vsel %vm3768_vm3, %v4045_v14, %v4047_v25  ;;  %v4077_v57 = vsel %vm2544_vm0, %v4074_v20, %v4076_v42 }
 0x331   : > { %v3595_v44 = vpop.f32.mrb[24].mxu0  ;;  %4082 = vrot.lane.b32.xlu1 %v4075_v62, %s8353_s21 }
 0x332   : > { %v7514_v31 = vadd.f32 %v3595_v44, %v9024_v3  ;;  %v3597_v54 = vpop.f32.mrb[25].mxu0 }
 0x333   : > { %v3598_v51 = vpop.f32.mrb[26].mxu0  ;;  %4055 = vrot.lane.b32.xlu0 %v4048_v47, %s8354_s13  ;;  %v9255_v58 = vld [vmem:[#allocation2 + $0x50] sm:$0xff] }
 0x334   : > { %3719 = vst.msk [vmem:[#allocation2 + $0x60] sm:$0xff] %vm3706_vm2, %v7514_v31  ;;  %v7515_v45 = vadd.f32 %v3598_v51, %v9026_v5  ;;  %v3600_v56 = vpop.f32.mrb[27].mxu0  ;;  %v4318_v2 = vrot.slane %v9255_v58, 1 }
 0x335   : > { %4084 = vrot.lane.b32.xlu1 %v4077_v57, %s8353_s21  ;;  %v9257_v59 = vld [vmem:[#allocation2 + $0x58] sm:$0xff] }
 0x336   : > { %3720 = vst.msk [vmem:[#allocation2 + $0x68] sm:$0xff] %vm3706_vm2, %v7515_v45  ;;  %v4319_v3 = vrot.slane %v9257_v59, 1  ;;  %v4348_v32 = vrot.slane %v9257_v59, 2 }
 0x337   : > { %4057 = vrot.lane.b32.xlu0 %v4047_v25, %s8354_s13  ;;  %v4347_v25 = vrot.slane %v9255_v58, 2 }
 0x338   : > { %v4320_v12 = vsel %vm3768_vm3, %v4318_v2, %v4319_v3 }
 0x339   : > { %v3603_v4 = vpop.f32.mrb[28].mxu0  ;;  %4086 = vrot.lane.b32.xlu1 %v4076_v42, %s8353_s21  ;;  %v4349_v42 = vsel %vm2544_vm0, %v4347_v25, %v4348_v32 }
 0x33a   : > { %v7516_v5 = vadd.f32 %v3603_v4, %v9030_v9  ;;  %v3605_v6 = vpop.f32.mrb[29].mxu0 }
 0x33b   : > { %v3606_v50 = vpop.f32.mrb[30].mxu0  ;;  %4327 = vrot.lane.b32.xlu0 %v4320_v12, %s8354_s13  ;;  %v9268_v14 = vld [vmem:[#allocation2 + $0x60] sm:$0xff] }
 0x33c   : > { %3721 = vst.msk [vmem:[#allocation2 + $0x70] sm:$0xff] %vm3706_vm2, %v7516_v5  ;;  %v7517_v20 = vadd.f32 %v3606_v50, %v9032_v11  ;;  %v3608_v22 = vpop.f32.mrb[31].mxu0  ;;  %v4321_v62 = vrot.slane %v9268_v14, 1  ;;  %v4350_v31 = vrot.slane %v9268_v14, 2 }
 0x33d   : > { %v9274_v9 = vld [vmem:[#allocation2 + $0x68] sm:$0xff] }
 0x33e   : > { %3722 = vst.msk [vmem:[#allocation2 + $0x78] sm:$0xff] %vm3706_vm2, %v7517_v20  ;;  %v4322_v44 = vsel %vm3768_vm3, %v4319_v3, %v4321_v62  ;;  %v4323_v54 = vrot.slane %v9274_v9, 1  ;;  %v4351_v45 = vsel %vm2544_vm0, %v4348_v32, %v4350_v31  ;;  %v4352_v57 = vrot.slane %v9274_v9, 2 }
 0x33f   : > { %4356 = vrot.lane.b32.xlu0 %v4349_v42, %s8353_s21  ;;  %4329 = vrot.lane.b32.xlu1 %v4322_v44, %s8354_s13 }
 0x340   : > { %v4324_v56 = vsel %vm3768_vm3, %v4321_v62, %v4323_v54  ;;  %v4353_v6 = vsel %vm2544_vm0, %v4350_v31, %v4352_v57 }
 0x341   : > { %v3611_v11 = vpop.f32.mrb[32].mxu0 }
 0x342   : > { %v7518_v47 = vadd.f32 %v3611_v11, %v9037_v15  ;;  %v3613_v51 = vpop.f32.mrb[33].mxu0 }
 0x343   : > { %v3614_v2 = vpop.f32.mrb[34].mxu0  ;;  %4358 = vrot.lane.b32.xlu1 %v4351_v45, %s8353_s21  ;;  %4331 = vrot.lane.b32.xlu0 %v4324_v56, %s8354_s13  ;;  %v9289_v3 = vld [vmem:[#allocation2 + $0x70] sm:$0xff] }
 0x344   : > { %3723 = vst.msk [vmem:[#allocation2 + $0x80] sm:$0xff] %vm3706_vm2, %v7518_v47  ;;  %v7519_v4 = vadd.f32 %v3614_v2, %v9039_v17  ;;  %v3616_v5 = vpop.f32.mrb[35].mxu0  ;;  %v4325_v15 = vrot.slane %v9289_v3, 1  ;;  %v4354_v32 = vrot.slane %v9289_v3, 2 }
 0x345   : > { %v9300_v20 = vld [vmem:[#allocation2 + $0x78] sm:$0xff] }
 0x346   : > { %3724 = vst.msk [vmem:[#allocation2 + $0x88] sm:$0xff] %vm3706_vm2, %v7519_v4  ;;  %v4326_v12 = vsel %vm3768_vm3, %v4323_v54, %v4325_v15  ;;  %v4355_v25 = vsel %vm2544_vm0, %v4352_v57, %v4354_v32  ;;  %v4596_v54 = vrot.slane %v9300_v20, 1 }
 0x347   : > { %4360 = vrot.lane.b32.xlu1 %v4353_v6, %s8353_s21  ;;  %4333 = vrot.lane.b32.xlu0 %v4326_v12, %s8354_s13 }
 0x349   : > { %v3619_v50 = vpop.f32.mrb[36].mxu0 }
 0x34a   : > { %v7520_v17 = vadd.f32 %v3619_v50, %v9044_v21  ;;  %v3621_v22 = vpop.f32.mrb[37].mxu0 }
 0x34b   : > { %v3622_v62 = vpop.f32.mrb[38].mxu0  ;;  %4362 = vrot.lane.b32.xlu1 %v4355_v25, %s8353_s21  ;;  %4335 = vrot.lane.b32.xlu0 %v4325_v15, %s8354_s13  ;;  %v9306_v42 = vld [vmem:[#allocation2 + $0x80] sm:$0xff] }
 0x34c   : > { %3725 = vst.msk [vmem:[#allocation2 + $0x90] sm:$0xff] %vm3706_vm2, %v7520_v17  ;;  %v7521_v44 = vadd.f32 %v3622_v62, %v9046_v23  ;;  %v3624_v31 = vpop.f32.mrb[39].mxu0  ;;  %v4597_v11 = vrot.slane %v9306_v42, 1  ;;  %v4626_v51 = vrot.slane %v9306_v42, 2  ;;  %v4625_v23 = vrot.slane %v9300_v20, 2 }
 0x34d   : > { %v9312_v21 = vld [vmem:[#allocation2 + $0x88] sm:$0xff] }
 0x34e   : > { %3726 = vst.msk [vmem:[#allocation2 + $0x98] sm:$0xff] %vm3706_vm2, %v7521_v44  ;;  %v4598_v47 = vsel %vm3768_vm3, %v4596_v54, %v4597_v11  ;;  %v4599_v45 = vrot.slane %v9312_v21, 1  ;;  %v4627_v4 = vsel %vm2544_vm0, %v4625_v23, %v4626_v51  ;;  %v4628_v15 = vrot.slane %v9312_v21, 2 }
 0x34f   : > { %4364 = vrot.lane.b32.xlu1 %v4354_v32, %s8353_s21  ;;  %4605 = vrot.lane.b32.xlu0 %v4598_v47, %s8354_s13 }
 0x350   : > { %v4600_v5 = vsel %vm3768_vm3, %v4597_v11, %v4599_v45  ;;  %v4629_v22 = vsel %vm2544_vm0, %v4626_v51, %v4628_v15 }
 0x351   : > { %v3627_v56 = vpop.f32.mrb[40].mxu0 }
 0x352   : > { %v7522_v57 = vadd.f32 %v3627_v56, %v9051_v26  ;;  %v3629_v2 = vpop.f32.mrb[41].mxu0 }
 0x353   : > { %v3630_v6 = vpop.f32.mrb[42].mxu0  ;;  %4634 = vrot.lane.b32.xlu0 %v4627_v4, %s8353_s21  ;;  %4607 = vrot.lane.b32.xlu1 %v4600_v5, %s8354_s13  ;;  %v9327_v12 = vld [vmem:[#allocation2 + $0x90] sm:$0xff] }
 0x354   : > { %3727 = vst.msk [vmem:[#allocation2 + $0xa0] sm:$0xff] %vm3706_vm2, %v7522_v57  ;;  %v7523_v32 = vadd.f32 %v3630_v6, %v9053_v28  ;;  %v3632_v50 = vpop.f32.mrb[43].mxu0  ;;  %v4601_v26 = vrot.slane %v9327_v12, 1  ;;  %v4630_v62 = vrot.slane %v9327_v12, 2 }
 0x355   : > { %v9332_v17 = vld [vmem:[#allocation2 + $0x98] sm:$0xff] }
 0x356   : > { %3728 = vst.msk [vmem:[#allocation2 + $0xa8] sm:$0xff] %vm3706_vm2, %v7523_v32  ;;  %v4602_v25 = vsel %vm3768_vm3, %v4599_v45, %v4601_v26  ;;  %v4603_v44 = vrot.slane %v9332_v17, 1  ;;  %v4631_v11 = vsel %vm2544_vm0, %v4628_v15, %v4630_v62  ;;  %v4632_v51 = vrot.slane %v9332_v17, 2 }
 0x357   : > { %4636 = vrot.lane.b32.xlu1 %v4629_v22, %s8353_s21  ;;  %4609 = vrot.lane.b32.xlu0 %v4602_v25, %s8354_s13 }
 0x358   : > { %v4604_v47 = vsel %vm3768_vm3, %v4601_v26, %v4603_v44  ;;  %v4633_v2 = vsel %vm2544_vm0, %v4630_v62, %v4632_v51 }
 0x359   : > { %v3635_v28 = vpop.f32.mrb[44].mxu0 }
 0x35a   : > { %v7524_v31 = vadd.f32 %v3635_v28, %v9058_v34  ;;  %v3637_v54 = vpop.f32.mrb[45].mxu0 }
 0x35b   : > { %v3638_v23 = vpop.f32.mrb[46].mxu0  ;;  %4638 = vrot.lane.b32.xlu1 %v4631_v11, %s8353_s21  ;;  %4611 = vrot.lane.b32.xlu0 %v4604_v47, %s8354_s13  ;;  %v9349_v57 = vld [vmem:[#allocation2 + $0xa0] sm:$0xff] }
 0x35c   : > { %3729 = vst.msk [vmem:[#allocation2 + $0xb0] sm:$0xff] %vm3706_vm2, %v7524_v31  ;;  %v7525_v45 = vadd.f32 %v3638_v23, %v9060_v37  ;;  %v3640_v56 = vpop.f32.mrb[47].mxu0  ;;  %v4874_v5 = vrot.slane %v9349_v57, 1 }
 0x35d   : > { %v9351_v34 = vld [vmem:[#allocation2 + $0xa8] sm:$0xff] }
 0x35e   : > { %3730 = vst.msk [vmem:[#allocation2 + $0xb8] sm:$0xff] %vm3706_vm2, %v7525_v45  ;;  %v4875_v4 = vrot.slane %v9351_v34, 1  ;;  %v4904_v50 = vrot.slane %v9351_v34, 2 }
 0x35f   : > { %4640 = vrot.lane.b32.xlu1 %v4633_v2, %s8353_s21  ;;  %4613 = vrot.lane.b32.xlu0 %v4603_v44, %s8354_s13  ;;  %v4903_v44 = vrot.slane %v9349_v57, 2 }
 0x360   : > { %v4876_v32 = vsel %vm3768_vm3, %v4874_v5, %v4875_v4 }
 0x361   : > { %v3643_v15 = vpop.f32.mrb[48].mxu0  ;;  %v4905_v31 = vsel %vm2544_vm0, %v4903_v44, %v4904_v50 }
 0x362   : > { %v7526_v37 = vadd.f32 %v3643_v15, %v9065_v43  ;;  %v3645_v6 = vpop.f32.mrb[49].mxu0 }
 0x363   : > { %v3646_v26 = vpop.f32.mrb[50].mxu0  ;;  %4642 = vrot.lane.b32.xlu1 %v4632_v51, %s8353_s21  ;;  %4883 = vrot.lane.b32.xlu0 %v4876_v32, %s8354_s13  ;;  %v9364_v22 = vld [vmem:[#allocation2 + $0xb0] sm:$0xff] }
 0x364   : > { %3731 = vst.msk [vmem:[#allocation2 + $0xc0] sm:$0xff] %vm3706_vm2, %v7526_v37  ;;  %v7527_v25 = vadd.f32 %v3646_v26, %v9067_v46  ;;  %v3648_v62 = vpop.f32.mrb[51].mxu0  ;;  %v4877_v43 = vrot.slane %v9364_v22, 1  ;;  %v4906_v11 = vrot.slane %v9364_v22, 2 }
 0x365   : > { %v9370_v28 = vld [vmem:[#allocation2 + $0xb8] sm:$0xff] }
 0x366   : > { %3732 = vst.msk [vmem:[#allocation2 + $0xc8] sm:$0xff] %vm3706_vm2, %v7527_v25  ;;  %v4878_v54 = vsel %vm3768_vm3, %v4875_v4, %v4877_v43  ;;  %v4879_v47 = vrot.slane %v9370_v28, 1  ;;  %v4907_v45 = vsel %vm2544_vm0, %v4904_v50, %v4906_v11  ;;  %v4908_v2 = vrot.slane %v9370_v28, 2 }
 0x367   : > { %4912 = vrot.lane.b32.xlu0 %v4905_v31, %s8353_s21  ;;  %4885 = vrot.lane.b32.xlu1 %v4878_v54, %s8354_s13 }
 0x368   : > { %v4880_v56 = vsel %vm3768_vm3, %v4877_v43, %v4879_v47  ;;  %v4909_v6 = vsel %vm2544_vm0, %v4906_v11, %v4908_v2 }
 0x369   : > { %v3651_v46 = vpop.f32.mrb[52].mxu0 }
 0x36a   : > { %v7528_v51 = vadd.f32 %v3651_v46, %v9072_v52  ;;  %v3653_v23 = vpop.f32.mrb[53].mxu0 }
 0x36b   : > { %v3654_v5 = vpop.f32.mrb[54].mxu0  ;;  %4914 = vrot.lane.b32.xlu1 %v4907_v45, %s8353_s21  ;;  %4887 = vrot.lane.b32.xlu0 %v4880_v56, %s8354_s13  ;;  %v9385_v4 = vld [vmem:[#allocation2 + $0xc0] sm:$0xff] }
 0x36c   : > { %3733 = vst.msk [vmem:[#allocation2 + $0xd0] sm:$0xff] %vm3706_vm2, %v7528_v51  ;;  %v7529_v15 = vadd.f32 %v3654_v5, %v9074_v55  ;;  %v3656_v37 = vpop.f32.mrb[55].mxu0  ;;  %v4881_v52 = vrot.slane %v9385_v4, 1  ;;  %v4910_v50 = vrot.slane %v9385_v4, 2 }
 0x36d   : > { %v9396_v25 = vld [vmem:[#allocation2 + $0xc8] sm:$0xff] }
 0x36e   : > { %3734 = vst.msk [vmem:[#allocation2 + $0xd8] sm:$0xff] %vm3706_vm2, %v7529_v15  ;;  %v4882_v32 = vsel %vm3768_vm3, %v4879_v47, %v4881_v52  ;;  %v4911_v44 = vsel %vm2544_vm0, %v4908_v2, %v4910_v50  ;;  %v5130_v47 = vrot.slane %v9396_v25, 1 }
 0x36f   : > { %4916 = vrot.lane.b32.xlu1 %v4909_v6, %s8353_s21  ;;  %4889 = vrot.lane.b32.xlu0 %v4882_v32, %s8354_s13 }
 0x371   : > { %v3659_v26 = vpop.f32.mrb[56].mxu0 }
 0x372   : > { %v7530_v55 = vadd.f32 %v3659_v26, %v9079_v61  ;;  %v3661_v62 = vpop.f32.mrb[57].mxu0 }
 0x373   : > { %v3662_v43 = vpop.f32.mrb[58].mxu0  ;;  %4918 = vrot.lane.b32.xlu1 %v4911_v44, %s8353_s21  ;;  %4891 = vrot.lane.b32.xlu0 %v4881_v52, %s8354_s13  ;;  %v9402_v31 = vld [vmem:[#allocation2 + $0xd0] sm:$0xff] }
 0x374   : > { %3735 = vst.msk [vmem:[#allocation2 + $0xe0] sm:$0xff] %vm3706_vm2, %v7530_v55  ;;  %v7531_v54 = vadd.f32 %v3662_v43, %v9081_v0  ;;  %v3664_v11 = vpop.f32.mrb[59].mxu0  ;;  %v5131_v46 = vrot.slane %v9402_v31, 1  ;;  %v5160_v23 = vrot.slane %v9402_v31, 2  ;;  %v5159_v0 = vrot.slane %v9396_v25, 2 }
 0x375   : > { %v9408_v61 = vld [vmem:[#allocation2 + $0xd8] sm:$0xff] }
 0x376   : > { %3736 = vst.msk [vmem:[#allocation2 + $0xe8] sm:$0xff] %vm3706_vm2, %v7531_v54  ;;  %v5132_v51 = vsel %vm3768_vm3, %v5130_v47, %v5131_v46  ;;  %v5133_v45 = vrot.slane %v9408_v61, 1  ;;  %v5161_v15 = vsel %vm2544_vm0, %v5159_v0, %v5160_v23  ;;  %v5162_v52 = vrot.slane %v9408_v61, 2 }
 0x377   : > { %4920 = vrot.lane.b32.xlu1 %v4910_v50, %s8353_s21  ;;  %5139 = vrot.lane.b32.xlu0 %v5132_v51, %s8354_s13 }
 0x378   : > { %v5134_v37 = vsel %vm3768_vm3, %v5131_v46, %v5133_v45  ;;  %v5163_v62 = vsel %vm2544_vm0, %v5160_v23, %v5162_v52 }
 0x379   : > { %v3667_v56 = vpop.f32.mrb[60].mxu0 }
 0x37a   : > { %v7532_v2 = vadd.f32 %v3667_v56, %v9086_v7  ;;  %v3669_v5 = vpop.f32.mrb[61].mxu0 }
 0x37b   : > { %v3670_v6 = vpop.f32.mrb[62].mxu0  ;;  %5168 = vrot.lane.b32.xlu0 %v5161_v15, %s8353_s21  ;;  %5141 = vrot.lane.b32.xlu1 %v5134_v37, %s8354_s13  ;;  %v9423_v32 = vld [vmem:[#allocation2 + $0xe0] sm:$0xff] }
 0x37c   : > { %3737 = vst.msk [vmem:[#allocation2 + $0xf0] sm:$0xff] %vm3706_vm2, %v7532_v2  ;;  %v7533_v50 = vadd.f32 %v3670_v6, %v9088_v10  ;;  %v3672_v26 = vpop.f32.mrb[63].mxu0  ;;  %v5135_v7 = vrot.slane %v9423_v32, 1  ;;  %v5164_v43 = vrot.slane %v9423_v32, 2 }
 0x37d   : > { %v9428_v55 = vld [vmem:[#allocation2 + $0xe8] sm:$0xff] }
 0x37e   : > { %3738 = vst.msk [vmem:[#allocation2 + $0xf8] sm:$0xff] %vm3706_vm2, %v7533_v50  ;;  %v5136_v44 = vsel %vm3768_vm3, %v5133_v45, %v5135_v7  ;;  %v5137_v54 = vrot.slane %v9428_v55, 1  ;;  %v5165_v46 = vsel %vm2544_vm0, %v5162_v52, %v5164_v43  ;;  %v5166_v23 = vrot.slane %v9428_v55, 2 }
 0x37f   : > { %5170 = vrot.lane.b32.xlu1 %v5163_v62, %s8353_s21  ;;  %5143 = vrot.lane.b32.xlu0 %v5136_v44, %s8354_s13 }
 0x380   : > { %v5138_v51 = vsel %vm3768_vm3, %v5135_v7, %v5137_v54  ;;  %v5167_v5 = vsel %vm2544_vm0, %v5164_v43, %v5166_v23 }
 0x381   : > { %v3675_v10 = vpop.f32.mrb[64].mxu0 }
 0x382   : > { %v7534_v11 = vadd.f32 %v3675_v10, %v9093_v16  ;;  %v3677_v47 = vpop.f32.mrb[65].mxu0 }
 0x383   : > { %v3678_v0 = vpop.f32.mrb[66].mxu0  ;;  %5172 = vrot.lane.b32.xlu1 %v5165_v46, %s8353_s21  ;;  %5145 = vrot.lane.b32.xlu0 %v5138_v51, %s8354_s13  ;;  %v9445_v2 = vld [vmem:[#allocation2 + $0xf0] sm:$0xff] }
 0x384   : > { %3739 = vst.msk [vmem:[#allocation2 + $0x100] sm:$0xff] %vm3706_vm2, %v7534_v11  ;;  %v7535_v45 = vadd.f32 %v3678_v0, %v9095_v19  ;;  %v3680_v56 = vpop.f32.mrb[67].mxu0  ;;  %v5406_v37 = vrot.slane %v9445_v2, 1  ;;  %v5435_v47 = vrot.slane %v9445_v2, 2 }
 0x385   : > { %v9447_v16 = vld [vmem:[#allocation2 + $0xf8] sm:$0xff] }
 0x386   : > { %3740 = vst.msk [vmem:[#allocation2 + $0x108] sm:$0xff] %vm3706_vm2, %v7535_v45  ;;  %v5407_v15 = vrot.slane %v9447_v16, 1  ;;  %v5436_v62 = vrot.slane %v9447_v16, 2 }
 0x387   : > { %5174 = vrot.lane.b32.xlu1 %v5167_v5, %s8353_s21  ;;  %5147 = vrot.lane.b32.xlu0 %v5137_v54, %s8354_s13 }
 0x388   : > { %v5408_v7 = vsel %vm3768_vm3, %v5406_v37, %v5407_v15  ;;  %v5437_v56 = vsel %vm2544_vm0, %v5435_v47, %v5436_v62 }
 0x389   : > { %v3683_v52 = vpop.f32.mrb[68].mxu0  ;;  %v3810_v6 = vpop.permute.xlu1 %3809 }
 0x38a   : > { %v7536_v19 = vadd.f32 %v3683_v52, %v9100_v1  ;;  %v3781_v50 = vpop.permute.xlu0 %3780  ;;  %v3685_v26 = vpop.f32.mrb[69].mxu0  ;;  %v9467_v1 = vld [vmem:[%s10451_s2] ss:$0 sm:$0xff] }
 0x38b   : > { %v3794_v44 = vadd.f32 %v3781_v50, %v9162_v30  ;;  %v3686_v43 = vpop.f32.mrb[70].mxu0  ;;  %5176 = vrot.lane.b32.xlu1 %v5166_v23, %s8353_s21  ;;  %5415 = vrot.lane.b32.xlu0 %v5408_v7, %s8354_s13  ;;  %v9461_v54 = vld [vmem:[#allocation2 + $0x100] sm:$0xff] }
 0x38c   : > { %3741 = vst.msk [vmem:[#allocation2 + $0x110] sm:$0xff] %vm3706_vm2, %v7536_v19  ;;  %v7537_v10 = vadd.f32 %v3686_v43, %v9102_v27  ;;  %v3688_v11 = vpop.f32.mrb[71].mxu0  ;;  %v5409_v46 = vrot.slane %v9461_v54, 1  ;;  %v5438_v37 = vrot.slane %v9461_v54, 2 }
 0x38d   : > { %v3823_v51 = vadd.f32 %v3810_v6, %v3794_v44  ;;  %v3812_v23 = vpop.permute.xlu1 %3811  ;;  %v9472_v0 = vld [vmem:[#allocation2 + $0x108] sm:$0xff] }
 0x38e   : > { %3742 = vst.msk [vmem:[#allocation2 + $0x118] sm:$0xff] %vm3706_vm2, %v7537_v10  ;;  %v3783_v45 = vpop.permute.xlu0 %3782  ;;  %v5410_v5 = vsel %vm3768_vm3, %v5407_v15, %v5409_v46  ;;  %v5411_v27 = vrot.slane %v9472_v0, 1  ;;  %v5439_v15 = vsel %vm2544_vm0, %v5436_v62, %v5438_v37  ;;  %v5440_v11 = vrot.slane %v9472_v0, 2 }
 0x38f   : > { %v3834_v52 = vadd.f32 %v9467_v1, %v3823_v51  ;;  %v3795_v19 = vadd.f32 %v3783_v45, %v9165_v18  ;;  %5444 = vrot.lane.b32.xlu0 %v5437_v56, %s8353_s21  ;;  %5417 = vrot.lane.b32.xlu1 %v5410_v5, %s8354_s13 }
 0x390   : > { %v5412_v10 = vsel %vm3768_vm3, %v5409_v46, %v5411_v27 }
 0x391   : > { %v3824_v6 = vadd.f32 %v3812_v23, %v3795_v19  ;;  %v3691_v50 = vpop.f32.mrb[72].mxu0  ;;  %v3814_v26 = vpop.permute.xlu1 %3813  ;;  %v3839_v47 = vmax.f32 %v3834_v52, 0.0 }
 0x392   : > { %v7538_v7 = vadd.f32 %v3691_v50, %v9107_v35  ;;  %v3785_v44 = vpop.permute.xlu0 %3784  ;;  %v3693_v43 = vpop.f32.mrb[73].mxu0 }
 0x393   : > { %v3835_v18 = vadd.f32 %v9467_v1, %v3824_v6  ;;  %v3796_v51 = vadd.f32 %v3785_v44, %v9173_v29  ;;  %v3694_v45 = vpop.f32.mrb[74].mxu0  ;;  %5446 = vrot.lane.b32.xlu1 %v5439_v15, %s8353_s21  ;;  %5419 = vrot.lane.b32.xlu0 %v5412_v10, %s8354_s13  ;;  %v9491_v23 = vld [vmem:[#allocation2 + $0x110] sm:$0xff]  ;;  %v5441_v29 = vsel %vm2544_vm0, %v5438_v37, %v5440_v11  ;;  %v9500_v50 = vrot.slane %v3839_v47, 1 }
 0x394   : > { %3743 = vst.msk [vmem:[#allocation2 + $0x120] sm:$0xff] %vm3706_vm2, %v7538_v7  ;;  %v7539_v35 = vadd.f32 %v3694_v45, %v9109_v40  ;;  %v3696_v62 = vpop.f32.mrb[75].mxu0  ;;  %v5413_v46 = vrot.slane %v9491_v23, 1  ;;  %v5442_v6 = vrot.slane %v9491_v23, 2 }
 0x395   : > { %v3840_v56 = vmax.f32 %v3835_v18, 0.0  ;;  %v3825_v5 = vadd.f32 %v3814_v26, %v3796_v51  ;;  %v3816_v40 = vpop.permute.xlu1 %3815  ;;  %v9508_v10 = vld [vmem:[#allocation2 + $0x118] sm:$0xff] }
 0x396   : > { %3744 = vst.msk [vmem:[#allocation2 + $0x128] sm:$0xff] %vm3706_vm2, %v7539_v35  ;;  %v3787_v52 = vpop.permute.xlu0 %3786  ;;  %v5414_v19 = vsel %vm3768_vm3, %v5411_v27, %v5413_v46 }
 0x397   : > { %v3851_v44 = vrot.slane %v3840_v56, 1  ;;  %v3836_v7 = vadd.f32 %v9467_v1, %v3825_v5  ;;  %v3797_v43 = vadd.f32 %v3787_v52, %v9191_v63  ;;  %5448 = vrot.lane.b32.xlu1 %v5441_v29, %s8353_s21  ;;  %5421 = vrot.lane.b32.xlu0 %v5414_v19, %s8354_s13  ;;  %v5443_v63 = vsel %vm2544_vm0, %v5440_v11, %v5442_v6 }
 0x398   : > { %v5682_v11 = vrot.slane %v9508_v10, 1 }
 0x399   : > { %v3852_v26 = vsel %vm3768_vm3, %v9500_v50, %v3851_v44  ;;  %v3841_v37 = vmax.f32 %v3836_v7, 0.0  ;;  %v3826_v15 = vadd.f32 %v3816_v40, %v3797_v43  ;;  %v3699_v27 = vpop.f32.mrb[76].mxu0 }
 0x39a   : > { %v3863_v18 = vmax.f32 %v3839_v47, %v3852_v26  ;;  %v7540_v51 = vadd.f32 %v3699_v27, %v9114_v49  ;;  %v4050_v45 = vpop.permute.xlu0 %4049  ;;  %v3701_v35 = vpop.f32.mrb[77].mxu0 }
 0x39b   : > { %v3853_v62 = vrot.slane %v3841_v37, 1  ;;  %v3837_v5 = vadd.f32 %v9467_v1, %v3826_v15  ;;  %v3702_v52 = vpop.f32.mrb[78].mxu0  ;;  %v4052_v29 = vpop.permute.xlu1 %4051  ;;  %5450 = vrot.lane.b32.xlu1 %v5443_v63, %s8353_s21  ;;  %5423 = vrot.lane.b32.xlu0 %v5413_v46, %s8354_s13  ;;  %v9515_v19 = vld [vmem:[#allocation2 + $0x120] sm:$0xff]  ;;  %v4064_v43 = vadd.f32 %v4050_v45, %v9206_v13 }
 0x39c   : > { %3745 = vst.msk [vmem:[#allocation2 + $0x130] sm:$0xff] %vm3706_vm2, %v7540_v51  ;;  %v7541_v47 = vadd.f32 %v3702_v52, %v9116_v53  ;;  %7246 = vmatmul.mubr.msk.f32.vlgmr.msra.gmra.mrb[80].mxu1 %vm3867_vm5, %v3863_v18  ;;  %v3704_v49 = vpop.f32.mrb[79].mxu0  ;;  %v5683_v7 = vrot.slane %v9515_v19, 1  ;;  %v4065_v26 = vadd.f32 %v4052_v29, %v9211_v38  ;;  %v5712_v51 = vrot.slane %v9515_v19, 2 }
 0x39d   : > { %v3842_v40 = vmax.f32 %v3837_v5, 0.0  ;;  %7248 = vmatprep.mubr.msk.f32.mxu1 %vm8355_vm4, %v10458_v48  ;;  %v3854_v46 = vsel %vm3768_vm3, %v3851_v44, %v3853_v62  ;;  %v9527_v15 = vld [vmem:[#allocation2 + $0x128] sm:$0xff]  ;;  %7395 = vmatpush3.bf16.msra.mxu1 %v9148_v39 }
 0x39e   : > { %3746 = vst.msk [vmem:[#allocation2 + $0x138] sm:$0xff] %vm3706_vm2, %v7541_v47  ;;  %v4079_v53 = vpop.permute.xlu0 %4078  ;;  %v3864_v27 = vmax.f32 %v3840_v56, %v3854_v46  ;;  %v5684_v18 = vsel %vm3768_vm3, %v5682_v11, %v5683_v7  ;;  %v5685_v13 = vrot.slane %v9527_v15, 1  ;;  %7396 = vmatprep.subr.bf16.mxu1 %v8352_v33  ;;  %v5711_v56 = vrot.slane %v9508_v10, 2  ;;  %vm7495_vm2 = vmpackc.low %vm6111_vm15, %vm8361_vm1 }
 0x39f   : > { %v3855_v38 = vrot.slane %v3842_v40, 1  ;;  %v4093_v45 = vadd.f32 %v4079_v53, %v4064_v43  ;;  %v4081_v35 = vpop.permute.xlu1 %4080  ;;  %5452 = vrot.lane.b32.xlu1 %v5442_v6, %s8353_s21  ;;  %5691 = vrot.lane.b32.xlu0 %v5684_v18, %s8354_s13  ;;  %v5714_v52 = vrot.slane %v9527_v15, 2 }
 0x3a0   : > { %7249 = vmatmul.mubr.msk.f32.gmra.mrb[82].mxu1 %vm3867_vm5, %v3864_v27  ;;  %v4094_v44 = vadd.f32 %v4081_v35, %v4065_v26  ;;  %v5713_v49 = vsel %vm2544_vm0, %v5711_v56, %v5712_v51  ;;  %v5686_v11 = vsel %vm3768_vm3, %v5683_v7, %v5685_v13 }
 0x3a1   : > { %v4098_v63 = vadd.f32 %v9467_v1, %v4093_v45  ;;  %7251 = vmatprep.mubr.msk.f32.mxu1 %vm8355_vm4, %v10458_v48  ;;  %v3856_v5 = vsel %vm3768_vm3, %v3853_v62, %v3855_v38  ;;  %v3866_v7 = vmax.f32 %v3842_v40, %v3855_v38  ;;  %v5715_v18 = vsel %vm2544_vm0, %v5712_v51, %v5714_v52 }
 0x3a2   : > { %v4099_v29 = vadd.f32 %v9467_v1, %v4094_v44  ;;  %v4054_v47 = vpop.permute.xlu0 %4053  ;;  %v3865_v6 = vmax.f32 %v3841_v37, %v3856_v5 }
 0x3a3   : > { %v4103_v43 = vmax.f32 %v4098_v63, 0.0  ;;  %v4066_v26 = vadd.f32 %v4054_v47, %v9217_v41  ;;  %v4083_v46 = vpop.permute.xlu1 %4082  ;;  %5720 = vrot.lane.b32.xlu0 %v5713_v49, %s8353_s21  ;;  %5693 = vrot.lane.b32.xlu1 %v5686_v11, %s8354_s13  ;;  %v9550_v53 = vld [vmem:[#allocation2 + $0x130] sm:$0xff] }
 0x3a4   : > { %v4104_v62 = vmax.f32 %v4099_v29, 0.0  ;;  %7252 = vmatmul.mubr.msk.f32.gmra.mrb[84].mxu1 %vm3867_vm5, %v3865_v6  ;;  %v5687_v27 = vrot.slane %v9550_v53, 1  ;;  %v5716_v41 = vrot.slane %v9550_v53, 2 }
 0x3a5   : > { %v4095_v37 = vadd.f32 %v4083_v46, %v4066_v26  ;;  %7254 = vmatprep.mubr.msk.f32.mxu1 %vm8355_vm4, %v10458_v48  ;;  %v9558_v45 = vld [vmem:[#allocation2 + $0x138] sm:$0xff]  ;;  %v4113_v35 = vrot.slane %v4103_v43, 1 }
 0x3a6   : > { %v4114_v44 = vrot.slane %v4104_v62, 1  ;;  %v4056_v56 = vpop.permute.xlu0 %4055  ;;  %v5688_v63 = vsel %vm3768_vm3, %v5685_v13, %v5687_v27  ;;  %v5689_v5 = vrot.slane %v9558_v45, 1  ;;  %v5717_v11 = vsel %vm2544_vm0, %v5714_v52, %v5716_v41 }
 0x3a7   : > { %v4100_v29 = vadd.f32 %v9467_v1, %v4095_v37  ;;  %v4067_v47 = vadd.f32 %v4056_v56, %v9231_v8  ;;  %v4085_v6 = vpop.permute.xlu1 %4084  ;;  %5722 = vrot.lane.b32.xlu1 %v5715_v18, %s8353_s21  ;;  %5695 = vrot.lane.b32.xlu0 %v5688_v63, %s8354_s13  ;;  %v5718_v26 = vrot.slane %v9558_v45, 2 }
 0x3a8   : > { %v4115_v40 = vsel %vm3768_vm3, %v4113_v35, %v4114_v44  ;;  %7255 = vmatmul.mubr.msk.f32.gmra.mrb[86].mxu1 %vm3867_vm5, %v3866_v7  ;;  %v5690_v8 = vsel %vm3768_vm3, %v5687_v27, %v5689_v5  ;;  %v9581_v27 = vld [vmem:[#allocation2] sm:$0xff] }
 0x3a9   : > { %v4127_v51 = vmax.f32 %v4103_v43, %v4115_v40  ;;  %v4105_v38 = vmax.f32 %v4100_v29, 0.0  ;;  %v4096_v49 = vadd.f32 %v4085_v6, %v4067_v47  ;;  %7261 = vmatprep.mubr.msk.f32.mxu1 %vm8355_vm4, %v10458_v48  ;;  %v5719_v63 = vsel %vm2544_vm0, %v5716_v41, %v5718_v26 }
 0x3aa   : > { %v4058_v13 = vpop.permute.xlu0 %4057 }
 0x3ab   : > { %v4116_v46 = vrot.slane %v4105_v38, 1  ;;  %v4101_v37 = vadd.f32 %v9467_v1, %v4096_v49  ;;  %v4068_v18 = vadd.f32 %v4058_v13, %v9239_v60  ;;  %v4087_v35 = vpop.permute.xlu1 %4086  ;;  %5724 = vrot.lane.b32.xlu1 %v5717_v11, %s8353_s21  ;;  %5697 = vrot.lane.b32.xlu0 %v5690_v8, %s8354_s13  ;;  %v3798_v8 = vrot.slane %v9581_v27, 2 }
 0x3ac   : > { %7262 = vmatmul.mubr.msk.f32.vlgmr.msra.gmra.mrb[88].mxu1 %vm3867_vm5, %v4127_v51 }
 0x3ad   : > { %v4106_v43 = vmax.f32 %v4101_v37, 0.0  ;;  %v4097_v7 = vadd.f32 %v4087_v35, %v4068_v18  ;;  %7264 = vmatprep.mubr.msk.f32.mxu1 %vm8355_vm4, %v10458_v48  ;;  %v4117_v52 = vsel %vm3768_vm3, %v4114_v44, %v4116_v46  ;;  %7398 = vmatpush3.bf16.msra.mxu1 %v9148_v39  ;;  %v3769_v44 = vrot.slane %v9581_v27, 1 }
 0x3ae   : > { %v4328_v56 = vpop.permute.xlu0 %4327  ;;  %v4128_v60 = vmax.f32 %v4104_v62, %v4117_v52  ;;  %7399 = vmatprep.subr.bf16.mxu1 %v8352_v33 }
 0x3af   : > { %v4118_v29 = vrot.slane %v4106_v43, 1  ;;  %v4102_v47 = vadd.f32 %v9467_v1, %v4097_v7  ;;  %5726 = vrot.lane.b32.xlu1 %v5719_v63, %s8353_s21  ;;  %5699 = vrot.lane.b32.xlu0 %v5689_v5, %s8354_s13  ;;  %v4342_v40 = vadd.f32 %v4328_v56, %v9255_v58  ;;  %v3771_v13 = vsel %vm3768_vm3, %v3769_v44, %v3770_v24 }
 0x3b0   : > { %7265 = vmatmul.mubr.msk.f32.gmra.mrb[90].mxu1 %vm3867_vm5, %v4128_v60 }
 0x3b1   : > { %v4107_v6 = vmax.f32 %v4102_v47, 0.0  ;;  %v4330_v51 = vpop.permute.xlu1 %4329  ;;  %7267 = vmatprep.mubr.msk.f32.mxu1 %vm8355_vm4, %v10458_v48  ;;  %v4119_v62 = vsel %vm3768_vm3, %v4116_v46, %v4118_v29 }
 0x3b2   : > { %v4357_v41 = vpop.permute.xlu0 %4356  ;;  %v4129_v49 = vmax.f32 %v4105_v38, %v4119_v62  ;;  %v4343_v58 = vadd.f32 %v4330_v51, %v9257_v59 }
 0x3b3   : > { %v4120_v5 = vrot.slane %v4107_v6, 1  ;;  %v4371_v11 = vadd.f32 %v4357_v41, %v4342_v40  ;;  %5728 = vrot.lane.b32.xlu1 %v5718_v26, %s8353_s21  ;;  %3778 = vrot.lane.b32.xlu0 %v3771_v13, %s8354_s13  ;;  %v3800_v26 = vsel %vm2544_vm0, %v3798_v8, %v3799_v36 }
 0x3b4   : > { %7268 = vmatmul.mubr.msk.f32.gmra.mrb[92].mxu1 %vm3867_vm5, %v4129_v49 }
 0x3b5   : > { %v4376_v46 = vadd.f32 %v9467_v1, %v4371_v11  ;;  %v4359_v37 = vpop.permute.xlu1 %4358  ;;  %7270 = vmatprep.mubr.msk.f32.mxu1 %vm8355_vm4, %v10458_v48  ;;  %v4121_v24 = vsel %vm3768_vm3, %v4118_v29, %v4120_v5  ;;  %v4131_v60 = vmax.f32 %v4107_v6, %v4120_v5 }
 0x3b6   : > { %v4372_v38 = vadd.f32 %v4359_v37, %v4343_v58  ;;  %v4332_v18 = vpop.permute.xlu0 %4331  ;;  %v4130_v35 = vmax.f32 %v4106_v43, %v4121_v24 }
 0x3b7   : > { %3807 = vrot.lane.b32.xlu1 %v3800_v26, %s8353_s21  ;;  %v4381_v59 = vmax.f32 %v4376_v46, 0.0  ;;  %v4344_v52 = vadd.f32 %v4332_v18, %v9268_v14 }
 0x3b8   : > { %v4377_v7 = vadd.f32 %v9467_v1, %v4372_v38  ;;  %7271 = vmatmul.mubr.msk.f32.gmra.mrb[94].mxu1 %vm3867_vm5, %v4130_v35 }
 0x3b9   : > { %v4361_v56 = vpop.permute.xlu1 %4360  ;;  %7273 = vmatprep.mubr.msk.f32.mxu1 %vm8355_vm4, %v10458_v48  ;;  %v4391_v30 = vrot.slane %v4381_v59, 1 }
 0x3ba   : > { %v4382_v63 = vmax.f32 %v4377_v7, 0.0  ;;  %v4373_v43 = vadd.f32 %v4361_v56, %v4344_v52  ;;  %v4334_v29 = vpop.permute.xlu0 %4333 }
 0x3bb   : > { %v4345_v44 = vadd.f32 %v4334_v29, %v9274_v9 }
 0x3bc   : > { %v4392_v47 = vrot.slane %v4382_v63, 1  ;;  %v4378_v36 = vadd.f32 %v9467_v1, %v4373_v43  ;;  %7274 = vmatmul.mubr.msk.f32.gmra.mrb[96].mxu1 %vm3867_vm5, %v4131_v60 }
 0x3bd   : > { %v4363_v40 = vpop.permute.xlu1 %4362  ;;  %7280 = vmatprep.mubr.msk.f32.mxu1 %vm8355_vm4, %v10458_v48 }
 0x3be   : > { %v4393_v14 = vsel %vm3768_vm3, %v4391_v30, %v4392_v47  ;;  %v4383_v51 = vmax.f32 %v4378_v36, 0.0  ;;  %v4374_v62 = vadd.f32 %v4363_v40, %v4345_v44  ;;  %v4336_v6 = vpop.permute.xlu0 %4335 }
 0x3bf   : > { %v4405_v41 = vmax.f32 %v4381_v59, %v4393_v14  ;;  %v4346_v5 = vadd.f32 %v4336_v6, %v9289_v3 }
 0x3c0   : > { %v4394_v49 = vrot.slane %v4383_v51, 1  ;;  %v4379_v13 = vadd.f32 %v9467_v1, %v4374_v62 }
 0x3c1   : > { %7281 = vmatmul.mubr.msk.f32.vlgmr.msra.gmra.mrb[98].mxu1 %vm3867_vm5, %v4405_v41  ;;  %v4365_v9 = vpop.permute.xlu1 %4364 }
 0x3c2   : > { %v4384_v11 = vmax.f32 %v4379_v13, 0.0  ;;  %v4375_v58 = vadd.f32 %v4365_v9, %v4346_v5  ;;  %v4606_v8 = vpop.permute.xlu0 %4605  ;;  %7283 = vmatprep.mubr.msk.f32.mxu1 %vm8355_vm4, %v10458_v48  ;;  %v4395_v46 = vsel %vm3768_vm3, %v4392_v47, %v4394_v49  ;;  %7401 = vmatpush3.bf16.msra.mxu1 %v9148_v39 }
 0x3c3   : > { %v4406_v37 = vmax.f32 %v4382_v63, %v4395_v46  ;;  %7402 = vmatprep.subr.bf16.mxu1 %v8352_v33  ;;  %v4620_v3 = vadd.f32 %v4606_v8, %v9300_v20 }
 0x3c4   : > { %v4396_v24 = vrot.slane %v4384_v11, 1  ;;  %v4380_v38 = vadd.f32 %v9467_v1, %v4375_v58 }
 0x3c5   : > { %7284 = vmatmul.mubr.msk.f32.gmra.mrb[100].mxu1 %vm3867_vm5, %v4406_v37  ;;  %v4608_v18 = vpop.permute.xlu1 %4607 }
 0x3c6   : > { %v4385_v35 = vmax.f32 %v4380_v38, 0.0  ;;  %v4635_v26 = vpop.permute.xlu0 %4634  ;;  %7286 = vmatprep.mubr.msk.f32.mxu1 %vm8355_vm4, %v10458_v48  ;;  %v4397_v59 = vsel %vm3768_vm3, %v4394_v49, %v4396_v24  ;;  %v4621_v60 = vadd.f32 %v4608_v18, %v9306_v42 }
 0x3c7   : > { %v4649_v7 = vadd.f32 %v4635_v26, %v4620_v3  ;;  %v4407_v52 = vmax.f32 %v4383_v51, %v4397_v59 }
 0x3c8   : > { %v4398_v56 = vrot.slane %v4385_v35, 1 }
 0x3c9   : > { %v4654_v63 = vadd.f32 %v9467_v1, %v4649_v7  ;;  %7287 = vmatmul.mubr.msk.f32.gmra.mrb[102].mxu1 %vm3867_vm5, %v4407_v52  ;;  %v4637_v20 = vpop.permute.xlu1 %4636 }
 0x3ca   : > { %v4650_v43 = vadd.f32 %v4637_v20, %v4621_v60  ;;  %v4610_v29 = vpop.permute.xlu0 %4609  ;;  %7289 = vmatprep.mubr.msk.f32.mxu1 %vm8355_vm4, %v10458_v48  ;;  %v4399_v30 = vsel %vm3768_vm3, %v4396_v24, %v4398_v56  ;;  %v4409_v6 = vmax.f32 %v4385_v35, %v4398_v56 }
 0x3cb   : > { %v4408_v47 = vmax.f32 %v4384_v11, %v4399_v30  ;;  %v4659_v36 = vmax.f32 %v4654_v63, 0.0  ;;  %v4622_v40 = vadd.f32 %v4610_v29, %v9312_v21 }
 0x3cc   : > { %v4655_v44 = vadd.f32 %v9467_v1, %v4650_v43 }
 0x3cd   : > { %7290 = vmatmul.mubr.msk.f32.gmra.mrb[104].mxu1 %vm3867_vm5, %v4408_v47  ;;  %v4639_v42 = vpop.permute.xlu1 %4638  ;;  %v4669_v41 = vrot.slane %v4659_v36, 1 }
 0x3ce   : > { %v4660_v14 = vmax.f32 %v4655_v44, 0.0  ;;  %v4651_v51 = vadd.f32 %v4639_v42, %v4622_v40  ;;  %v4612_v62 = vpop.permute.xlu0 %4611  ;;  %7292 = vmatprep.mubr.msk.f32.mxu1 %vm8355_vm4, %v10458_v48 }
 0x3cf   : > { %v4623_v5 = vadd.f32 %v4612_v62, %v9327_v12 }
 0x3d0   : > { %v4670_v49 = vrot.slane %v4660_v14, 1  ;;  %v4656_v13 = vadd.f32 %v9467_v1, %v4651_v51 }
 0x3d1   : > { %7293 = vmatmul.mubr.msk.f32.gmra.mrb[106].mxu1 %vm3867_vm5, %v4409_v6  ;;  %v4641_v9 = vpop.permute.xlu1 %4640 }
 0x3d2   : > { %v4671_v21 = vsel %vm3768_vm3, %v4669_v41, %v4670_v49  ;;  %v4661_v11 = vmax.f32 %v4656_v13, 0.0  ;;  %v4652_v58 = vadd.f32 %v4641_v9, %v4623_v5  ;;  %v4614_v8 = vpop.permute.xlu0 %4613  ;;  %7299 = vmatprep.mubr.msk.f32.mxu1 %vm8355_vm4, %v10458_v48 }
 0x3d3   : > { %v4683_v46 = vmax.f32 %v4659_v36, %v4671_v21  ;;  %v4624_v38 = vadd.f32 %v4614_v8, %v9332_v17 }
 0x3d4   : > { %v4672_v37 = vrot.slane %v4661_v11, 1  ;;  %v4657_v24 = vadd.f32 %v9467_v1, %v4652_v58 }
 0x3d5   : > { %7300 = vmatmul.mubr.msk.f32.vlgmr.msra.gmra.mrb[108].mxu1 %vm3867_vm5, %v4683_v46  ;;  %v4643_v12 = vpop.permute.xlu1 %4642 }
 0x3d6   : > { %v4662_v3 = vmax.f32 %v4657_v24, 0.0  ;;  %v4653_v18 = vadd.f32 %v4643_v12, %v4624_v38  ;;  %v4884_v35 = vpop.permute.xlu0 %4883  ;;  %7302 = vmatprep.mubr.msk.f32.mxu1 %vm8355_vm4, %v10458_v48  ;;  %v4673_v26 = vsel %vm3768_vm3, %v4670_v49, %v4672_v37  ;;  %7404 = vmatpush3.bf16.msra.mxu1 %v9148_v39 }
 0x3d7   : > { %v4684_v59 = vmax.f32 %v4660_v14, %v4673_v26  ;;  %7405 = vmatprep.subr.bf16.mxu1 %v8352_v33  ;;  %v4898_v17 = vadd.f32 %v4884_v35, %v9349_v57 }
 0x3d8   : > { %v4674_v7 = vrot.slane %v4662_v3, 1  ;;  %v4658_v52 = vadd.f32 %v9467_v1, %v4653_v18 }
 0x3d9   : > { %7303 = vmatmul.mubr.msk.f32.gmra.mrb[110].mxu1 %vm3867_vm5, %v4684_v59  ;;  %v4886_v56 = vpop.permute.xlu1 %4885 }
 0x3da   : > { %v4663_v60 = vmax.f32 %v4658_v52, 0.0  ;;  %v4913_v63 = vpop.permute.xlu0 %4912  ;;  %7305 = vmatprep.mubr.msk.f32.mxu1 %vm8355_vm4, %v10458_v48  ;;  %v4675_v20 = vsel %vm3768_vm3, %v4672_v37, %v4674_v7  ;;  %v4899_v47 = vadd.f32 %v4886_v56, %v9351_v34 }
 0x3db   : > { %v4927_v43 = vadd.f32 %v4913_v63, %v4898_v17  ;;  %v4685_v29 = vmax.f32 %v4661_v11, %v4675_v20 }
 0x3dc   : > { %v4676_v30 = vrot.slane %v4663_v60, 1 }
 0x3dd   : > { %v4932_v36 = vadd.f32 %v9467_v1, %v4927_v43  ;;  %7306 = vmatmul.mubr.msk.f32.gmra.mrb[112].mxu1 %vm3867_vm5, %v4685_v29  ;;  %v4915_v57 = vpop.permute.xlu1 %4914 }
 0x3de   : > { %v4928_v44 = vadd.f32 %v4915_v57, %v4899_v47  ;;  %v4888_v40 = vpop.permute.xlu0 %4887  ;;  %7308 = vmatprep.mubr.msk.f32.mxu1 %vm8355_vm4, %v10458_v48  ;;  %v4677_v42 = vsel %vm3768_vm3, %v4674_v7, %v4676_v30  ;;  %v4687_v5 = vmax.f32 %v4663_v60, %v4676_v30 }
 0x3df   : > { %v4686_v14 = vmax.f32 %v4662_v3, %v4677_v42  ;;  %v4937_v51 = vmax.f32 %v4932_v36, 0.0  ;;  %v4900_v6 = vadd.f32 %v4888_v40, %v9364_v22 }
 0x3e0   : > { %v4933_v62 = vadd.f32 %v9467_v1, %v4928_v44 }
 0x3e1   : > { %7309 = vmatmul.mubr.msk.f32.gmra.mrb[114].mxu1 %vm3867_vm5, %v4686_v14  ;;  %v4917_v34 = vpop.permute.xlu1 %4916  ;;  %v4947_v9 = vrot.slane %v4937_v51, 1 }
 0x3e2   : > { %v4938_v41 = vmax.f32 %v4933_v62, 0.0  ;;  %v4929_v49 = vadd.f32 %v4917_v34, %v4900_v6  ;;  %v4890_v13 = vpop.permute.xlu0 %4889  ;;  %7311 = vmatprep.mubr.msk.f32.mxu1 %vm8355_vm4, %v10458_v48 }
 0x3e3   : > { %v4901_v58 = vadd.f32 %v4890_v13, %v9370_v28 }
 0x3e4   : > { %v4948_v21 = vrot.slane %v4938_v41, 1  ;;  %v4934_v11 = vadd.f32 %v9467_v1, %v4929_v49 }
 0x3e5   : > { %7312 = vmatmul.mubr.msk.f32.gmra.mrb[116].mxu1 %vm3867_vm5, %v4687_v5  ;;  %v4919_v8 = vpop.permute.xlu1 %4918 }
 0x3e6   : > { %v4949_v22 = vsel %vm3768_vm3, %v4947_v9, %v4948_v21  ;;  %v4939_v46 = vmax.f32 %v4934_v11, 0.0  ;;  %v4930_v37 = vadd.f32 %v4919_v8, %v4901_v58  ;;  %v4892_v24 = vpop.permute.xlu0 %4891  ;;  %7318 = vmatprep.mubr.msk.f32.mxu1 %vm8355_vm4, %v10458_v48 }
 0x3e7   : > { %v4961_v38 = vmax.f32 %v4937_v51, %v4949_v22  ;;  %v4902_v18 = vadd.f32 %v4892_v24, %v9385_v4 }
 0x3e8   : > { %v4950_v12 = vrot.slane %v4939_v46, 1  ;;  %v4935_v3 = vadd.f32 %v9467_v1, %v4930_v37 }
 0x3e9   : > { %7319 = vmatmul.mubr.msk.f32.vlgmr.msra.gmra.mrb[118].mxu1 %vm3867_vm5, %v4961_v38  ;;  %v4921_v28 = vpop.permute.xlu1 %4920 }
 0x3ea   : > { %v4940_v35 = vmax.f32 %v4935_v3, 0.0  ;;  %v4931_v26 = vadd.f32 %v4921_v28, %v4902_v18  ;;  %v5140_v59 = vpop.permute.xlu0 %5139  ;;  %7321 = vmatprep.mubr.msk.f32.mxu1 %vm8355_vm4, %v10458_v48  ;;  %v4951_v7 = vsel %vm3768_vm3, %v4948_v21, %v4950_v12  ;;  %7407 = vmatpush3.bf16.msra.mxu1 %v9148_v39 }
 0x3eb   : > { %v4962_v52 = vmax.f32 %v4938_v41, %v4951_v7  ;;  %7408 = vmatprep.subr.bf16.mxu1 %v8352_v33  ;;  %v5154_v4 = vadd.f32 %v5140_v59, %v9396_v25 }
 0x3ec   : > { %v4952_v17 = vrot.slane %v4940_v35, 1  ;;  %v4936_v56 = vadd.f32 %v9467_v1, %v4931_v26 }
 0x3ed   : > { %7322 = vmatmul.mubr.msk.f32.gmra.mrb[120].mxu1 %vm3867_vm5, %v4962_v52  ;;  %v5142_v60 = vpop.permute.xlu1 %5141 }
 0x3ee   : > { %v4941_v63 = vmax.f32 %v4936_v56, 0.0  ;;  %v5169_v20 = vpop.permute.xlu0 %5168  ;;  %7324 = vmatprep.mubr.msk.f32.mxu1 %vm8355_vm4, %v10458_v48  ;;  %v4953_v43 = vsel %vm3768_vm3, %v4950_v12, %v4952_v17  ;;  %v5155_v36 = vadd.f32 %v5142_v60, %v9402_v31 }
 0x3ef   : > { %v5183_v29 = vadd.f32 %v5169_v20, %v5154_v4  ;;  %v4963_v30 = vmax.f32 %v4939_v46, %v4953_v43 }
 0x3f0   : > { %v4954_v47 = vrot.slane %v4941_v63, 1 }
 0x3f1   : > { %v5188_v57 = vadd.f32 %v9467_v1, %v5183_v29  ;;  %7325 = vmatmul.mubr.msk.f32.gmra.mrb[122].mxu1 %vm3867_vm5, %v4963_v30  ;;  %v5171_v25 = vpop.permute.xlu1 %5170 }
 0x3f2   : > { %v5184_v44 = vadd.f32 %v5171_v25, %v5155_v36  ;;  %v5144_v40 = vpop.permute.xlu0 %5143  ;;  %7327 = vmatprep.mubr.msk.f32.mxu1 %vm8355_vm4, %v10458_v48  ;;  %v4955_v42 = vsel %vm3768_vm3, %v4952_v17, %v4954_v47  ;;  %v4965_v13 = vmax.f32 %v4941_v63, %v4954_v47 }
 0x3f3   : > { %v4964_v14 = vmax.f32 %v4940_v35, %v4955_v42  ;;  %v5193_v51 = vmax.f32 %v5188_v57, 0.0  ;;  %v5156_v6 = vadd.f32 %v5144_v40, %v9408_v61 }
 0x3f4   : > { %v5189_v62 = vadd.f32 %v9467_v1, %v5184_v44 }
 0x3f5   : > { %7328 = vmatmul.mubr.msk.f32.gmra.mrb[124].mxu1 %vm3867_vm5, %v4964_v14  ;;  %v5173_v31 = vpop.permute.xlu1 %5172  ;;  %v5203_v5 = vrot.slane %v5193_v51, 1 }
 0x3f6   : > { %v5194_v34 = vmax.f32 %v5189_v62, 0.0  ;;  %v5185_v41 = vadd.f32 %v5173_v31, %v5156_v6  ;;  %v5146_v49 = vpop.permute.xlu0 %5145  ;;  %7330 = vmatprep.mubr.msk.f32.mxu1 %vm8355_vm4, %v10458_v48 }
 0x3f7   : > { %v5157_v11 = vadd.f32 %v5146_v49, %v9423_v32 }
 0x3f8   : > { %v5204_v9 = vrot.slane %v5194_v34, 1  ;;  %v5190_v21 = vadd.f32 %v9467_v1, %v5185_v41 }
 0x3f9   : > { %7331 = vmatmul.mubr.msk.f32.gmra.mrb[126].mxu1 %vm3867_vm5, %v4965_v13  ;;  %v5175_v58 = vpop.permute.xlu1 %5174 }
 0x3fa   : > { %v5205_v61 = vsel %vm3768_vm3, %v5203_v5, %v5204_v9  ;;  %v5195_v8 = vmax.f32 %v5190_v21, 0.0  ;;  %v5186_v22 = vadd.f32 %v5175_v58, %v5157_v11  ;;  %v5148_v46 = vpop.permute.xlu0 %5147  ;;  %7337 = vmatprep.mubr.msk.f32.mxu1 %vm8355_vm4, %v10458_v48 }
 0x3fb   : > { %v5217_v37 = vmax.f32 %v5193_v51, %v5205_v61  ;;  %v5158_v12 = vadd.f32 %v5148_v46, %v9428_v55 }
 0x3fc   : > { %v5206_v24 = vrot.slane %v5195_v8, 1  ;;  %v5191_v38 = vadd.f32 %v9467_v1, %v5186_v22 }
 0x3fd   : > { %7338 = vmatmul.mubr.msk.f32.vlgmr.msra.gmra.mrb[128].mxu1 %vm3867_vm5, %v5217_v37  ;;  %v5177_v32 = vpop.permute.xlu1 %5176 }
 0x3fe   : > { %v5196_v3 = vmax.f32 %v5191_v38, 0.0  ;;  %v5187_v18 = vadd.f32 %v5177_v32, %v5158_v12  ;;  %v5416_v28 = vpop.permute.xlu0 %5415  ;;  %7340 = vmatprep.mubr.msk.f32.mxu1 %vm8355_vm4, %v10458_v48  ;;  %v5207_v35 = vsel %vm3768_vm3, %v5204_v9, %v5206_v24  ;;  %7410 = vmatpush3.bf16.msra.mxu1 %v9148_v39 }
 0x3ff   : > { %v5218_v26 = vmax.f32 %v5194_v34, %v5207_v35  ;;  %7411 = vmatprep.subr.bf16.mxu1 %v8352_v33  ;;  %v5430_v55 = vadd.f32 %v5416_v28, %v9445_v2 }
 0x400   : > { %v5208_v59 = vrot.slane %v5196_v3, 1  ;;  %v5192_v7 = vadd.f32 %v9467_v1, %v5187_v18 }
 0x401   : > { %7341 = vmatmul.mubr.msk.f32.gmra.mrb[130].mxu1 %vm3867_vm5, %v5218_v26  ;;  %v5418_v52 = vpop.permute.xlu1 %5417 }
 0x402   : > { %v5197_v17 = vmax.f32 %v5192_v7, 0.0  ;;  %v5445_v56 = vpop.permute.xlu0 %5444  ;;  %7343 = vmatprep.mubr.msk.f32.mxu1 %vm8355_vm4, %v10458_v48  ;;  %v5209_v4 = vsel %vm3768_vm3, %v5206_v24, %v5208_v59  ;;  %v5431_v33 = vadd.f32 %v5418_v52, %v9447_v16 }
 0x403   : > { %v5459_v60 = vadd.f32 %v5445_v56, %v5430_v55  ;;  %v5219_v63 = vmax.f32 %v5195_v8, %v5209_v4 }
 0x404   : > { %v5210_v20 = vrot.slane %v5197_v17, 1 }
 0x405   : > { %v5464_v43 = vadd.f32 %v9467_v1, %v5459_v60  ;;  %7344 = vmatmul.mubr.msk.f32.gmra.mrb[132].mxu1 %vm3867_vm5, %v5219_v63  ;;  %v5447_v2 = vpop.permute.xlu1 %5446 }
 0x406   : > { %v5460_v29 = vadd.f32 %v5447_v2, %v5431_v33  ;;  %v5420_v30 = vpop.permute.xlu0 %5419  ;;  %7346 = vmatprep.mubr.msk.f32.mxu1 %vm8355_vm4, %v10458_v48  ;;  %v5211_v47 = vsel %vm3768_vm3, %v5208_v59, %v5210_v20  ;;  %v5221_v51 = vmax.f32 %v5197_v17, %v5210_v20 }
 0x407   : > { %v5220_v36 = vmax.f32 %v5196_v3, %v5211_v47  ;;  %v5469_v57 = vmax.f32 %v5464_v43, 0.0  ;;  %v5432_v44 = vadd.f32 %v5420_v30, %v9461_v54 }
 0x408   : > { %v5465_v25 = vadd.f32 %v9467_v1, %v5460_v29 }
 0x409   : > { %7347 = vmatmul.mubr.msk.f32.gmra.mrb[134].mxu1 %vm3867_vm5, %v5220_v36  ;;  %v5449_v16 = vpop.permute.xlu1 %5448  ;;  %v5479_v62 = vrot.slane %v5469_v57, 1 }
 0x40a   : > { %v5470_v40 = vmax.f32 %v5465_v25, 0.0  ;;  %v5461_v42 = vadd.f32 %v5449_v16, %v5432_v44  ;;  %v5422_v14 = vpop.permute.xlu0 %5421  ;;  %7349 = vmatprep.mubr.msk.f32.mxu1 %vm8355_vm4, %v10458_v48 }
 0x40b   : > { %v5433_v34 = vadd.f32 %v5422_v14, %v9472_v0 }
 0x40c   : > { %v5480_v6 = vrot.slane %v5470_v40, 1  ;;  %v5466_v31 = vadd.f32 %v9467_v1, %v5461_v42 }
 0x40d   : > { %7350 = vmatmul.mubr.msk.f32.gmra.mrb[136].mxu1 %vm3867_vm5, %v5221_v51  ;;  %v5451_v41 = vpop.permute.xlu1 %5450 }
 0x40e   : > { %v5481_v54 = vsel %vm3768_vm3, %v5479_v62, %v5480_v6  ;;  %v5471_v49 = vmax.f32 %v5466_v31, 0.0  ;;  %v5462_v13 = vadd.f32 %v5451_v41, %v5433_v34  ;;  %v5424_v5 = vpop.permute.xlu0 %5423  ;;  %7356 = vmatprep.mubr.msk.f32.mxu1 %vm8355_vm4, %v10458_v48 }
 0x40f   : > { %v5493_v9 = vmax.f32 %v5469_v57, %v5481_v54  ;;  %v5434_v58 = vadd.f32 %v5424_v5, %v9491_v23 }
 0x410   : > { %v5482_v21 = vrot.slane %v5471_v49, 1  ;;  %v5467_v11 = vadd.f32 %v9467_v1, %v5462_v13 }
 0x411   : > { %7357 = vmatmul.mubr.msk.f32.vlgmr.msra.gmra.mrb[138].mxu1 %vm3867_vm5, %v5493_v9  ;;  %v5453_v0 = vpop.permute.xlu1 %5452 }
 0x412   : > { %v5472_v61 = vmax.f32 %v5467_v11, 0.0  ;;  %v5463_v8 = vadd.f32 %v5453_v0, %v5434_v58  ;;  %v5692_v22 = vpop.permute.xlu0 %5691  ;;  %7359 = vmatprep.mubr.msk.f32.mxu1 %vm8355_vm4, %v10458_v48  ;;  %v5483_v46 = vsel %vm3768_vm3, %v5480_v6, %v5482_v21  ;;  %7413 = vmatpush3.bf16.msra.mxu1 %v9148_v39  ;;  %v8342_v58 = vld [vmem:[%s10451_s2] ss:$0 sm:$0xff] }
 0x413   : > { %v5494_v37 = vmax.f32 %v5470_v40, %v5483_v46  ;;  %v5706_v12 = vadd.f32 %v5692_v22, %v9508_v10 }
 0x414   : > { %v5484_v24 = vrot.slane %v5472_v61, 1  ;;  %v5468_v38 = vadd.f32 %v9467_v1, %v5463_v8 }
 0x415   : > { %7360 = vmatmul.mubr.msk.f32.gmra.mrb[140].mxu1 %vm3867_vm5, %v5494_v37  ;;  %v5694_v23 = vpop.permute.xlu1 %5693 }
 0x416   : > { %v5473_v32 = vmax.f32 %v5468_v38, 0.0  ;;  %v5721_v3 = vpop.permute.xlu0 %5720  ;;  %7362 = vmatprep.mubr.msk.f32.mxu1 %vm8355_vm4, %v10458_v48  ;;  %v5485_v18 = vsel %vm3768_vm3, %v5482_v21, %v5484_v24  ;;  %v5707_v39 = vadd.f32 %v5694_v23, %v9515_v19 }
 0x417   : > { %v5735_v28 = vadd.f32 %v5721_v3, %v5706_v12  ;;  %v5495_v35 = vmax.f32 %v5471_v49, %v5485_v18 }
 0x418   : > { %v5486_v26 = vrot.slane %v5473_v32, 1 }
 0x419   : > { %v5740_v59 = vadd.f32 %v9467_v1, %v5735_v28  ;;  %7363 = vmatmul.mubr.msk.f32.gmra.mrb[142].mxu1 %vm3867_vm5, %v5495_v35  ;;  %v5723_v10 = vpop.permute.xlu1 %5722 }
 0x41a   : > { %v5736_v7 = vadd.f32 %v5723_v10, %v5707_v39  ;;  %v5696_v55 = vpop.permute.xlu0 %5695  ;;  %7365 = vmatprep.mubr.msk.f32.mxu1 %vm8355_vm4, %v10458_v48  ;;  %v5487_v52 = vsel %vm3768_vm3, %v5484_v24, %v5486_v26  ;;  %v5497_v43 = vmax.f32 %v5473_v32, %v5486_v26 }
 0x41b   : > { %v5496_v17 = vmax.f32 %v5472_v61, %v5487_v52  ;;  %v5745_v56 = vmax.f32 %v5740_v59, 0.0  ;;  %v5708_v60 = vadd.f32 %v5696_v55, %v9527_v15 }
 0x41c   : > { %v5741_v4 = vadd.f32 %v9467_v1, %v5736_v7 }
 0x41d   : > { %7366 = vmatmul.mubr.msk.f32.gmra.mrb[144].mxu1 %vm3867_vm5, %v5496_v17  ;;  %v5725_v19 = vpop.permute.xlu1 %5724  ;;  %v5755_v2 = vrot.slane %v5745_v56, 1 }
 0x41e   : > { %v5746_v63 = vmax.f32 %v5741_v4, 0.0  ;;  %v5737_v20 = vadd.f32 %v5725_v19, %v5708_v60  ;;  %v5698_v33 = vpop.permute.xlu0 %5697  ;;  %7368 = vmatprep.mubr.msk.f32.mxu1 %vm8355_vm4, %v10458_v48 }
 0x41f   : > { %v5709_v47 = vadd.f32 %v5698_v33, %v9550_v53 }
 0x420   : > { %v5756_v29 = vrot.slane %v5746_v63, 1  ;;  %v5742_v30 = vadd.f32 %v9467_v1, %v5737_v20 }
 0x421   : > { %7369 = vmatmul.mubr.msk.f32.gmra.mrb[146].mxu1 %vm3867_vm5, %v5497_v43  ;;  %v5727_v36 = vpop.permute.xlu1 %5726 }
 0x422   : > { %v5757_v15 = vsel %vm3768_vm3, %v5755_v2, %v5756_v29  ;;  %v5747_v57 = vmax.f32 %v5742_v30, 0.0  ;;  %v5738_v25 = vadd.f32 %v5727_v36, %v5709_v47  ;;  %v5700_v44 = vpop.permute.xlu0 %5699  ;;  %7375 = vmatprep.mubr.msk.f32.mxu1 %vm8355_vm4, %v10458_v48 }
 0x423   : > { %v5769_v16 = vmax.f32 %v5745_v56, %v5757_v15  ;;  %v5710_v14 = vadd.f32 %v5700_v44, %v9558_v45 }
 0x424   : > { %v5758_v40 = vrot.slane %v5747_v57, 1  ;;  %v5743_v42 = vadd.f32 %v9467_v1, %v5738_v25 }
 0x425   : > { %7376 = vmatmul.mubr.msk.f32.vlgmr.msra.gmra.mrb[148].mxu1 %vm3867_vm5, %v5769_v16  ;;  %v5729_v53 = vpop.permute.xlu1 %5728 }
 0x426   : > { %v5748_v51 = vmax.f32 %v5743_v42, 0.0  ;;  %v5739_v62 = vadd.f32 %v5729_v53, %v5710_v14  ;;  %v3779_v6 = vpop.permute.xlu0 %3778  ;;  %7378 = vmatprep.mubr.msk.f32.mxu1 %vm8355_vm4, %v10458_v48  ;;  %v5759_v31 = vsel %vm3768_vm3, %v5756_v29, %v5758_v40 }
 0x427   : > { %v5770_v34 = vmax.f32 %v5746_v63, %v5759_v31  ;;  %v3793_v49 = vadd.f32 %v3779_v6, %v9581_v27 }
 0x428   : > { %v5760_v41 = vrot.slane %v5748_v51, 1  ;;  %v5744_v54 = vadd.f32 %v9467_v1, %v5739_v62 }
 0x429   : > { %7379 = vmatmul.mubr.msk.f32.gmra.mrb[150].mxu1 %vm3867_vm5, %v5770_v34  ;;  %v3808_v45 = vpop.permute.xlu1 %3807 }
 0x42a   : > { %v5749_v13 = vmax.f32 %v5744_v54, 0.0  ;;  %v3822_v5 = vadd.f32 %v3808_v45, %v3793_v49  ;;  %7381 = vmatprep.mubr.msk.f32.mxu1 %vm8355_vm4, %v10458_v48  ;;  %v5761_v9 = vsel %vm3768_vm3, %v5758_v40, %v5760_v41 }
 0x42b   : > { %v5771_v21 = vmax.f32 %v5747_v57, %v5761_v9 }
 0x42c   : > { %v5762_v11 = vrot.slane %v5749_v13, 1  ;;  %v3833_v0 = vadd.f32 %v8342_v58, %v3822_v5 }
 0x42d   : > { %7382 = vmatmul.mubr.msk.f32.gmra.mrb[152].mxu1 %vm3867_vm5, %v5771_v21 }
 0x42e   : > { %v3838_v1 = vmax.f32 %v3833_v0, 0.0  ;;  %7384 = vmatprep.mubr.msk.f32.mxu1 %vm8355_vm4, %v10458_v48  ;;  %v5763_v27 = vsel %vm3768_vm3, %v5760_v41, %v5762_v11  ;;  %v5773_v46 = vmax.f32 %v5749_v13, %v5762_v11 }
 0x42f   : > { %v5772_v61 = vmax.f32 %v5748_v51, %v5763_v27 }
 0x430   : > { %v3848_v8 = vrot.slane %v3838_v1, 1 }
 0x431   : > { %7385 = vmatmul.mubr.msk.f32.gmra.mrb[154].mxu1 %vm3867_vm5, %v5772_v61 }
 0x432   : > { %v3850_v22 = vsel %vm3768_vm3, %v3848_v8, %v9500_v50  ;;  %7387 = vmatprep.mubr.msk.f32.mxu1 %vm8355_vm4, %v10458_v48  ;;  %vm6513_vm3 = vcmask 359424  }
 0x433   : > { %v3862_v37 = vmax.f32 %v3838_v1, %v3850_v22 }
 0x435   : > { %7243 = vmatmul.mubr.msk.f32.vlgmr.msra.gmra.mrb[80].mxu0 %vm3867_vm5, %v3862_v37  ;;  %7388 = vmatmul.mubr.msk.f32.gmra.mrb[156].mxu1 %vm3867_vm5, %v5773_v46 }
 0x436   : > { %6182 = vmatprep.mubr.f32.mxu1 %v10458_v48 }
 0x46f   : > { %v9803_v24 = vpop.f32.mrb[80].mxu1 }
 0x470   : > { %v7247_v38 = vpop.f32.mrb[81].mxu1  ;;  %v10464_v23 = vrot.slane %v9803_v24, 2 }
 0x473   : > { %v9805_v12 = vpop.f32.mrb[82].mxu1 }
 0x474   : > { %10469 = vst [vmem:[#allocation4_spill] sm:$0xff] %v9805_v12  ;;  %v3981_v50 = vrot.slane %v9805_v12, 2  ;;  %v7250_v32 = vpop.f32.mrb[83].mxu1 }
 0x476   : > { %v3982_v3 = vsel %vm2544_vm0, %v10464_v23, %v3981_v50 }
 0x477   : > { %3989 = vrot.lane.b32.xlu1 %v3982_v3, %s8353_s21  ;;  %v9813_v18 = vpop.f32.mrb[84].mxu1 }
 0x478   : > { %v3983_v28 = vrot.slane %v9813_v18, 2  ;;  %v7253_v35 = vpop.f32.mrb[85].mxu1 }
 0x47a   : > { %v9817_v26 = vsel %vm2544_vm0, %v3981_v50, %v3983_v28 }
 0x47b   : > { %v9819_v39 = vpop.f32.mrb[86].mxu1 }
 0x47c   : > { %v10462_v59 = vrot.slane %v9819_v39, 2  ;;  %v7256_v10 = vpop.f32.mrb[87].mxu1 }
 0x47e   : > { %v9825_v7 = vsel %vm2544_vm0, %v3983_v28, %v10462_v59 }
 0x47f   : > { %v9827_v55 = vpop.f32.mrb[88].mxu1 }
 0x480   : > { %v7263_v52 = vpop.f32.mrb[89].mxu1  ;;  %v4242_v56 = vrot.slane %v9827_v55, 2 }
 0x483   : > { %v9829_v17 = vpop.f32.mrb[90].mxu1 }
 0x484   : > { %v4243_v4 = vrot.slane %v9829_v17, 2  ;;  %v7266_v60 = vpop.f32.mrb[91].mxu1 }
 0x486   : > { %v9834_v19 = vsel %vm2544_vm0, %v4242_v56, %v4243_v4 }
 0x487   : > { %v9836_v63 = vpop.f32.mrb[92].mxu1 }
 0x488   : > { %v4245_v20 = vrot.slane %v9836_v63, 2  ;;  %v7269_v33 = vpop.f32.mrb[93].mxu1 }
 0x48a   : > { %v4246_v43 = vsel %vm2544_vm0, %v4243_v4, %v4245_v20 }
 0x48b   : > { %4253 = vrot.lane.b32.xlu1 %v4246_v43, %s8353_s21  ;;  %v9841_v2 = vpop.f32.mrb[94].mxu1 }
 0x48c   : > { %v4247_v29 = vrot.slane %v9841_v2, 2  ;;  %v7272_v30 = vpop.f32.mrb[95].mxu1 }
 0x48e   : > { %v9845_v47 = vsel %vm2544_vm0, %v4245_v20, %v4247_v29 }
 0x48f   : > { %v9847_v36 = vpop.f32.mrb[96].mxu1 }
 0x490   : > { %v4249_v15 = vrot.slane %v9847_v36, 2  ;;  %v7275_v57 = vpop.f32.mrb[97].mxu1 }
 0x492   : > { %4259 = vrot.lane.b32.xlu1 %v4249_v15, %s8353_s21  ;;  %v4250_v25 = vsel %vm2544_vm0, %v4247_v29, %v4249_v15 }
 0x494   : > { %v9852_v44 = vpop.f32.mrb[98].mxu1 }
 0x495   : > { %v7282_v16 = vpop.f32.mrb[99].mxu1  ;;  %v4520_v42 = vrot.slane %v9852_v44, 2 }
 0x496   : > { %4257 = vrot.lane.b32.xlu1 %v4250_v25, %s8353_s21 }
 0x498   : > { %v9855_v40 = vpop.f32.mrb[100].mxu1 }
 0x499   : > { %v4521_v14 = vrot.slane %v9855_v40, 2  ;;  %v7285_v53 = vpop.f32.mrb[101].mxu1 }
 0x49b   : > { %v9860_v51 = vsel %vm2544_vm0, %v4520_v42, %v4521_v14 }
 0x49c   : > { %v9862_v62 = vpop.f32.mrb[102].mxu1 }
 0x49d   : > { %v4523_v6 = vrot.slane %v9862_v62, 2  ;;  %v7288_v31 = vpop.f32.mrb[103].mxu1 }
 0x49f   : > { %v4524_v34 = vsel %vm2544_vm0, %v4521_v14, %v4523_v6 }
 0x4a0   : > { %4531 = vrot.lane.b32.xlu1 %v4524_v34, %s8353_s21  ;;  %v9867_v41 = vpop.f32.mrb[104].mxu1 }
 0x4a1   : > { %v4525_v54 = vrot.slane %v9867_v41, 2  ;;  %v7291_v49 = vpop.f32.mrb[105].mxu1 }
 0x4a3   : > { %v9871_v45 = vsel %vm2544_vm0, %v4523_v6, %v4525_v54 }
 0x4a4   : > { %v9873_v13 = vpop.f32.mrb[106].mxu1 }
 0x4a5   : > { %v4527_v5 = vrot.slane %v9873_v13, 2  ;;  %v7294_v9 = vpop.f32.mrb[107].mxu1 }
 0x4a7   : > { %4537 = vrot.lane.b32.xlu1 %v4527_v5, %s8353_s21  ;;  %v4528_v21 = vsel %vm2544_vm0, %v4525_v54, %v4527_v5 }
 0x4a8   : > { %v9878_v11 = vpop.f32.mrb[108].mxu1 }
 0x4a9   : > { %v7301_v58 = vpop.f32.mrb[109].mxu1  ;;  %v4798_v1 = vrot.slane %v9878_v11, 2 }
 0x4ab   : > { %4535 = vrot.lane.b32.xlu1 %v4528_v21, %s8353_s21 }
 0x4ac   : > { %v9881_v0 = vpop.f32.mrb[110].mxu1 }
 0x4ad   : > { %v4799_v27 = vrot.slane %v9881_v0, 2  ;;  %v7304_v61 = vpop.f32.mrb[111].mxu1 }
 0x4af   : > { %v9886_v8 = vsel %vm2544_vm0, %v4798_v1, %v4799_v27 }
 0x4b0   : > { %v9888_v22 = vpop.f32.mrb[112].mxu1 }
 0x4b1   : > { %v4801_v46 = vrot.slane %v9888_v22, 2  ;;  %v7307_v37 = vpop.f32.mrb[113].mxu1 }
 0x4b3   : > { %v4802_v38 = vsel %vm2544_vm0, %v4799_v27, %v4801_v46 }
 0x4b4   : > { %4809 = vrot.lane.b32.xlu1 %v4802_v38, %s8353_s21  ;;  %v9893_v50 = vpop.f32.mrb[114].mxu1 }
 0x4b5   : > { %v4803_v32 = vrot.slane %v9893_v50, 2  ;;  %v7310_v3 = vpop.f32.mrb[115].mxu1 }
 0x4b7   : > { %v9897_v28 = vsel %vm2544_vm0, %v4801_v46, %v4803_v32 }
 0x4b8   : > { %v9899_v35 = vpop.f32.mrb[116].mxu1 }
 0x4b9   : > { %v4805_v10 = vrot.slane %v9899_v35, 2  ;;  %v7313_v52 = vpop.f32.mrb[117].mxu1 }
 0x4bb   : > { %4815 = vrot.lane.b32.xlu1 %v4805_v10, %s8353_s21  ;;  %v4806_v56 = vsel %vm2544_vm0, %v4803_v32, %v4805_v10 }
 0x4bc   : > { %v9904_v4 = vpop.f32.mrb[118].mxu1 }
 0x4bd   : > { %v7320_v60 = vpop.f32.mrb[119].mxu1  ;;  %v5076_v33 = vrot.slane %v9904_v4, 2 }
 0x4bf   : > { %4813 = vrot.lane.b32.xlu1 %v4806_v56, %s8353_s21 }
 0x4c0   : > { %v9907_v20 = vpop.f32.mrb[120].mxu1 }
 0x4c1   : > { %v5077_v43 = vrot.slane %v9907_v20, 2  ;;  %v7323_v29 = vpop.f32.mrb[121].mxu1 }
 0x4c3   : > { %v9912_v30 = vsel %vm2544_vm0, %v5076_v33, %v5077_v43 }
 0x4c4   : > { %v9914_v15 = vpop.f32.mrb[122].mxu1 }
 0x4c5   : > { %v5079_v57 = vrot.slane %v9914_v15, 2  ;;  %v7326_v25 = vpop.f32.mrb[123].mxu1 }
 0x4c7   : > { %v5080_v16 = vsel %vm2544_vm0, %v5077_v43, %v5079_v57 }
 0x4c8   : > { %5087 = vrot.lane.b32.xlu1 %v5080_v16, %s8353_s21  ;;  %v9919_v42 = vpop.f32.mrb[124].mxu1  ;;  %v9964_v16 = vld [vmem:[%s10453_s4] ss:$0 sm:$0xff] }
 0x4c9   : > { %v10463_v14 = vrot.slane %v9919_v42, 2  ;;  %v7329_v53 = vpop.f32.mrb[125].mxu1 }
 0x4cb   : > { %v9925_v6 = vsel %vm2544_vm0, %v5079_v57, %v10463_v14 }
 0x4cc   : > { %v9927_v31 = vpop.f32.mrb[126].mxu1 }
 0x4cd   : > { %v7332_v34 = vpop.f32.mrb[127].mxu1 }
 0x4d0   : > { %v9929_v54 = vpop.f32.mrb[128].mxu1 }
 0x4d1   : > { %v7339_v49 = vpop.f32.mrb[129].mxu1  ;;  %v5332_v9 = vrot.slane %v9929_v54, 2 }
 0x4d4   : > { %v9931_v5 = vpop.f32.mrb[130].mxu1 }
 0x4d5   : > { %v5333_v21 = vrot.slane %v9931_v5, 2  ;;  %v7342_v58 = vpop.f32.mrb[131].mxu1 }
 0x4d7   : > { %v9936_v1 = vsel %vm2544_vm0, %v5332_v9, %v5333_v21 }
 0x4d8   : > { %v9938_v27 = vpop.f32.mrb[132].mxu1 }
 0x4d9   : > { %v5335_v61 = vrot.slane %v9938_v27, 2  ;;  %v7345_v46 = vpop.f32.mrb[133].mxu1 }
 0x4db   : > { %v5336_v37 = vsel %vm2544_vm0, %v5333_v21, %v5335_v61 }
 0x4dc   : > { %5343 = vrot.lane.b32.xlu1 %v5336_v37, %s8353_s21  ;;  %v9943_v38 = vpop.f32.mrb[134].mxu1 }
 0x4dd   : > { %v5337_v32 = vrot.slane %v9943_v38, 2  ;;  %v7348_v3 = vpop.f32.mrb[135].mxu1 }
 0x4df   : > { %v9947_v10 = vsel %vm2544_vm0, %v5335_v61, %v5337_v32 }
 0x4e0   : > { %v9949_v52 = vpop.f32.mrb[136].mxu1 }
 0x4e1   : > { %v10460_v56 = vrot.slane %v9949_v52, 2  ;;  %v7351_v60 = vpop.f32.mrb[137].mxu1 }
 0x4e3   : > { %v5340_v33 = vsel %vm2544_vm0, %v5337_v32, %v10460_v56 }
 0x4e4   : > { %5347 = vrot.lane.b32.xlu1 %v5340_v33, %s8353_s21  ;;  %v9956_v43 = vpop.f32.mrb[138].mxu1 }
 0x4e5   : > { %v7358_v29 = vpop.f32.mrb[139].mxu1  ;;  %v5608_v25 = vrot.slane %v9956_v43, 2 }
 0x4e8   : > { %v9958_v57 = vpop.f32.mrb[140].mxu1 }
 0x4e9   : > { %v3990_v53 = vpop.permute.xlu1 %3989  ;;  %v5609_v34 = vrot.slane %v9958_v57, 2  ;;  %v7361_v49 = vpop.f32.mrb[141].mxu1 }
 0x4ea   : > { %v4003_v9 = vadd.f32 %v3990_v53, %v9803_v24 }
 0x4eb   : > { %v9969_v21 = vsel %vm2544_vm0, %v5608_v25, %v5609_v34 }
 0x4ec   : > { %v4014_v58 = vadd.f32 %v9964_v16, %v4003_v9  ;;  %v9972_v61 = vpop.f32.mrb[142].mxu1 }
 0x4ed   : > { %10470 = vst [vmem:[#allocation5_spill] sm:$0xff] %v9972_v61  ;;  %v5611_v46 = vrot.slane %v9972_v61, 2  ;;  %v7364_v37 = vpop.f32.mrb[143].mxu1 }
 0x4ee   : > { %v4019_v32 = vmax.f32 %v4014_v58, 0.0 }
 0x4ef   : > { %v5612_v3 = vsel %vm2544_vm0, %v5609_v34, %v5611_v46 }
 0x4f0   : > { %5619 = vrot.lane.b32.xlu1 %v5612_v3, %s8353_s21  ;;  %v9977_v60 = vpop.f32.mrb[144].mxu1  ;;  %4025 = vst.msk [vmem:[#allocation3 + $0x10] sm:$0xff] %vm4023_vm6, %v4019_v32 }
 0x4f1   : > { %v5613_v33 = vrot.slane %v9977_v60, 2  ;;  %v7367_v29 = vpop.f32.mrb[145].mxu1 }
 0x4f3   : > { %v9982_v25 = vsel %vm2544_vm0, %v5611_v46, %v5613_v33 }
 0x4f4   : > { %v9984_v53 = vpop.f32.mrb[146].mxu1 }
 0x4f5   : > { %v10461_v49 = vrot.slane %v9984_v53, 2  ;;  %v7370_v9 = vpop.f32.mrb[147].mxu1 }
 0x4f7   : > { %v5616_v34 = vsel %vm2544_vm0, %v5613_v33, %v10461_v49 }
 0x4f8   : > { %5623 = vrot.lane.b32.xlu1 %v5616_v34, %s8353_s21  ;;  %v9991_v58 = vpop.f32.mrb[148].mxu1 }
 0x4f9   : > { %10471 = vst [vmem:[#allocation6_spill] sm:$0xff] %v9991_v58  ;;  %v7377_v37 = vpop.f32.mrb[149].mxu1  ;;  %v5884_v3 = vrot.slane %v9991_v58, 2  ;;  %v10473_v58 = vrot.slane %v9803_v24, 2  ;;  %v10474_v24 = vrot.slane %v9919_v42, 2 }
 0x4fc   : > { %v9993_v32 = vpop.f32.mrb[150].mxu1 }
 0x4fd   : > { %v5885_v46 = vrot.slane %v9993_v32, 2  ;;  %v7380_v29 = vpop.f32.mrb[151].mxu1  ;;  %v4254_v14 = vpop.permute.xlu1 %4253 }
 0x4ff   : > { %v9998_v48 = vsel %vm2544_vm0, %v5884_v3, %v5885_v46 }
 0x500   : > { %v10000_v9 = vpop.f32.mrb[152].mxu1 }
 0x501   : > { %10472 = vst [vmem:[#allocation7_spill] sm:$0xff] %v10000_v9  ;;  %v5887_v56 = vrot.slane %v10000_v9, 2  ;;  %v7383_v33 = vpop.f32.mrb[153].mxu1 }
 0x503   : > { %v5888_v34 = vsel %vm2544_vm0, %v5885_v46, %v5887_v56 }
 0x504   : > { %5895 = vrot.lane.b32.xlu1 %v5888_v34, %s8353_s21  ;;  %v10005_v37 = vpop.f32.mrb[154].mxu1  ;;  %v4260_v34 = vpop.permute.xlu1 %4259 }
 0x505   : > { %v5889_v49 = vrot.slane %v10005_v37, 2  ;;  %v7386_v59 = vpop.f32.mrb[155].mxu1 }
 0x506   : > { %v5083_v59 = vrot.slane %v9927_v31, 2 }
 0x507   : > { %v10009_v29 = vsel %vm2544_vm0, %v5887_v56, %v5889_v49 }
 0x508   : > { %v10011_v3 = vpop.f32.mrb[80].mxu0  ;;  %v10014_v12 = vpop.f32.mrb[156].mxu1 }
 0x509   : > { %v3978_v23 = vrot.slane %v10011_v3, 2  ;;  %v7244_v33 = vpop.f32.mrb[81].mxu0  ;;  %v5891_v46 = vrot.slane %v10014_v12, 2  ;;  %v7389_v9 = vpop.f32.mrb[157].mxu1 }
 0x50a   : > { %v4267_v33 = vadd.f32 %v4254_v14, %v9829_v17 }
 0x50b   : > { %v3980_v61 = vsel %vm2544_vm0, %v3978_v23, %v10473_v58  ;;  %v5892_v56 = vsel %vm2544_vm0, %v5889_v49, %v5891_v46  ;;  %v5084_v23 = vsel %vm2544_vm0, %v10474_v24, %v5083_v59  ;;  %v4258_v58 = vpop.permute.xlu1 %4257  ;;  %vm5996_vm0 = vcmask 293888  }
 0x50c   : > { %3987 = vrot.lane.b32.xlu0 %v3980_v61, %s8353_s21  ;;  %5899 = vrot.lane.b32.xlu1 %v5892_v56, %s8353_s21  ;;  %v4272_v61 = vadd.f32 %v9964_v16, %v4267_v33 }
 0x50e   : > { %v4277_v17 = vmax.f32 %v4272_v61, 0.0 }
 0x510   : > { %4251 = vrot.lane.b32.xlu0 %v9834_v19, %s8353_s21  ;;  %5091 = vrot.lane.b32.xlu1 %v5084_v23, %s8353_s21  ;;  %v4270_v19 = vadd.f32 %v4260_v34, %v9847_v36 }
 0x512   : > { %v4532_v49 = vpop.permute.xlu1 %4531  ;;  %v4275_v56 = vadd.f32 %v9964_v16, %v4270_v19  ;;  %v10476_v19 = vrot.slane %v9949_v52, 2 }
 0x513   : > { %v4545_v34 = vadd.f32 %v4532_v49, %v9855_v40 }
 0x514   : > { %4255 = vrot.lane.b32.xlu0 %v9845_v47, %s8353_s21  ;;  %3993 = vrot.lane.b32.xlu1 %v9825_v7, %s8353_s21  ;;  %v4269_v47 = vadd.f32 %v4258_v58, %v9841_v2  ;;  %v10475_v7 = vrot.slane %v9819_v39, 2  ;;  %v4280_v36 = vmax.f32 %v4275_v56, 0.0 }
 0x515   : > { %v4550_v2 = vadd.f32 %v9964_v16, %v4545_v34 }
 0x517   : > { %v4555_v23 = vmax.f32 %v4550_v2, 0.0 }
 0x518   : > { %4529 = vrot.lane.b32.xlu0 %v9860_v51, %s8353_s21  ;;  %4288 = vrot.lane.b32.xlu1 %v4277_v17, %s8357_s20  ;;  %v4274_v51 = vadd.f32 %v9964_v16, %v4269_v47 }
 0x519   : > { %v4538_v14 = vpop.permute.xlu1 %4537 }
 0x51a   : > { %v10045_v9 = vadd.f32 %v4538_v14, %v9873_v13  ;;  %v4279_v13 = vmax.f32 %v4274_v51, 0.0 }
 0x51c   : > { %4533 = vrot.lane.b32.xlu0 %v9871_v45, %s8353_s21  ;;  %3995 = vrot.lane.b32.xlu1 %v10475_v7, %s8353_s21 }
 0x51d   : > { %v4536_v33 = vpop.permute.xlu1 %4535 }
 0x51e   : > { %v4547_v45 = vadd.f32 %v4536_v33, %v9867_v41 }
 0x520   : > { %4807 = vrot.lane.b32.xlu0 %v9886_v8, %s8353_s21  ;;  %4294 = vrot.lane.b32.xlu1 %v4280_v36, %s8357_s20  ;;  %v4552_v40 = vadd.f32 %v9964_v16, %v4547_v45 }
 0x522   : > { %v4557_v8 = vmax.f32 %v4552_v40, 0.0 }
 0x524   : > { %4811 = vrot.lane.b32.xlu0 %v9897_v28, %s8353_s21  ;;  %4292 = vrot.lane.b32.xlu1 %v4279_v13, %s8357_s20 }
 0x526   : > { %v4810_v24 = vpop.permute.xlu1 %4809 }
 0x527   : > { %v4823_v58 = vadd.f32 %v4810_v24, %v9881_v0 }
 0x528   : > { %5085 = vrot.lane.b32.xlu0 %v9912_v30, %s8353_s21  ;;  %4566 = vrot.lane.b32.xlu1 %v4555_v23, %s8358_s22  ;;  %v3751_v23 = vlaneseq }
 0x529   : > { %v4828_v41 = vadd.f32 %v9964_v16, %v4823_v58 }
 0x52a   : > { %vm3753_vm7 = vcmp.lt.s32.totalorder %v3751_v23, 256 }
 0x52b   : > { %v4833_v49 = vmax.f32 %v4828_v41, 0.0  ;;  %v8359_v41 = vmov 1.0  }
 0x52c   : > { %5089 = vrot.lane.b32.xlu0 %v9925_v6, %s8353_s21  ;;  %4570 = vrot.lane.b32.xlu1 %v4557_v8, %s8358_s22  ;;  %3756 = vst.msk [vmem:[#allocation3 + $0x43] ss:$8 sm:$0x3] %vm3753_vm7, %v8359_v41 }
 0x52d   : > { %v4816_v28 = vpop.permute.xlu1 %4815 }
 0x52e   : > { %v10074_v61 = vadd.f32 %v4816_v28, %v9899_v35 }
 0x530   : > { %5341 = vrot.lane.b32.xlu0 %v9936_v1, %s8353_s21  ;;  %4844 = vrot.lane.b32.xlu1 %v4833_v49, %s8353_s21 }
 0x531   : > { %v4814_v0 = vpop.permute.xlu1 %4813 }
 0x532   : > { %v4825_v30 = vadd.f32 %v4814_v0, %v9893_v50 }
 0x534   : > { %v4830_v17 = vadd.f32 %v9964_v16, %v4825_v30  ;;  %5345 = vrot.lane.b32.xlu0 %v9947_v10, %s8353_s21  ;;  %v10477_v10 = vrot.slane %v9984_v53, 2 }
 0x536   : > { %v4835_v6 = vmax.f32 %v4830_v17, 0.0  ;;  %v4553_v17 = vadd.f32 %v9964_v16, %v10045_v9  ;;  %v4831_v9 = vadd.f32 %v9964_v16, %v10074_v61 }
 0x538   : > { %5349 = vrot.lane.b32.xlu0 %v10476_v19, %s8353_s21  ;;  %4848 = vrot.lane.b32.xlu1 %v4835_v6, %s8353_s21 }
 0x53a   : > { %v5088_v35 = vpop.permute.xlu1 %5087 }
 0x53b   : > { %v5101_v1 = vadd.f32 %v5088_v35, %v9907_v20 }
 0x53c   : > { %5617 = vrot.lane.b32.xlu0 %v9969_v21, %s8353_s21 }
 0x53d   : > { %v5106_v50 = vadd.f32 %v9964_v16, %v5101_v1 }
 0x53f   : > { %v5111_v14 = vmax.f32 %v5106_v50, 0.0 }
 0x540   : > { %5621 = vrot.lane.b32.xlu0 %v9982_v25, %s8353_s21 }
 0x541   : > { %5116 = vst.msk [vmem:[#allocation3 + $0x18] sm:$0xff] %vm4023_vm6, %v5111_v14  ;;  %v4558_v14 = vmax.f32 %v4553_v17, 0.0 }
 0x544   : > { %5625 = vrot.lane.b32.xlu0 %v10477_v10, %s8353_s21 }
 0x548   : > { %5893 = vrot.lane.b32.xlu0 %v9998_v48, %s8353_s21 }
 0x54c   : > { %5897 = vrot.lane.b32.xlu0 %v10009_v29, %s8353_s21 }
 0x54e   : > { %v5344_v20 = vpop.permute.xlu1 %5343 }
 0x54f   : > { %v5357_v21 = vadd.f32 %v5344_v20, %v9931_v5 }
 0x550   : > { %5901 = vrot.lane.b32.xlu0 %v5891_v46, %s8353_s21 }
 0x551   : > { %v5362_v25 = vadd.f32 %v9964_v16, %v5357_v21 }
 0x553   : > { %v5367_v56 = vmax.f32 %v5362_v25, 0.0 }
 0x554   : > { %3991 = vrot.lane.b32.xlu0 %v9817_v26, %s8353_s21 }
 0x555   : > { %5378 = vrot.lane.b32.xlu1 %v5367_v56, %s8357_s20 }
 0x556   : > { %v5348_v47 = vpop.permute.xlu1 %5347 }
 0x557   : > { %v5359_v48 = vadd.f32 %v5348_v47, %v9943_v38  ;;  %v4836_v47 = vmax.f32 %v4831_v9, 0.0 }
 0x559   : > { %v5364_v29 = vadd.f32 %v9964_v16, %v5359_v48 }
 0x55b   : > { %v5369_v7 = vmax.f32 %v5364_v29, 0.0 }
 0x55d   : > { %5382 = vrot.lane.b32.xlu1 %v5369_v7, %s8357_s20 }
 0x562   : > { %v5620_v5 = vpop.permute.xlu1 %5619 }
 0x563   : > { %v5633_v36 = vadd.f32 %v5620_v5, %v9958_v57 }
 0x565   : > { %v5638_v46 = vadd.f32 %v9964_v16, %v5633_v36 }
 0x567   : > { %v5643_v51 = vmax.f32 %v5638_v46, 0.0 }
 0x569   : > { %5654 = vrot.lane.b32.xlu1 %v5643_v51, %s8358_s22 }
 0x56a   : > { %v5624_v34 = vpop.permute.xlu1 %5623 }
 0x56b   : > { %v5635_v26 = vadd.f32 %v5624_v34, %v9977_v60 }
 0x56d   : > { %v5640_v33 = vadd.f32 %v9964_v16, %v5635_v26 }
 0x56f   : > { %v5645_v13 = vmax.f32 %v5640_v33, 0.0 }
 0x571   : > { %5658 = vrot.lane.b32.xlu1 %v5645_v13, %s8358_s22 }
 0x576   : > { %v5896_v38 = vpop.permute.xlu1 %5895 }
 0x577   : > { %v5909_v2 = vadd.f32 %v5896_v38, %v9993_v32 }
 0x579   : > { %v5914_v45 = vadd.f32 %v9964_v16, %v5909_v2 }
 0x57b   : > { %v5919_v24 = vmax.f32 %v5914_v45, 0.0 }
 0x57d   : > { %5930 = vrot.lane.b32.xlu1 %v5919_v24, %s8353_s21 }
 0x57e   : > { %v3988_v57 = vpop.permute.xlu0 %3987  ;;  %v5900_v58 = vpop.permute.xlu1 %5899 }
 0x57f   : > { %v4002_v40 = vadd.f32 %v3988_v57, %v10011_v3  ;;  %v5911_v60 = vadd.f32 %v5900_v58, %v10005_v37 }
 0x581   : > { %v4013_v8 = vadd.f32 %v9964_v16, %v4002_v40  ;;  %v5916_v32 = vadd.f32 %v9964_v16, %v5911_v60 }
 0x582   : > { %v4252_v28 = vpop.permute.xlu0 %4251  ;;  %v5092_v30 = vpop.permute.xlu1 %5091 }
 0x583   : > { %v4018_v49 = vmax.f32 %v4013_v8, 0.0  ;;  %v4266_v0 = vadd.f32 %v4252_v28, %v9827_v55  ;;  %v5921_v3 = vmax.f32 %v5916_v32, 0.0  ;;  %v5103_v6 = vadd.f32 %v5092_v30, %v9919_v42 }
 0x585   : > { %v4271_v37 = vadd.f32 %v9964_v16, %v4266_v0  ;;  %4024 = vst.msk [vmem:[#allocation3] sm:$0xff] %vm4023_vm6, %v4018_v49  ;;  %v5108_v19 = vadd.f32 %v9964_v16, %v5103_v6  ;;  %5934 = vrot.lane.b32.xlu1 %v5921_v3, %s8353_s21 }
 0x586   : > { %v4256_v35 = vpop.permute.xlu0 %4255  ;;  %v3994_v55 = vpop.permute.xlu1 %3993 }
 0x587   : > { %v4276_v1 = vmax.f32 %v4271_v37, 0.0  ;;  %v4268_v50 = vadd.f32 %v4256_v35, %v9836_v63  ;;  %v5113_v10 = vmax.f32 %v5108_v19, 0.0  ;;  %v4005_v42 = vadd.f32 %v3994_v55, %v9813_v18 }
 0x589   : > { %4286 = vrot.lane.b32.xlu0 %v4276_v1, %s8357_s20  ;;  %v4016_v20 = vadd.f32 %v9964_v16, %v4005_v42  ;;  %4572 = vrot.lane.b32.xlu1 %v4558_v14, %s8358_s22  ;;  %5118 = vst.msk [vmem:[#allocation3 + $0x38] sm:$0xff] %vm4023_vm6, %v5113_v10  ;;  %v4273_v63 = vadd.f32 %v9964_v16, %v4268_v50 }
 0x58a   : > { %v4530_v21 = vpop.permute.xlu0 %4529  ;;  %v4289_v56 = vpop.permute.xlu1 %4288 }
 0x58b   : > { %v4544_v25 = vadd.f32 %v4530_v21, %v9852_v44  ;;  %v4021_v61 = vmax.f32 %v4016_v20, 0.0  ;;  %4303 = vst.msk [vmem:[#allocation3 + $0x10] sm:$0xff] %vm4301_vm8, %v4289_v56  ;;  %v4278_v48 = vmax.f32 %v4273_v63, 0.0  ;;  %v10478_v20 = vld [vmem:[#allocation5_spill] sm:$0xff] }
 0x58d   : > { %5093 = vrot.lane.b32.xlu0 %v5083_v59, %s8353_s21  ;;  %4027 = vst.msk [vmem:[#allocation3 + $0x30] sm:$0xff] %vm4023_vm6, %v4021_v61  ;;  %4850 = vrot.lane.b32.xlu1 %v4836_v47, %s8353_s21  ;;  %v4549_v29 = vadd.f32 %v9964_v16, %v4544_v25  ;;  %v10479_v47 = vld [vmem:[#allocation6_spill] sm:$0xff] }
 0x58e   : > { %v4534_v18 = vpop.permute.xlu0 %4533  ;;  %v3996_v44 = vpop.permute.xlu1 %3995 }
 0x58f   : > { %v4546_v7 = vadd.f32 %v4534_v18, %v9862_v62  ;;  %v4006_v5 = vadd.f32 %v3996_v44, %v9819_v39  ;;  %v4554_v51 = vmax.f32 %v4549_v29, 0.0 }
 0x591   : > { %4290 = vrot.lane.b32.xlu0 %v4278_v48, %s8357_s20  ;;  %v4017_v36 = vadd.f32 %v9964_v16, %v4006_v5  ;;  %v4551_v59 = vadd.f32 %v9964_v16, %v4546_v7  ;;  %v10480_v7 = vld [vmem:[#allocation7_spill] sm:$0xff] }
 0x592   : > { %v4808_v46 = vpop.permute.xlu0 %4807  ;;  %v4295_v26 = vpop.permute.xlu1 %4294 }
 0x593   : > { %v4822_v34 = vadd.f32 %v4808_v46, %v9878_v11  ;;  %v4022_v33 = vmax.f32 %v4017_v36, 0.0  ;;  %v4556_v39 = vmax.f32 %v4551_v59, 0.0 }
 0x595   : > { %4564 = vrot.lane.b32.xlu0 %v4554_v51, %s8358_s22  ;;  %4029 = vst.msk [vmem:[#allocation3 + $0x40] sm:$0x7] %vm4028_vm9, %v4022_v33  ;;  %v4827_v13 = vadd.f32 %v9964_v16, %v4822_v34 }
 0x596   : > { %v4812_v62 = vpop.permute.xlu0 %4811  ;;  %4307 = vst.msk [vmem:[#allocation3 + $0x40] sm:$0x7] %vm4306_vm10, %v4295_v26  ;;  %v4293_v2 = vpop.permute.xlu1 %4292 }
 0x597   : > { %v4824_v38 = vadd.f32 %v4812_v62, %v9888_v22  ;;  %4305 = vst.msk [vmem:[#allocation3 + $0x30] sm:$0xff] %vm4301_vm8, %v4293_v2  ;;  %v4832_v45 = vmax.f32 %v4827_v13, 0.0 }
 0x599   : > { %4568 = vrot.lane.b32.xlu0 %v4556_v39, %s8358_s22  ;;  %v4829_v24 = vadd.f32 %v9964_v16, %v4824_v38 }
 0x59a   : > { %v5086_v11 = vpop.permute.xlu0 %5085  ;;  %v4567_v40 = vpop.permute.xlu1 %4566 }
 0x59b   : > { %v5100_v57 = vadd.f32 %v5086_v11, %v9904_v4  ;;  %4581 = vst.msk [vmem:[#allocation3 + $0x10] sm:$0xff] %vm4579_vm11, %v4567_v40  ;;  %v4834_v60 = vmax.f32 %v4829_v24, 0.0 }
 0x59d   : > { %v5105_v58 = vadd.f32 %v9964_v16, %v5100_v57  ;;  %4842 = vrot.lane.b32.xlu0 %v4832_v45, %s8353_s21 }
 0x59e   : > { %v5090_v22 = vpop.permute.xlu0 %5089  ;;  %v4571_v32 = vpop.permute.xlu1 %4570 }
 0x59f   : > { %v5110_v8 = vmax.f32 %v5105_v58, 0.0  ;;  %v5102_v41 = vadd.f32 %v5090_v22, %v9914_v15  ;;  %4583 = vst.msk [vmem:[#allocation3 + $0x30] sm:$0xff] %vm4579_vm11, %v4571_v32 }
 0x5a1   : > { %5115 = vst.msk [vmem:[#allocation3 + $0x8] sm:$0xff] %vm4023_vm6, %v5110_v8  ;;  %v5107_v28 = vadd.f32 %v9964_v16, %v5102_v41  ;;  %4846 = vrot.lane.b32.xlu0 %v4834_v60, %s8353_s21 }
 0x5a2   : > { %v5342_v4 = vpop.permute.xlu0 %5341  ;;  %v4845_v30 = vpop.permute.xlu1 %4844 }
 0x5a3   : > { %v5112_v49 = vmax.f32 %v5107_v28, 0.0  ;;  %v5356_v0 = vadd.f32 %v5342_v4, %v9929_v54  ;;  %4859 = vst.msk [vmem:[#allocation3 + $0x10] sm:$0xff] %vm4857_vm12, %v4845_v30 }
 0x5a5   : > { %5117 = vst.msk [vmem:[#allocation3 + $0x28] sm:$0xff] %vm4023_vm6, %v5112_v49  ;;  %v5361_v15 = vadd.f32 %v9964_v16, %v5356_v0 }
 0x5a6   : > { %v5346_v17 = vpop.permute.xlu0 %5345 }
 0x5a7   : > { %v5366_v3 = vmax.f32 %v5361_v15, 0.0  ;;  %v5358_v6 = vadd.f32 %v5346_v17, %v9938_v27 }
 0x5a9   : > { %v5363_v37 = vadd.f32 %v9964_v16, %v5358_v6  ;;  %5376 = vrot.lane.b32.xlu0 %v5366_v3, %s8357_s20 }
 0x5aa   : > { %v5350_v19 = vpop.permute.xlu0 %5349  ;;  %v4849_v35 = vpop.permute.xlu1 %4848 }
 0x5ab   : > { %v5368_v1 = vmax.f32 %v5363_v37, 0.0  ;;  %v5360_v54 = vadd.f32 %v5350_v19, %v9949_v52  ;;  %4861 = vst.msk [vmem:[#allocation3 + $0x30] sm:$0xff] %vm4857_vm12, %v4849_v35 }
 0x5ad   : > { %v5365_v50 = vadd.f32 %v9964_v16, %v5360_v54  ;;  %5380 = vrot.lane.b32.xlu0 %v5368_v1, %s8357_s20 }
 0x5ae   : > { %v5618_v55 = vpop.permute.xlu0 %5617 }
 0x5af   : > { %v5370_v14 = vmax.f32 %v5365_v50, 0.0  ;;  %v5632_v9 = vadd.f32 %v5618_v55, %v9956_v43  ;;  %v5988_v55 = vld [vmem:[#allocation3 + $0x10] sm:$0xff] }
 0x5b1   : > { %v5637_v27 = vadd.f32 %v9964_v16, %v5632_v9  ;;  %5384 = vrot.lane.b32.xlu0 %v5370_v14, %s8357_s20 }
 0x5b2   : > { %v5622_v10 = vpop.permute.xlu0 %5621 }
 0x5b3   : > { %v5642_v42 = vmax.f32 %v5637_v27, 0.0  ;;  %v5634_v21 = vadd.f32 %v5622_v10, %v10478_v20 }
 0x5b5   : > { %v5639_v52 = vadd.f32 %v9964_v16, %v5634_v21  ;;  %5652 = vrot.lane.b32.xlu0 %v5642_v42, %s8358_s22  ;;  %v5992_v21 = vld [vmem:[#allocation3 + $0x30] sm:$0xff] }
 0x5b6   : > { %v5626_v63 = vpop.permute.xlu0 %5625 }
 0x5b7   : > { %v5644_v25 = vmax.f32 %v5639_v52, 0.0  ;;  %v5636_v48 = vadd.f32 %v5626_v63, %v9984_v53  ;;  %v10481_v53 = vld [vmem:[#allocation4_spill] sm:$0xff] }
 0x5b9   : > { %5656 = vrot.lane.b32.xlu0 %v5644_v25, %s8358_s22  ;;  %v5641_v46 = vadd.f32 %v9964_v16, %v5636_v48  ;;  %v5948_v25 = vld [vmem:[%s10454_s5] sm:$0xff] }
 0x5ba   : > { %v5894_v56 = vpop.permute.xlu0 %5893  ;;  %v5952_v48 = vld [vmem:[%s10454_s5 + $0x20] sm:$0xff] }
 0x5bb   : > { %v5908_v61 = vadd.f32 %v5894_v56, %v10479_v47  ;;  %v5646_v26 = vmax.f32 %v5641_v46, 0.0  ;;  %v10482_v47 = vmov 0.0   ;;  %v5958_v46 = vld [vmem:[%s10454_s5 + $0x50] sm:$0xff] }
 0x5bd   : > { %v5913_v43 = vadd.f32 %v9964_v16, %v5908_v61  ;;  %v5949_v61 = vld [vmem:[%s10454_s5 + $0x8] sm:$0xff] }
 0x5be   : > { %v5898_v18 = vpop.permute.xlu0 %5897 }
 0x5bf   : > { %v5918_v29 = vmax.f32 %v5913_v43, 0.0  ;;  %v5910_v44 = vadd.f32 %v5898_v18, %v10480_v7  ;;  %v5950_v43 = vld [vmem:[%s10454_s5 + $0x10] sm:$0xff]  ;;  %v5951_v18 = vld [vmem:[%s10454_s5 + $0x18] sm:$0xff] }
 0x5c0   : > { %v5954_v7 = vld [vmem:[%s10454_s5 + $0x30] sm:$0xff] }
 0x5c1   : > { %v5915_v5 = vadd.f32 %v9964_v16, %v5910_v44  ;;  %5928 = vrot.lane.b32.xlu0 %v5918_v29, %s8353_s21  ;;  %v5953_v29 = vld [vmem:[%s10454_s5 + $0x28] sm:$0xff]  ;;  %v5955_v44 = vld [vmem:[%s10454_s5 + $0x38] sm:$0xff] }
 0x5c2   : > { %v5902_v36 = vpop.permute.xlu0 %5901 }
 0x5c3   : > { %v5920_v51 = vmax.f32 %v5915_v5, 0.0  ;;  %v5912_v59 = vadd.f32 %v5902_v36, %v10014_v12  ;;  %v5956_v5 = vld [vmem:[%s10454_s5 + $0x40] sm:$0xff]  ;;  %v5957_v36 = vld [vmem:[%s10454_s5 + $0x48] sm:$0xff] }
 0x5c5   : > { %5932 = vrot.lane.b32.xlu0 %v5920_v51, %s8353_s21  ;;  %v5917_v33 = vadd.f32 %v9964_v16, %v5912_v59  ;;  %v5959_v51 = vld [vmem:[%s10454_s5 + $0x58] sm:$0xff]  ;;  %v5960_v59 = vld [vmem:[%s10454_s5 + $0x60] sm:$0xff] }
 0x5c6   : > { %v3992_v34 = vpop.permute.xlu0 %3991 }
 0x5c7   : > { %v4004_v62 = vadd.f32 %v3992_v34, %v10481_v53  ;;  %v5379_v39 = vpop.permute.xlu1 %5378  ;;  %v5922_v38 = vmax.f32 %v5917_v33, 0.0  ;;  %v5961_v34 = vld [vmem:[%s10454_s5 + $0x68] sm:$0xff]  ;;  %v5963_v33 = vld [vmem:[%s10454_s5 + $0x78] sm:$0xff]  ;;  %v5964_v53 = vld [vmem:[%s10454_s5 + $0x80] sm:$0xff] }
 0x5c8   : > { %5392 = vst.msk [vmem:[#allocation3 + $0x18] sm:$0xff] %vm4301_vm8, %v5379_v39  ;;  %v5966_v39 = vld [vmem:[%s10454_s5 + $0x90] sm:$0xff] }
 0x5c9   : > { %v4015_v13 = vadd.f32 %v9964_v16, %v4004_v62  ;;  %5660 = vrot.lane.b32.xlu0 %v5646_v26, %s8358_s22  ;;  %v5962_v26 = vld [vmem:[%s10454_s5 + $0x70] sm:$0xff]  ;;  %v5965_v62 = vld [vmem:[%s10454_s5 + $0x88] sm:$0xff] }
 0x5cb   : > { %v4020_v2 = vmax.f32 %v4015_v13, 0.0  ;;  %v5967_v13 = vld [vmem:[%s10454_s5 + $0x98] sm:$0xff] }
 0x5cd   : > { %4026 = vst.msk [vmem:[#allocation3 + $0x20] sm:$0xff] %vm4023_vm6, %v4020_v2  ;;  %5936 = vrot.lane.b32.xlu0 %v5922_v38, %s8353_s21  ;;  %v5968_v38 = vld [vmem:[%s10454_s5 + $0xa0] sm:$0xff]  ;;  %v5969_v2 = vld [vmem:[%s10454_s5 + $0xa8] sm:$0xff] }
 0x5cf   : > { %v5383_v12 = vpop.permute.xlu1 %5382 }
 0x5d0   : > { %5394 = vst.msk [vmem:[#allocation3 + $0x38] sm:$0xff] %vm4301_vm8, %v5383_v12  ;;  %v5970_v12 = vld [vmem:[%s10454_s5 + $0xb0] sm:$0xff] }
 0x5db   : > { %v5655_v11 = vpop.permute.xlu1 %5654 }
 0x5dc   : > { %5668 = vst.msk [vmem:[#allocation3 + $0x18] sm:$0xff] %vm4579_vm11, %v5655_v11  ;;  %v5971_v11 = vld [vmem:[%s10454_s5 + $0xb8] sm:$0xff] }
 0x5e3   : > { %v5659_v45 = vpop.permute.xlu1 %5658 }
 0x5e4   : > { %5670 = vst.msk [vmem:[#allocation3 + $0x38] sm:$0xff] %vm4579_vm11, %v5659_v45  ;;  %v5972_v45 = vld [vmem:[%s10454_s5 + $0xc0] sm:$0xff] }
 0x5ef   : > { %v5931_v24 = vpop.permute.xlu1 %5930 }
 0x5f0   : > { %5944 = vst.msk [vmem:[#allocation3 + $0x18] sm:$0xff] %vm4857_vm12, %v5931_v24  ;;  %v5973_v24 = vld [vmem:[%s10454_s5 + $0xc8] sm:$0xff] }
 0x5f7   : > { %v5935_v57 = vpop.permute.xlu1 %5934  ;;  %v5989_v54 = vld [vmem:[#allocation3 + $0x18] sm:$0xff] }
 0x5f8   : > { %5946 = vst.msk [vmem:[#allocation3 + $0x38] sm:$0xff] %vm4857_vm12, %v5935_v57  ;;  %v5974_v57 = vld [vmem:[%s10454_s5 + $0xd0] sm:$0xff] }
 0x5fb   : > { %v4287_v40 = vpop.permute.xlu0 %4286  ;;  %v4573_v58 = vpop.permute.xlu1 %4572 }
 0x5fc   : > { %4302 = vst.msk [vmem:[#allocation3] sm:$0xff] %vm4301_vm8, %v4287_v40  ;;  %v5975_v40 = vld [vmem:[%s10454_s5 + $0xd8] sm:$0xff] }
 0x5fd   : > { %4585 = vst.msk [vmem:[#allocation3 + $0x40] sm:$0x7] %vm4584_vm13, %v4573_v58  ;;  %v5976_v58 = vld [vmem:[%s10454_s5 + $0xe0] sm:$0xff] }
 0x5ff   : > { %v5094_v22 = vpop.permute.xlu0 %5093  ;;  %v4851_v8 = vpop.permute.xlu1 %4850  ;;  %v5993_v42 = vld [vmem:[#allocation3 + $0x38] sm:$0xff] }
 0x600   : > { %v5104_v60 = vadd.f32 %v5094_v22, %v9927_v31  ;;  %4863 = vst.msk [vmem:[#allocation3 + $0x40] sm:$0x7] %vm4862_vm14, %v4851_v8  ;;  %v5977_v22 = vld [vmem:[%s10454_s5 + $0xe8] sm:$0xff]  ;;  %v5979_v8 = vld [vmem:[%s10454_s5 + $0xf8] sm:$0xff] }
 0x602   : > { %v5109_v41 = vadd.f32 %v9964_v16, %v5104_v60  ;;  %v5978_v60 = vld [vmem:[%s10454_s5 + $0xf0] sm:$0xff] }
 0x603   : > { %v4291_v32 = vpop.permute.xlu0 %4290 }
 0x604   : > { %v5114_v28 = vmax.f32 %v5109_v41, 0.0  ;;  %4304 = vst.msk [vmem:[#allocation3 + $0x20] sm:$0xff] %vm4301_vm8, %v4291_v32  ;;  %v5980_v41 = vld [vmem:[%s10454_s5 + $0x100] sm:$0xff]  ;;  %v5981_v32 = vld [vmem:[%s10454_s5 + $0x108] sm:$0xff] }
 0x606   : > { %5119 = vst.msk [vmem:[#allocation3 + $0x48] sm:$0x7] %vm4028_vm9, %v5114_v28  ;;  %v5982_v28 = vld [vmem:[%s10454_s5 + $0x110] sm:$0xff] }
 0x607   : > { %v4565_v4 = vpop.permute.xlu0 %4564  ;;  %v5994_v56 = vld [vmem:[#allocation3 + $0x40] sm:$0xf] }
 0x608   : > { %4580 = vst.msk [vmem:[#allocation3] sm:$0xff] %vm4579_vm11, %v4565_v4  ;;  %v5983_v4 = vld [vmem:[%s10454_s5 + $0x118] sm:$0xff] }
 0x60b   : > { %v4569_v49 = vpop.permute.xlu0 %4568 }
 0x60c   : > { %4582 = vst.msk [vmem:[#allocation3 + $0x20] sm:$0xff] %vm4579_vm11, %v4569_v49  ;;  %v5984_v49 = vld [vmem:[%s10454_s5 + $0x120] sm:$0xff] }
 0x60f   : > { %v4843_v0 = vpop.permute.xlu0 %4842 }
 0x610   : > { %4858 = vst.msk [vmem:[#allocation3] sm:$0xff] %vm4857_vm12, %v4843_v0  ;;  %v5985_v0 = vld [vmem:[%s10454_s5 + $0x128] sm:$0xf] }
 0x613   : > { %v4847_v31 = vpop.permute.xlu0 %4846 }
 0x614   : > { %4860 = vst.msk [vmem:[#allocation3 + $0x20] sm:$0xff] %vm4857_vm12, %v4847_v31 }
 0x617   : > { %v5986_v19 = vld [vmem:[#allocation3] sm:$0xff] }
 0x618   : > { %v7416_v14 = vpack.c.bf16 %v5988_v55, %v5986_v19  ;;  %v6487_v55 = vld [vmem:[%s10455_s6] sm:$0x3f] }
 0x61b   : > { %v5377_v30 = vpop.permute.xlu0 %5376  ;;  %v5990_v9 = vld [vmem:[#allocation3 + $0x20] sm:$0xff] }
 0x61c   : > { %5391 = vst.msk [vmem:[#allocation3 + $0x8] sm:$0xff] %vm4301_vm8, %v5377_v30  ;;  %v7420_v52 = vpack.c.bf16 %v5992_v21, %v5990_v9 }
 0x61f   : > { %v5381_v16 = vpop.permute.xlu0 %5380 }
 0x620   : > { %5393 = vst.msk [vmem:[#allocation3 + $0x28] sm:$0xff] %vm4301_vm8, %v5381_v16  ;;  %v8360_v16 = vmov 1983009808  }
 0x623   : > { %v5385_v15 = vpop.permute.xlu0 %5384 }
 0x624   : > { %5395 = vst.msk [vmem:[#allocation3 + $0x48] sm:$0x7] %vm4306_vm10, %v5385_v15  ;;  %v6497_v15 = vunpack.c.l.s4 %v8360_v16 }
 0x627   : > { %v5653_v17 = vpop.permute.xlu0 %5652 }
 0x628   : > { %5667 = vst.msk [vmem:[#allocation3 + $0x8] sm:$0xff] %vm4579_vm11, %v5653_v17  ;;  %v6498_v17 = vunpack.c.0.s8 %v6497_v15 }
 0x62b   : > { %v5657_v3 = vpop.permute.xlu0 %5656 }
 0x62c   : > { %5669 = vst.msk [vmem:[#allocation3 + $0x28] sm:$0xff] %vm4579_vm11, %v5657_v3  ;;  %v6500_v3 = vshrl.u32 %v3751_v23, 7 }
 0x633   : > { %v5929_v6 = vpop.permute.xlu0 %5928 }
 0x634   : > { %5943 = vst.msk [vmem:[#allocation3 + $0x8] sm:$0xff] %vm4857_vm12, %v5929_v6 }
 0x637   : > { %v5933_v37 = vpop.permute.xlu0 %5932 }
 0x638   : > { %5945 = vst.msk [vmem:[#allocation3 + $0x28] sm:$0xff] %vm4857_vm12, %v5933_v37 }
 0x63b   : > { %v5661_v35 = vpop.permute.xlu0 %5660  ;;  %v5987_v1 = vld [vmem:[#allocation3 + $0x8] sm:$0xff] }
 0x63c   : > { %5671 = vst.msk [vmem:[#allocation3 + $0x48] sm:$0x7] %vm4584_vm13, %v5661_v35  ;;  %v7414_v50 = vpack.c.bf16 %v5989_v54, %v5987_v1  ;;  %v6501_v1 = vsub.s32 %v6498_v17, %v6500_v3 }
 0x63e   : > { %7415 = vmatprep.subr.bf16.mxu1 %v7414_v50  ;;  %v10428_v9 = vrot.slane %v6487_v55, %v6501_v1 }
 0x63f   : > { %v5937_v27 = vpop.permute.xlu0 %5936  ;;  %7417 = vmatpush1.bf16.msra.mxu1 %v7416_v14  ;;  %v5991_v10 = vld [vmem:[#allocation3 + $0x28] sm:$0xff] }
 0x640   : > { %5947 = vst.msk [vmem:[#allocation3 + $0x48] sm:$0x7] %vm4862_vm14, %v5937_v27  ;;  %v7418_v20 = vpack.c.bf16 %v5993_v42, %v5991_v10  ;;  %v6510_v23 = vcombine.high %v10428_v9, %v10428_v9 }
 0x642   : > { %7419 = vmatprep.subr.bf16.mxu1 %v7418_v20 }
 0x643   : > { %7421 = vmatpush1.bf16.msra.mxu1 %v7420_v52 }
 0x647   : > { %v5995_v63 = vld [vmem:[#allocation3 + $0x48] sm:$0xf] }
 0x648   : > { %7135 = vmatprep.subr.msk.mxu1 %vm6111_vm15, %v5995_v63 }
 0x649   : > { %7136 = vmatpush1.msk.msra.mxu1 %vm6111_vm15, %v5994_v56 }
 0x64a   : > { %7137 = vmatmul.mubr.msk.f32.vlgmr.msra.gmra.mrb[158].mxu1 %vm5996_vm0, %v5948_v25 }
 0x64b   : > { %6188 = vmatprep.mubr.f32.mxu1 %v10482_v47 }
 0x64e   : > { %7138 = vmatmul.mubr.msk.f32.gmra.mrb[160].mxu1 %vm5996_vm0, %v5949_v61 }
 0x64f   : > { %6194 = vmatprep.mubr.f32.mxu1 %v10482_v47 }
 0x652   : > { %7139 = vmatmul.mubr.msk.f32.gmra.mrb[162].mxu1 %vm5996_vm0, %v5950_v43  ;;  %v6495_v43 = vcombine.high %v6487_v55, %v6487_v55 }
 0x653   : > { %6200 = vmatprep.mubr.f32.mxu1 %v10482_v47 }
 0x656   : > { %7140 = vmatmul.mubr.msk.f32.gmra.mrb[164].mxu1 %vm5996_vm0, %v5951_v18 }
 0x657   : > { %6206 = vmatprep.mubr.f32.mxu1 %v10482_v47 }
 0x65a   : > { %7141 = vmatmul.mubr.msk.f32.gmra.mrb[166].mxu1 %vm5996_vm0, %v5952_v48 }
 0x65b   : > { %6212 = vmatprep.mubr.f32.mxu1 %v10482_v47 }
 0x65e   : > { %7142 = vmatmul.mubr.msk.f32.gmra.mrb[168].mxu1 %vm5996_vm0, %v5953_v29 }
 0x65f   : > { %6218 = vmatprep.mubr.f32.mxu1 %v10482_v47 }
 0x662   : > { %7143 = vmatmul.mubr.msk.f32.gmra.mrb[170].mxu1 %vm5996_vm0, %v5954_v7  ;;  %v10432_v7 = vrot.slane %v6495_v43, %v6501_v1 }
 0x663   : > { %6224 = vmatprep.mubr.f32.mxu1 %v10482_v47 }
 0x666   : > { %7144 = vmatmul.mubr.msk.f32.gmra.mrb[172].mxu1 %vm5996_vm0, %v5955_v44 }
 0x667   : > { %6230 = vmatprep.mubr.f32.mxu1 %v10482_v47 }
 0x66a   : > { %7145 = vmatmul.mubr.msk.f32.gmra.mrb[174].mxu1 %vm5996_vm0, %v5956_v5 }
 0x66b   : > { %6236 = vmatprep.mubr.f32.mxu1 %v10482_v47 }
 0x66e   : > { %7146 = vmatmul.mubr.msk.f32.gmra.mrb[176].mxu1 %vm5996_vm0, %v5957_v36 }
 0x66f   : > { %6242 = vmatprep.mubr.f32.mxu1 %v10482_v47 }
 0x672   : > { %7147 = vmatmul.mubr.msk.f32.gmra.mrb[178].mxu1 %vm5996_vm0, %v5958_v46 }
 0x673   : > { %6248 = vmatprep.mubr.f32.mxu1 %v10482_v47 }
 0x676   : > { %7148 = vmatmul.mubr.msk.f32.gmra.mrb[180].mxu1 %vm5996_vm0, %v5959_v51 }
 0x677   : > { %6254 = vmatprep.mubr.f32.mxu1 %v10482_v47 }
 0x67a   : > { %7149 = vmatmul.mubr.msk.f32.gmra.mrb[182].mxu1 %vm5996_vm0, %v5960_v59 }
 0x67b   : > { %6260 = vmatprep.mubr.f32.mxu1 %v10482_v47 }
 0x67e   : > { %7150 = vmatmul.mubr.msk.f32.gmra.mrb[184].mxu1 %vm5996_vm0, %v5961_v34 }
 0x67f   : > { %6266 = vmatprep.mubr.f32.mxu1 %v10482_v47 }
 0x682   : > { %7151 = vmatmul.mubr.msk.f32.gmra.mrb[186].mxu1 %vm5996_vm0, %v5962_v26 }
 0x683   : > { %6272 = vmatprep.mubr.f32.mxu1 %v10482_v47 }
 0x686   : > { %7152 = vmatmul.mubr.msk.f32.gmra.mrb[188].mxu1 %vm5996_vm0, %v5963_v33 }
 0x687   : > { %6278 = vmatprep.mubr.f32.mxu1 %v10482_v47 }
 0x68a   : > { %7153 = vmatmul.mubr.msk.f32.gmra.mrb[190].mxu1 %vm5996_vm0, %v5964_v53 }
 0x68b   : > { %6284 = vmatprep.mubr.f32.mxu1 %v10482_v47 }
 0x68e   : > { %7154 = vmatmul.mubr.msk.f32.gmra.mrb[192].mxu1 %vm5996_vm0, %v5965_v62 }
 0x68f   : > { %6290 = vmatprep.mubr.f32.mxu1 %v10482_v47 }
 0x692   : > { %7155 = vmatmul.mubr.msk.f32.gmra.mrb[194].mxu1 %vm5996_vm0, %v5966_v39 }
 0x693   : > { %6296 = vmatprep.mubr.f32.mxu1 %v10482_v47 }
 0x696   : > { %7156 = vmatmul.mubr.msk.f32.gmra.mrb[196].mxu1 %vm5996_vm0, %v5967_v13 }
 0x697   : > { %6302 = vmatprep.mubr.f32.mxu1 %v10482_v47 }
 0x69a   : > { %7157 = vmatmul.mubr.msk.f32.gmra.mrb[198].mxu1 %vm5996_vm0, %v5968_v38 }
 0x69b   : > { %6308 = vmatprep.mubr.f32.mxu1 %v10482_v47 }
 0x69e   : > { %7158 = vmatmul.mubr.msk.f32.gmra.mrb[200].mxu1 %vm5996_vm0, %v5969_v2 }
 0x69f   : > { %6314 = vmatprep.mubr.f32.mxu1 %v10482_v47 }
 0x6a2   : > { %7159 = vmatmul.mubr.msk.f32.gmra.mrb[202].mxu1 %vm5996_vm0, %v5970_v12 }
 0x6a3   : > { %6320 = vmatprep.mubr.f32.mxu1 %v10482_v47 }
 0x6a6   : > { %7160 = vmatmul.mubr.msk.f32.gmra.mrb[204].mxu1 %vm5996_vm0, %v5971_v11  ;;  %v6488_v11 = vld [vmem:[%s10456_s7] sm:$0x3] }
 0x6a7   : > { %6326 = vmatprep.mubr.f32.mxu1 %v10482_v47  ;;  %6491 = vperm.xlu0 %7886, %v6488_v11  }
 0x6aa   : > { %7161 = vmatmul.mubr.msk.f32.gmra.mrb[206].mxu1 %vm5996_vm0, %v5972_v45 }
 0x6ab   : > { %6332 = vmatprep.mubr.f32.mxu1 %v10482_v47 }
 0x6ae   : > { %7162 = vmatmul.mubr.msk.f32.gmra.mrb[208].mxu1 %vm5996_vm0, %v5973_v24 }
 0x6af   : > { %6338 = vmatprep.mubr.f32.mxu1 %v10482_v47 }
 0x6b2   : > { %7163 = vmatmul.mubr.msk.f32.gmra.mrb[210].mxu1 %vm5996_vm0, %v5974_v57 }
 0x6b3   : > { %6344 = vmatprep.mubr.f32.mxu1 %v10482_v47 }
 0x6b6   : > { %7164 = vmatmul.mubr.msk.f32.gmra.mrb[212].mxu1 %vm5996_vm0, %v5975_v40 }
 0x6b7   : > { %6350 = vmatprep.mubr.f32.mxu1 %v10482_v47 }
 0x6ba   : > { %7165 = vmatmul.mubr.msk.f32.gmra.mrb[214].mxu1 %vm5996_vm0, %v5976_v58 }
 0x6bb   : > { %6356 = vmatprep.mubr.f32.mxu1 %v10482_v47 }
 0x6be   : > { %7166 = vmatmul.mubr.msk.f32.gmra.mrb[216].mxu1 %vm5996_vm0, %v5977_v22 }
 0x6bf   : > { %6362 = vmatprep.mubr.f32.mxu1 %v10482_v47 }
 0x6c2   : > { %7167 = vmatmul.mubr.msk.f32.gmra.mrb[218].mxu1 %vm5996_vm0, %v5978_v60 }
 0x6c3   : > { %6368 = vmatprep.mubr.f32.mxu1 %v10482_v47 }
 0x6c6   : > { %7168 = vmatmul.mubr.msk.f32.gmra.mrb[220].mxu1 %vm5996_vm0, %v5979_v8 }
 0x6c7   : > { %6374 = vmatprep.mubr.f32.mxu1 %v10482_v47 }
 0x6ca   : > { %7169 = vmatmul.mubr.msk.f32.gmra.mrb[222].mxu1 %vm5996_vm0, %v5980_v41 }
 0x6cb   : > { %6380 = vmatprep.mubr.f32.mxu1 %v10482_v47 }
 0x6ce   : > { %7170 = vmatmul.mubr.msk.f32.gmra.mrb[224].mxu1 %vm5996_vm0, %v5981_v32 }
 0x6cf   : > { %6386 = vmatprep.mubr.f32.mxu1 %v10482_v47 }
 0x6d2   : > { %7171 = vmatmul.mubr.msk.f32.gmra.mrb[226].mxu1 %vm5996_vm0, %v5982_v28 }
 0x6d3   : > { %6392 = vmatprep.mubr.f32.mxu1 %v10482_v47 }
 0x6d6   : > { %7172 = vmatmul.mubr.msk.f32.gmra.mrb[228].mxu1 %vm5996_vm0, %v5983_v4 }
 0x6d7   : > { %6398 = vmatprep.mubr.f32.mxu1 %v10482_v47 }
 0x6da   : > { %7173 = vmatmul.mubr.msk.f32.gmra.mrb[230].mxu1 %vm5996_vm0, %v5984_v49 }
 0x6db   : > { %6404 = vmatprep.mubr.f32.mxu1 %v10482_v47 }
 0x6de   : > { %7174 = vmatmul.mubr.msk.f32.gmra.mrb[232].mxu1 %vm5996_vm0, %v5985_v0 }
 0x6df   : > { %6586 = vmatprep.mubr.f32.mxu1 %v6510_v23 }
 0x71d   : > { %v6184_v31 = vpop.f32.mrb[158].mxu1 }
 0x71e   : > { %v6186_v30 = vpop.f32.mrb[159].mxu1  ;;  %v6411_v37 = vmax.f32 %v6184_v31, 0.0 }
 0x71f   : > { %v6412_v54 = vmax.f32 %v6186_v30, 0.0 }
 0x721   : > { %v6190_v6 = vpop.f32.mrb[160].mxu1 }
 0x722   : > { %v6413_v19 = vmax.f32 %v6190_v6, 0.0  ;;  %v6192_v35 = vpop.f32.mrb[161].mxu1 }
 0x723   : > { %v6414_v50 = vmax.f32 %v6192_v35, 0.0 }
 0x724   : > { %v7424_v14 = vpack.c.bf16 %v6413_v19, %v6411_v37 }
 0x725   : > { %v7422_v27 = vpack.c.bf16 %v6414_v50, %v6412_v54  ;;  %v6196_v10 = vpop.f32.mrb[162].mxu1 }
 0x726   : > { %v6198_v42 = vpop.f32.mrb[163].mxu1  ;;  %v6415_v21 = vmax.f32 %v6196_v10, 0.0 }
 0x727   : > { %7423 = vmatprep.subr.bf16.mxu1 %v7422_v27  ;;  %v6416_v25 = vmax.f32 %v6198_v42, 0.0 }
 0x728   : > { %7425 = vmatpush1.bf16.msra.mxu1 %v7424_v14 }
 0x729   : > { %v6202_v20 = vpop.f32.mrb[164].mxu1 }
 0x72a   : > { %v6417_v52 = vmax.f32 %v6202_v20, 0.0  ;;  %v6204_v63 = vpop.f32.mrb[165].mxu1 }
 0x72b   : > { %v6418_v56 = vmax.f32 %v6204_v63, 0.0 }
 0x72c   : > { %v7428_v61 = vpack.c.bf16 %v6417_v52, %v6415_v21 }
 0x72d   : > { %v7426_v18 = vpack.c.bf16 %v6418_v56, %v6416_v25  ;;  %v6208_v48 = vpop.f32.mrb[166].mxu1 }
 0x72e   : > { %v6210_v29 = vpop.f32.mrb[167].mxu1  ;;  %v6419_v5 = vmax.f32 %v6208_v48, 0.0 }
 0x72f   : > { %7427 = vmatprep.subr.bf16.mxu1 %v7426_v18  ;;  %v6420_v51 = vmax.f32 %v6210_v29, 0.0 }
 0x730   : > { %7429 = vmatpush1.bf16.msra.mxu1 %v7428_v61 }
 0x731   : > { %v6214_v44 = vpop.f32.mrb[168].mxu1 }
 0x732   : > { %v6421_v36 = vmax.f32 %v6214_v44, 0.0  ;;  %v6216_v46 = vpop.f32.mrb[169].mxu1 }
 0x733   : > { %v6422_v59 = vmax.f32 %v6216_v46, 0.0 }
 0x734   : > { %v7432_v34 = vpack.c.bf16 %v6421_v36, %v6419_v5 }
 0x735   : > { %v7430_v26 = vpack.c.bf16 %v6422_v59, %v6420_v51  ;;  %v6220_v33 = vpop.f32.mrb[170].mxu1 }
 0x736   : > { %v6222_v53 = vpop.f32.mrb[171].mxu1  ;;  %v6423_v39 = vmax.f32 %v6220_v33, 0.0 }
 0x737   : > { %7431 = vmatprep.subr.bf16.mxu1 %v7430_v26  ;;  %v6424_v2 = vmax.f32 %v6222_v53, 0.0 }
 0x738   : > { %7433 = vmatpush1.bf16.msra.mxu1 %v7432_v34 }
 0x739   : > { %v6226_v62 = vpop.f32.mrb[172].mxu1 }
 0x73a   : > { %v6425_v13 = vmax.f32 %v6226_v62, 0.0  ;;  %v6228_v38 = vpop.f32.mrb[173].mxu1 }
 0x73b   : > { %v6426_v12 = vmax.f32 %v6228_v38, 0.0 }
 0x73c   : > { %v7436_v45 = vpack.c.bf16 %v6425_v13, %v6423_v39 }
 0x73d   : > { %v7434_v24 = vpack.c.bf16 %v6426_v12, %v6424_v2  ;;  %v6232_v57 = vpop.f32.mrb[174].mxu1 }
 0x73e   : > { %v6234_v40 = vpop.f32.mrb[175].mxu1  ;;  %v6427_v22 = vmax.f32 %v6232_v57, 0.0 }
 0x73f   : > { %7435 = vmatprep.subr.bf16.mxu1 %v7434_v24  ;;  %v6428_v41 = vmax.f32 %v6234_v40, 0.0 }
 0x740   : > { %7437 = vmatpush1.bf16.msra.mxu1 %v7436_v45 }
 0x741   : > { %v6238_v58 = vpop.f32.mrb[176].mxu1 }
 0x742   : > { %v6429_v60 = vmax.f32 %v6238_v58, 0.0  ;;  %v6240_v8 = vpop.f32.mrb[177].mxu1 }
 0x743   : > { %v6430_v32 = vmax.f32 %v6240_v8, 0.0 }
 0x744   : > { %v7440_v28 = vpack.c.bf16 %v6429_v60, %v6427_v22 }
 0x745   : > { %v7438_v4 = vpack.c.bf16 %v6430_v32, %v6428_v41  ;;  %v6244_v49 = vpop.f32.mrb[178].mxu1 }
 0x746   : > { %v6246_v0 = vpop.f32.mrb[179].mxu1  ;;  %v6431_v30 = vmax.f32 %v6244_v49, 0.0 }
 0x747   : > { %7439 = vmatprep.subr.bf16.mxu1 %v7438_v4  ;;  %v6432_v17 = vmax.f32 %v6246_v0, 0.0 }
 0x748   : > { %7441 = vmatpush1.bf16.msra.mxu1 %v7440_v28 }
 0x749   : > { %v6250_v31 = vpop.f32.mrb[180].mxu1 }
 0x74a   : > { %v6433_v16 = vmax.f32 %v6250_v31, 0.0  ;;  %v6252_v15 = vpop.f32.mrb[181].mxu1 }
 0x74b   : > { %v6434_v3 = vmax.f32 %v6252_v15, 0.0 }
 0x74c   : > { %v7444_v6 = vpack.c.bf16 %v6433_v16, %v6431_v30 }
 0x74d   : > { %v7442_v37 = vpack.c.bf16 %v6434_v3, %v6432_v17  ;;  %v6256_v19 = vpop.f32.mrb[182].mxu1 }
 0x74e   : > { %v6258_v35 = vpop.f32.mrb[183].mxu1  ;;  %v6435_v54 = vmax.f32 %v6256_v19, 0.0 }
 0x74f   : > { %7443 = vmatprep.subr.bf16.mxu1 %v7442_v37  ;;  %v6436_v14 = vmax.f32 %v6258_v35, 0.0 }
 0x750   : > { %7445 = vmatpush1.bf16.msra.mxu1 %v7444_v6 }
 0x751   : > { %v6262_v1 = vpop.f32.mrb[184].mxu1 }
 0x752   : > { %v6437_v50 = vmax.f32 %v6262_v1, 0.0  ;;  %v6264_v55 = vpop.f32.mrb[185].mxu1 }
 0x753   : > { %v6438_v27 = vmax.f32 %v6264_v55, 0.0 }
 0x754   : > { %v7448_v10 = vpack.c.bf16 %v6437_v50, %v6435_v54 }
 0x755   : > { %v7446_v42 = vpack.c.bf16 %v6438_v27, %v6436_v14  ;;  %v6268_v23 = vpop.f32.mrb[186].mxu1 }
 0x756   : > { %v6270_v20 = vpop.f32.mrb[187].mxu1  ;;  %v6439_v52 = vmax.f32 %v6268_v23, 0.0 }
 0x757   : > { %7447 = vmatprep.subr.bf16.mxu1 %v7446_v42  ;;  %v6440_v56 = vmax.f32 %v6270_v20, 0.0 }
 0x758   : > { %7449 = vmatpush1.bf16.msra.mxu1 %v7448_v10 }
 0x759   : > { %v6274_v21 = vpop.f32.mrb[188].mxu1 }
 0x75a   : > { %v6441_v63 = vmax.f32 %v6274_v21, 0.0  ;;  %v6276_v25 = vpop.f32.mrb[189].mxu1 }
 0x75b   : > { %v6442_v61 = vmax.f32 %v6276_v25, 0.0 }
 0x75c   : > { %v7452_v43 = vpack.c.bf16 %v6441_v63, %v6439_v52 }
 0x75d   : > { %v7450_v18 = vpack.c.bf16 %v6442_v61, %v6440_v56  ;;  %v6280_v48 = vpop.f32.mrb[190].mxu1 }
 0x75e   : > { %v6282_v29 = vpop.f32.mrb[191].mxu1  ;;  %v6443_v5 = vmax.f32 %v6280_v48, 0.0 }
 0x75f   : > { %7451 = vmatprep.subr.bf16.mxu1 %v7450_v18  ;;  %v6444_v51 = vmax.f32 %v6282_v29, 0.0 }
 0x760   : > { %7453 = vmatpush1.bf16.msra.mxu1 %v7452_v43 }
 0x761   : > { %v6286_v44 = vpop.f32.mrb[192].mxu1 }
 0x762   : > { %v6445_v36 = vmax.f32 %v6286_v44, 0.0  ;;  %v6288_v46 = vpop.f32.mrb[193].mxu1 }
 0x763   : > { %v6446_v59 = vmax.f32 %v6288_v46, 0.0 }
 0x764   : > { %v7456_v34 = vpack.c.bf16 %v6445_v36, %v6443_v5 }
 0x765   : > { %v7454_v26 = vpack.c.bf16 %v6446_v59, %v6444_v51  ;;  %v6292_v33 = vpop.f32.mrb[194].mxu1 }
 0x766   : > { %v6294_v53 = vpop.f32.mrb[195].mxu1  ;;  %v6447_v39 = vmax.f32 %v6292_v33, 0.0 }
 0x767   : > { %7455 = vmatprep.subr.bf16.mxu1 %v7454_v26  ;;  %v6448_v2 = vmax.f32 %v6294_v53, 0.0 }
 0x768   : > { %7457 = vmatpush1.bf16.msra.mxu1 %v7456_v34 }
 0x769   : > { %v6298_v62 = vpop.f32.mrb[196].mxu1 }
 0x76a   : > { %v6449_v13 = vmax.f32 %v6298_v62, 0.0  ;;  %v6300_v38 = vpop.f32.mrb[197].mxu1 }
 0x76b   : > { %v6450_v12 = vmax.f32 %v6300_v38, 0.0 }
 0x76c   : > { %v7460_v11 = vpack.c.bf16 %v6449_v13, %v6447_v39 }
 0x76d   : > { %v7458_v45 = vpack.c.bf16 %v6450_v12, %v6448_v2  ;;  %v6304_v24 = vpop.f32.mrb[198].mxu1 }
 0x76e   : > { %v6306_v57 = vpop.f32.mrb[199].mxu1  ;;  %v6451_v58 = vmax.f32 %v6304_v24, 0.0 }
 0x76f   : > { %7459 = vmatprep.subr.bf16.mxu1 %v7458_v45  ;;  %v6452_v8 = vmax.f32 %v6306_v57, 0.0 }
 0x770   : > { %7461 = vmatpush1.bf16.msra.mxu1 %v7460_v11 }
 0x771   : > { %v6310_v40 = vpop.f32.mrb[200].mxu1 }
 0x772   : > { %v6453_v22 = vmax.f32 %v6310_v40, 0.0  ;;  %v6312_v60 = vpop.f32.mrb[201].mxu1 }
 0x773   : > { %v6454_v41 = vmax.f32 %v6312_v60, 0.0 }
 0x774   : > { %v7464_v32 = vpack.c.bf16 %v6453_v22, %v6451_v58 }
 0x775   : > { %v7462_v28 = vpack.c.bf16 %v6454_v41, %v6452_v8  ;;  %v6316_v4 = vpop.f32.mrb[202].mxu1 }
 0x776   : > { %v6318_v49 = vpop.f32.mrb[203].mxu1  ;;  %v6455_v31 = vmax.f32 %v6316_v4, 0.0 }
 0x777   : > { %7463 = vmatprep.subr.bf16.mxu1 %v7462_v28  ;;  %v6456_v15 = vmax.f32 %v6318_v49, 0.0 }
 0x778   : > { %7465 = vmatpush1.bf16.msra.mxu1 %v7464_v32 }
 0x779   : > { %v6322_v0 = vpop.f32.mrb[204].mxu1 }
 0x77a   : > { %v6457_v30 = vmax.f32 %v6322_v0, 0.0  ;;  %v6324_v16 = vpop.f32.mrb[205].mxu1 }
 0x77b   : > { %v6458_v17 = vmax.f32 %v6324_v16, 0.0 }
 0x77c   : > { %v7468_v3 = vpack.c.bf16 %v6457_v30, %v6455_v31 }
 0x77d   : > { %v7466_v6 = vpack.c.bf16 %v6458_v17, %v6456_v15  ;;  %v6328_v37 = vpop.f32.mrb[206].mxu1 }
 0x77e   : > { %v6330_v19 = vpop.f32.mrb[207].mxu1  ;;  %v6459_v1 = vmax.f32 %v6328_v37, 0.0 }
 0x77f   : > { %7467 = vmatprep.subr.bf16.mxu1 %v7466_v6  ;;  %v6460_v55 = vmax.f32 %v6330_v19, 0.0 }
 0x780   : > { %7469 = vmatpush1.bf16.msra.mxu1 %v7468_v3 }
 0x781   : > { %v6334_v35 = vpop.f32.mrb[208].mxu1 }
 0x782   : > { %v6461_v54 = vmax.f32 %v6334_v35, 0.0  ;;  %v6336_v50 = vpop.f32.mrb[209].mxu1 }
 0x783   : > { %v6462_v14 = vmax.f32 %v6336_v50, 0.0 }
 0x784   : > { %v7472_v27 = vpack.c.bf16 %v6461_v54, %v6459_v1 }
 0x785   : > { %v7470_v10 = vpack.c.bf16 %v6462_v14, %v6460_v55  ;;  %v6340_v42 = vpop.f32.mrb[210].mxu1  ;;  %v6492_v14 = vpop.permute.xlu0 %6491 }
 0x786   : > { %v6342_v23 = vpop.f32.mrb[211].mxu1  ;;  %v6463_v21 = vmax.f32 %v6340_v42, 0.0 }
 0x787   : > { %7471 = vmatprep.subr.bf16.mxu1 %v7470_v10  ;;  %v6464_v25 = vmax.f32 %v6342_v23, 0.0 }
 0x788   : > { %7473 = vmatpush1.bf16.msra.mxu1 %v7472_v27 }
 0x789   : > { %v6346_v20 = vpop.f32.mrb[212].mxu1 }
 0x78a   : > { %v6465_v52 = vmax.f32 %v6346_v20, 0.0  ;;  %v6348_v63 = vpop.f32.mrb[213].mxu1 }
 0x78b   : > { %v6466_v56 = vmax.f32 %v6348_v63, 0.0 }
 0x78c   : > { %v7476_v61 = vpack.c.bf16 %v6465_v52, %v6463_v21 }
 0x78d   : > { %v7474_v43 = vpack.c.bf16 %v6466_v56, %v6464_v25  ;;  %v6352_v18 = vpop.f32.mrb[214].mxu1 }
 0x78e   : > { %v6354_v48 = vpop.f32.mrb[215].mxu1  ;;  %v6467_v44 = vmax.f32 %v6352_v18, 0.0 }
 0x78f   : > { %7475 = vmatprep.subr.bf16.mxu1 %v7474_v43  ;;  %v6468_v46 = vmax.f32 %v6354_v48, 0.0 }
 0x790   : > { %7477 = vmatpush1.bf16.msra.mxu1 %v7476_v61 }
 0x791   : > { %v6358_v29 = vpop.f32.mrb[216].mxu1 }
 0x792   : > { %v6469_v5 = vmax.f32 %v6358_v29, 0.0  ;;  %v6360_v36 = vpop.f32.mrb[217].mxu1 }
 0x793   : > { %v6470_v51 = vmax.f32 %v6360_v36, 0.0 }
 0x794   : > { %v7480_v59 = vpack.c.bf16 %v6469_v5, %v6467_v44 }
 0x795   : > { %v7478_v34 = vpack.c.bf16 %v6470_v51, %v6468_v46  ;;  %v6364_v26 = vpop.f32.mrb[218].mxu1 }
 0x796   : > { %v6366_v33 = vpop.f32.mrb[219].mxu1  ;;  %v6471_v62 = vmax.f32 %v6364_v26, 0.0 }
 0x797   : > { %7479 = vmatprep.subr.bf16.mxu1 %v7478_v34  ;;  %v6472_v38 = vmax.f32 %v6366_v33, 0.0 }
 0x798   : > { %7481 = vmatpush1.bf16.msra.mxu1 %v7480_v59 }
 0x799   : > { %v6370_v53 = vpop.f32.mrb[220].mxu1 }
 0x79a   : > { %v6473_v39 = vmax.f32 %v6370_v53, 0.0  ;;  %v6372_v13 = vpop.f32.mrb[221].mxu1 }
 0x79b   : > { %v6474_v2 = vmax.f32 %v6372_v13, 0.0 }
 0x79c   : > { %v7484_v12 = vpack.c.bf16 %v6473_v39, %v6471_v62 }
 0x79d   : > { %v7482_v11 = vpack.c.bf16 %v6474_v2, %v6472_v38  ;;  %v6376_v45 = vpop.f32.mrb[222].mxu1 }
 0x79e   : > { %v6378_v24 = vpop.f32.mrb[223].mxu1  ;;  %v6475_v40 = vmax.f32 %v6376_v45, 0.0 }
 0x79f   : > { %7483 = vmatprep.subr.bf16.mxu1 %v7482_v11  ;;  %v6476_v60 = vmax.f32 %v6378_v24, 0.0 }
 0x7a0   : > { %7485 = vmatpush1.bf16.msra.mxu1 %v7484_v12 }
 0x7a1   : > { %v6382_v57 = vpop.f32.mrb[224].mxu1 }
 0x7a2   : > { %v6477_v58 = vmax.f32 %v6382_v57, 0.0  ;;  %v6384_v22 = vpop.f32.mrb[225].mxu1 }
 0x7a3   : > { %v6478_v8 = vmax.f32 %v6384_v22, 0.0  ;;  %6587 = vmatmul.mubr.f32.vlgmr.msra.gmra.mrb[234].mxu1 %v10428_v9 }
 0x7a4   : > { %v7488_v41 = vpack.c.bf16 %v6477_v58, %v6475_v40  ;;  %6657 = vmatprep.mubr.f32.mxu1 %v10482_v47 }
 0x7a5   : > { %v7486_v32 = vpack.c.bf16 %v6478_v8, %v6476_v60  ;;  %v6388_v28 = vpop.f32.mrb[226].mxu1 }
 0x7a6   : > { %v6390_v4 = vpop.f32.mrb[227].mxu1  ;;  %v6479_v0 = vmax.f32 %v6388_v28, 0.0 }
 0x7a7   : > { %7487 = vmatprep.subr.bf16.mxu1 %v7486_v32  ;;  %v6480_v16 = vmax.f32 %v6390_v4, 0.0 }
 0x7a8   : > { %7489 = vmatpush1.bf16.msra.mxu1 %v7488_v41 }
 0x7a9   : > { %v6394_v49 = vpop.f32.mrb[228].mxu1 }
 0x7aa   : > { %v6481_v31 = vmax.f32 %v6394_v49, 0.0  ;;  %v6396_v30 = vpop.f32.mrb[229].mxu1 }
 0x7ab   : > { %v6482_v15 = vmax.f32 %v6396_v30, 0.0 }
 0x7ac   : > { %v7492_v17 = vpack.c.bf16 %v6481_v31, %v6479_v0 }
 0x7ad   : > { %v7490_v3 = vpack.c.bf16 %v6482_v15, %v6480_v16  ;;  %v6400_v6 = vpop.f32.mrb[230].mxu1 }
 0x7ae   : > { %v6402_v37 = vpop.f32.mrb[231].mxu1  ;;  %v6483_v9 = vmax.f32 %v6400_v6, 0.0 }
 0x7af   : > { %7491 = vmatprep.subr.bf16.mxu1 %v7490_v3  ;;  %v6484_v1 = vmax.f32 %v6402_v37, 0.0 }
 0x7b0   : > { %7493 = vmatpush1.bf16.msra.mxu1 %v7492_v17 }
 0x7b1   : > { %v6406_v47 = vpop.f32.mrb[232].mxu1 }
 0x7b2   : > { %v6485_v19 = vmax.f32 %v6406_v47, 0.0  ;;  %v6408_v35 = vpop.f32.mrb[233].mxu1 }
 0x7b3   : > { %v6486_v54 = vmax.f32 %v6408_v35, 0.0 }
 0x7b4   : > { %v7497_v50 = vpack.c.bf16 %v6485_v19, %v6483_v9 }
 0x7b5   : > { %v7494_v55 = vpack.c.bf16 %v6486_v54, %v6484_v1 }
 0x7b7   : > { %7496 = vmatprep.subr.msk.bf16.mxu1 %vm7495_vm2, %v7494_v55 }
 0x7b8   : > { %7499 = vmatpush1.bf16.msk.msra.mxu1 %vm7495_vm2, %v7497_v50 }
 0x7bb   : > { %7177 = vmatmul.mubr.msk.f32.vlgmr.msra.gmra.mrb[234].mxu1 %vm6513_vm3, %v10432_v7 }
 0x88e   : > { %v6659_v27 = vpop.f32.mrb[234].mxu1 }
 0x88f   : > { %v7542_v10 = vadd.f32 %v6659_v27, %v6492_v14  ;;  %v6661_v42 = vpop.f32.mrb[235].mxu1 }
 0x890   : > { %v7543_v23 = vadd.f32 %v6661_v42, %v6492_v14 }
 0x892   : > { %v6666_v20 = vcombine.low %v7542_v10, %v7543_v23 }
 0x894   : > { %7178 = vst.sshfl [vmem:[%s310_s26] sm:$0x33 pattern:$0x76325410] %v6666_v20 }
 0x895 PF: > { %s18_s27 = sadd.s32 1, %s8349_s27  }
 0x896   : > { %p15_p5 = scmp.ge.s32.totalorder %s18_s27, 4  }
 0x898   :  { %17 = sbr.rel (!%p15_p5) target bundleno = 1 (0x1), region = 83 }

</bundles_post_ra>
